<compile_context>
chip_gen: v5e
topology: v5e:2x2
jax: 0.10.0
libtpu: 0.0.40
codegen_flags: <defaults>
</compile_context>

<pallas_src>
import functools

import jax
import jax.numpy as jnp
from jax import lax
from jax.experimental import pallas as pl
from jax.experimental.pallas import tpu as pltpu


def _round_up(x, m):
    return (x + m - 1) // m * m


def _pick_lane_tile(length):
    # >=512 lanes per tile once sequences are long enough; 128 otherwise.
    return 512 if length >= 512 else 128


# ---------------------------------------------------------------------------
# Pallas kernels (all NCL: channels on sublanes, sequence position on lanes)
# ---------------------------------------------------------------------------

def _pointwise_mlp_kernel(x_ref, w1_ref, b1_ref, w2_ref, b2_ref, o_ref):
    """FCLayer: relu(W2 @ relu(W1 @ x + b1) + b2), x is (C_in, TL)."""
    x = x_ref[...]
    h = jnp.dot(w1_ref[...], x, preferred_element_type=jnp.float32) + b1_ref[...]
    h = jnp.maximum(h, 0.0)
    # TODO(synk): dropout between the two 1x1 convs is identity in eval mode.
    y = jnp.dot(w2_ref[...], h, preferred_element_type=jnp.float32) + b2_ref[...]
    y = jnp.maximum(y, 0.0)
    o_ref[...] = y.astype(o_ref.dtype)


def _cnn_layer_kernel(xu_ref, xres_ref, w1_ref, b1_ref, w2_ref, b2_ref, o_ref,
                      *, residual, valid_len, lane_tile):
    """CNNLayer: conv(k) (one matmul on tap-unfolded input) + relu +
    1x1 reduce + relu + optional residual.  Lanes >= valid_len are zeroed so
    downstream conv windows never see padded-lane garbage."""
    h = jnp.dot(w1_ref[...], xu_ref[...],
                preferred_element_type=jnp.float32) + b1_ref[...]
    h = jnp.maximum(h, 0.0)
    y = jnp.dot(w2_ref[...], h,
                preferred_element_type=jnp.float32) + b2_ref[...]
    y = jnp.maximum(y, 0.0)
    if residual:
        y = y + xres_ref[...]
    lane = (jax.lax.broadcasted_iota(jnp.int32, y.shape, 1)
            + pl.program_id(1) * lane_tile)
    y = jnp.where(lane < valid_len, y, 0.0)
    o_ref[...] = y.astype(o_ref.dtype)


def _attention_pool_kernel(x_ref, wp_ref, bp_ref, cw_ref, o_ref, *, n_heads):
    """Per batch element: n_heads attention context vectors + global max pool.

    x_ref:(L,2H)  wp_ref:(n_heads,2H,A)  bp_ref:(n_heads,1,A)
    cw_ref:(n_heads,A,1)  o_ref:(n_heads+1,2H) (last row = global max pool).
    """
    x = x_ref[...]
    rows = []
    for h in range(n_heads):
        p = jnp.tanh(jnp.dot(x, wp_ref[h], preferred_element_type=jnp.float32)
                     + bp_ref[h])
        s = jnp.dot(p, cw_ref[h], preferred_element_type=jnp.float32)  # (L,1)
        s = s - jnp.max(s, axis=0, keepdims=True)
        e = jnp.exp(s)
        w = e / jnp.sum(e, axis=0, keepdims=True)
        rows.append(jnp.sum(x * w, axis=0, keepdims=True))             # (1,2H)
    rows.append(jnp.max(x, axis=0, keepdims=True))                     # gmp
    o_ref[...] = jnp.concatenate(rows, axis=0).astype(o_ref.dtype)


# ---------------------------------------------------------------------------
# Pallas wrappers
# ---------------------------------------------------------------------------

def fc_layer_forward(x_pad, w1, b1, w2, b2, tl):
    """x_pad: (B, C_in, Lp) NCL, Lp % tl == 0."""
    bsz, c_in, lp = x_pad.shape
    c_large, c_small = w1.shape[0], w2.shape[0]
    flops = 2 * bsz * lp * (c_in * c_large + c_large * c_small)
    bytes_acc = 4 * (bsz * lp * (c_in + c_small)
                     + w1.size + w2.size + b1.size + b2.size)
    return pl.pallas_call(
        _pointwise_mlp_kernel,
        out_shape=jax.ShapeDtypeStruct((bsz, c_small, lp), jnp.float32),
        grid=(bsz, lp // tl),
        in_specs=[
            pl.BlockSpec((None, c_in, tl), lambda b, l: (b, 0, l)),
            pl.BlockSpec((c_large, c_in), lambda b, l: (0, 0)),
            pl.BlockSpec((c_large, 1), lambda b, l: (0, 0)),
            pl.BlockSpec((c_small, c_large), lambda b, l: (0, 0)),
            pl.BlockSpec((c_small, 1), lambda b, l: (0, 0)),
        ],
        out_specs=pl.BlockSpec((None, c_small, tl), lambda b, l: (b, 0, l)),
        compiler_params=pltpu.CompilerParams(
            dimension_semantics=("parallel", "parallel")),
        cost_estimate=pl.CostEstimate(flops=flops, transcendentals=0,
                                      bytes_accessed=bytes_acc),
    )(x_pad, w1, b1.reshape(c_large, 1), w2, b2.reshape(c_small, 1))


def cnn_layer_forward(x_pad, valid_len, wconv, bconv, wred, bred, k, tl):
    """x_pad: (B, C_in, Lp), zero beyond valid_len.  wconv: (C_large, C_in, k)."""
    bsz, c_in, lp = x_pad.shape
    c_large = wconv.shape[0]
    c_small = wred.shape[0]
    residual = (c_in == c_small)
    # TODO(synk): pool_size / batch_norm branches of CNNLayer are not implemented.
    # Tap-unfold so the k-wide conv becomes a single MXU matmul.
    # TODO(synk): the k shifted copies could be built in-kernel with pltpu.roll
    # to avoid the k-fold HBM duplication; kept in the wrapper for robustness.
    xcp = jnp.pad(x_pad, ((0, 0), (0, 0), (k // 2, k // 2)))
    taps = jnp.stack([xcp[:, :, dk:dk + lp] for dk in range(k)], axis=2)
    xu = taps.reshape(bsz, c_in * k, lp)
    w1 = wconv.reshape(c_large, c_in * k)
    flops = 2 * bsz * lp * (c_in * k * c_large + c_large * c_small)
    bytes_acc = 4 * (bsz * lp * (c_in * (k + 1) + c_small) + w1.size + wred.size)
    kern = functools.partial(_cnn_layer_kernel, residual=residual,
                             valid_len=valid_len, lane_tile=tl)
    return pl.pallas_call(
        kern,
        out_shape=jax.ShapeDtypeStruct((bsz, c_small, lp), jnp.float32),
        grid=(bsz, lp // tl),
        in_specs=[
            pl.BlockSpec((None, c_in * k, tl), lambda b, l: (b, 0, l)),
            pl.BlockSpec((None, c_in, tl), lambda b, l: (b, 0, l)),
            pl.BlockSpec((c_large, c_in * k), lambda b, l: (0, 0)),
            pl.BlockSpec((c_large, 1), lambda b, l: (0, 0)),
            pl.BlockSpec((c_small, c_large), lambda b, l: (0, 0)),
            pl.BlockSpec((c_small, 1), lambda b, l: (0, 0)),
        ],
        out_specs=pl.BlockSpec((None, c_small, tl), lambda b, l: (b, 0, l)),
        compiler_params=pltpu.CompilerParams(
            dimension_semantics=("parallel", "parallel")),
        cost_estimate=pl.CostEstimate(flops=flops, transcendentals=0,
                                      bytes_accessed=bytes_acc),
    )(xu, x_pad, w1, bconv.reshape(c_large, 1), wred, bred.reshape(c_small, 1))


def attention_pool_forward(lstm_out, wp, bp, cw):
    """lstm_out: (B, L, 2H) -> (B, n_heads+1, 2H): contexts + global max pool."""
    bsz, seq, d2h = lstm_out.shape
    n_heads, _, adim = wp.shape
    flops = 2 * bsz * seq * n_heads * (d2h * adim + adim + d2h)
    kern = functools.partial(_attention_pool_kernel, n_heads=n_heads)
    return pl.pallas_call(
        kern,
        out_shape=jax.ShapeDtypeStruct((bsz, n_heads + 1, d2h), jnp.float32),
        grid=(bsz,),
        in_specs=[
            pl.BlockSpec((None, seq, d2h), lambda b: (b, 0, 0)),
            pl.BlockSpec((n_heads, d2h, adim), lambda b: (0, 0, 0)),
            pl.BlockSpec((n_heads, 1, adim), lambda b: (0, 0, 0)),
            pl.BlockSpec((n_heads, adim, 1), lambda b: (0, 0, 0)),
        ],
        out_specs=pl.BlockSpec((None, n_heads + 1, d2h), lambda b: (b, 0, 0)),
        compiler_params=pltpu.CompilerParams(dimension_semantics=("parallel",)),
        cost_estimate=pl.CostEstimate(
            flops=flops,
            transcendentals=bsz * seq * n_heads * (adim + 1),
            bytes_accessed=4 * (bsz * seq * d2h + bsz * (n_heads + 1) * d2h
                                + wp.size + bp.size + cw.size)),
    )(lstm_out, wp, bp, cw)


# ---------------------------------------------------------------------------
# BiLSTM in plain JAX (sequential recurrence -> lax.scan; no clean Pallas win)
# ---------------------------------------------------------------------------
# TODO(synk): LSTM recurrence is left to XLA via lax.scan.

def _lstm_direction(x, w_ih, w_hh, b_ih, b_hh, reverse):
    bsz = x.shape[0]
    hidden = w_hh.shape[1]
    xs = jnp.transpose(x, (1, 0, 2))
    if reverse:
        xs = xs[::-1]

    def step(carry, x_t):
        h, c = carry
        gates = x_t @ w_ih.T + b_ih + h @ w_hh.T + b_hh
        i, f, g, o = jnp.split(gates, 4, axis=-1)       # PyTorch gate order
        i = jax.nn.sigmoid(i)
        f = jax.nn.sigmoid(f)
        g = jnp.tanh(g)
        o = jax.nn.sigmoid(o)
        c = f * c + i * g
        h = o * jnp.tanh(c)
        return (h, c), h

    init = (jnp.zeros((bsz, hidden), jnp.float32),
            jnp.zeros((bsz, hidden), jnp.float32))
    _, hs = lax.scan(step, init, xs)
    if reverse:
        hs = hs[::-1]
    return jnp.transpose(hs, (1, 0, 2))


def bilstm_forward(x, p):
    fwd = _lstm_direction(x, p['w_ih_f'], p['w_hh_f'], p['b_ih_f'], p['b_hh_f'],
                          reverse=False)
    bwd = _lstm_direction(x, p['w_ih_b'], p['w_hh_b'], p['b_ih_b'], p['b_hh_b'],
                          reverse=True)
    return jnp.concatenate([fwd, bwd], axis=-1)


# ---------------------------------------------------------------------------
# Full forward pass (Pallas path)
# ---------------------------------------------------------------------------

def enhanced_forward(char_ids, params):
    # TODO(synk): embedding gather left to XLA (data-dependent row gather).
    emb = jnp.take(params['char_embedding'], char_ids, axis=0)   # (B, L, E)
    x = jnp.transpose(emb, (0, 2, 1))                            # (B, E, L) NCL
    _, _, seq_len = x.shape
    tl = _pick_lane_tile(seq_len)
    lp = _round_up(seq_len, tl)
    x = jnp.pad(x, ((0, 0), (0, 0), (0, lp - seq_len)))

    for layer in params['cnn_layers']:
        x = cnn_layer_forward(x, seq_len, layer['w_conv'], layer['b_conv'],
                              layer['w_reduce'], layer['b_reduce'],
                              layer['kernel'], tl)
    for layer in params['fc_layers']:
        x = fc_layer_forward(x, layer['w1'], layer['b1'],
                             layer['w2'], layer['b2'], tl)

    x = jnp.transpose(x[:, :, :seq_len], (0, 2, 1))              # (B, L, C)
    lstm_out = bilstm_forward(x, params['lstm'])                 # (B, L, 2H)
    # TODO(synk): dropout on lstm_out is identity in eval mode.

    pooled = attention_pool_forward(lstm_out, params['att_proj_w'],
                                    params['att_proj_b'], params['att_ctx_w'])
    # rows: 0 not_toxic, 1 toxic, 2 very_toxic, 3 insult, 4 profanity,
    #       5 threat, 6 identity_hate, 7 global max pool
    gmp = pooled[:, 7, :]
    tox_feat = (gmp * 0.5 + pooled[:, 0, :] * 0.2 + pooled[:, 1, :] * 0.2
                + pooled[:, 2, :] * 0.1)
    cat_cols = []
    for j, idx in enumerate((3, 4, 5, 6)):
        cat_cols.append(pooled[:, idx, :] @ params['fc_cat_w'][j].T
                        + params['fc_cat_b'][j])
    category_output = jnp.concatenate(cat_cols, axis=1)
    toxicity_output = tox_feat @ params['fc_tox_w'].T + params['fc_tox_b']
    return toxicity_output, category_output


# ---------------------------------------------------------------------------
# Pure-JAX reference (same math, no Pallas)
# ---------------------------------------------------------------------------

_HI = lax.Precision.HIGHEST


def _ref_cnn_layer(x, layer):
    bsz, c_in, seq = x.shape
    k = layer['kernel']
    wconv, bconv = layer['w_conv'], layer['b_conv']
    wred, bred = layer['w_reduce'], layer['b_reduce']
    xp = jnp.pad(x, ((0, 0), (0, 0), (k // 2, k // 2)))
    taps = jnp.stack([xp[:, :, dk:dk + seq] for dk in range(k)], axis=2)
    xu = taps.reshape(bsz, c_in * k, seq)
    w1 = wconv.reshape(wconv.shape[0], c_in * k)
    h = jnp.maximum(jnp.einsum('oc,bcl->bol', w1, xu, precision=_HI)
                    + bconv[None, :, None], 0.0)
    y = jnp.maximum(jnp.einsum('oc,bcl->bol', wred, h, precision=_HI)
                    + bred[None, :, None], 0.0)
    if c_in == wred.shape[0]:
        y = y + x
    return y


def _ref_fc_layer(x, layer):
    h = jnp.maximum(jnp.einsum('oc,bcl->bol', layer['w1'], x, precision=_HI)
                    + layer['b1'][None, :, None], 0.0)
    return jnp.maximum(jnp.einsum('oc,bcl->bol', layer['w2'], h, precision=_HI)
                       + layer['b2'][None, :, None], 0.0)


def reference_forward(char_ids, params):
    emb = jnp.take(params['char_embedding'], char_ids, axis=0)
    x = jnp.transpose(emb, (0, 2, 1))
    for layer in params['cnn_layers']:
        x = _ref_cnn_layer(x, layer)
    for layer in params['fc_layers']:
        x = _ref_fc_layer(x, layer)
    x = jnp.transpose(x, (0, 2, 1))
    lstm_out = bilstm_forward(x, params['lstm'])
    gmp = jnp.max(lstm_out, axis=1)
    wp, bp, cw = params['att_proj_w'], params['att_proj_b'], params['att_ctx_w']
    ctxs = []
    for h in range(wp.shape[0]):
        p = jnp.tanh(jnp.einsum('bld,da->bla', lstm_out, wp[h], precision=_HI)
                     + bp[h][0])
        s = jnp.einsum('bla,ao->blo', p, cw[h], precision=_HI)
        w = jax.nn.softmax(s, axis=1)
        ctxs.append(jnp.sum(lstm_out * w, axis=1))
    tox_feat = gmp * 0.5 + ctxs[0] * 0.2 + ctxs[1] * 0.2 + ctxs[2] * 0.1
    cat_cols = [ctxs[idx] @ params['fc_cat_w'][j].T + params['fc_cat_b'][j]
                for j, idx in enumerate((3, 4, 5, 6))]
    category_output = jnp.concatenate(cat_cols, axis=1)
    toxicity_output = tox_feat @ params['fc_tox_w'].T + params['fc_tox_b']
    return toxicity_output, category_output


# ---------------------------------------------------------------------------
# Parameter construction (PyTorch-like init, deterministic)
# ---------------------------------------------------------------------------

def init_params(key, n_chars, config):
    emb_dim = config['char_emb_dim']
    hidden = config['lstm_hidden_dim']
    adim = config['attention_dim']
    keys = iter(jax.random.split(key, 64))

    def uni(shape, bound):
        return jax.random.uniform(next(keys), shape, jnp.float32, -bound, bound)

    emb = jax.random.normal(next(keys), (n_chars, emb_dim), jnp.float32)
    emb = emb.at[0].set(0.0)                                # padding_idx = 0

    cnn_layers, c_in = [], emb_dim
    for cfg in config['char_cnn_layers']:
        cl, cs, k = cfg['large_features'], cfg['small_features'], cfg['kernel']
        b1 = 1.0 / (c_in * k) ** 0.5
        b2 = 1.0 / cl ** 0.5
        cnn_layers.append(dict(kernel=k,
                               w_conv=uni((cl, c_in, k), b1),
                               b_conv=uni((cl,), b1),
                               w_reduce=uni((cs, cl), b2),
                               b_reduce=uni((cs,), b2)))
        c_in = cs

    fc_layers = []
    for cfg in config['fc_layers']:
        lg, sm = cfg['large_units'], cfg['small_units']
        b1 = 1.0 / c_in ** 0.5
        b2 = 1.0 / lg ** 0.5
        fc_layers.append(dict(w1=uni((lg, c_in), b1), b1=uni((lg,), b1),
                              w2=uni((sm, lg), b2), b2=uni((sm,), b2)))
        c_in = sm

    bl = 1.0 / hidden ** 0.5
    lstm = dict(w_ih_f=uni((4 * hidden, c_in), bl), w_hh_f=uni((4 * hidden, hidden), bl),
                b_ih_f=uni((4 * hidden,), bl), b_hh_f=uni((4 * hidden,), bl),
                w_ih_b=uni((4 * hidden, c_in), bl), w_hh_b=uni((4 * hidden, hidden), bl),
                b_ih_b=uni((4 * hidden,), bl), b_hh_b=uni((4 * hidden,), bl))

    d2h, n_heads = 2 * hidden, 7
    att_proj_w = (jax.random.normal(next(keys), (n_heads, d2h, adim), jnp.float32)
                  * (2.0 / (d2h + adim)) ** 0.5)
    att_proj_b = uni((n_heads, 1, adim), 1.0 / d2h ** 0.5)
    att_ctx_w = (jax.random.normal(next(keys), (n_heads, adim, 1), jnp.float32)
                 * (2.0 / (adim + 1)) ** 0.5)

    bh = 1.0 / d2h ** 0.5
    return dict(char_embedding=emb, cnn_layers=cnn_layers, fc_layers=fc_layers,
                lstm=lstm, att_proj_w=att_proj_w, att_proj_b=att_proj_b,
                att_ctx_w=att_ctx_w,
                fc_cat_w=uni((4, 1, d2h), bh), fc_cat_b=uni((4, 1), bh),
                fc_tox_w=uni((3, d2h), bh), fc_tox_b=uni((3,), bh))


if __name__ == "__main__":
    config = dict(char_emb_dim=32, lstm_hidden_dim=64, attention_dim=64,
                  dropout_rate=0.3, use_attention=True,
                  char_cnn_layers=[dict(large_features=64, small_features=32,
                                        kernel=3)],
                  fc_layers=[dict(large_units=64, small_units=32)])
    n_chars, batch, seq_len = 97, 2, 48

    key = jax.random.PRNGKey(0)
    k_params, k_ids = jax.random.split(key)
    params = init_params(k_params, n_chars, config)
    char_ids = jax.random.randint(k_ids, (batch, seq_len), 0, n_chars,
                                  dtype=jnp.int32)

    fwd = jax.jit(functools.partial(enhanced_forward, params=params))
    tox, cat = fwd(char_ids)
    jax.block_until_ready(tox)
    jax.block_until_ready(cat)

    tox_ref, cat_ref = reference_forward(char_ids, params)
    assert tox.shape == (batch, 3) and cat.shape == (batch, 4)
    assert jnp.allclose(tox, tox_ref, atol=2e-3, rtol=2e-3), \
        float(jnp.max(jnp.abs(tox - tox_ref)))
    assert jnp.allclose(cat, cat_ref, atol=2e-3, rtol=2e-3), \
        float(jnp.max(jnp.abs(cat - cat_ref)))

    print("KERNEL_OK")
</pallas_src>

<mosaic_0001>
module attributes {stable_mosaic.version = 11 : i64} {
  func.func @_cnn_layer_kernel(%arg0: i32, %arg1: i32, %arg2: memref<1x96x128xf32, #tpu.memory_space<vmem>>, %arg3: memref<1x32x128xf32, #tpu.memory_space<vmem>>, %arg4: memref<64x96xf32, #tpu.memory_space<vmem>>, %arg5: memref<64x1xf32, #tpu.memory_space<vmem>>, %arg6: memref<32x64xf32, #tpu.memory_space<vmem>>, %arg7: memref<32x1xf32, #tpu.memory_space<vmem>>, %arg8: memref<1x32x128xf32, #tpu.memory_space<vmem>>) attributes {dimension_semantics = [#tpu.dimension_semantics<parallel>, #tpu.dimension_semantics<parallel>], iteration_bounds = array<i64: 2, 1>, scalar_prefetch = 0 : i64, scratch_operands = 0 : i64, tpu.core_type = #tpu.core_type<tc>, window_params = [{transform_indices = @transform_0, window_bounds = array<i64: 1, 96, 128>}, {transform_indices = @transform_1, window_bounds = array<i64: 1, 32, 128>}, {pipeline_mode = #tpu.pipeline_mode<synchronous>, transform_indices = @transform_2, window_bounds = array<i64: 64, 96>}, {pipeline_mode = #tpu.pipeline_mode<synchronous>, transform_indices = @transform_3, window_bounds = array<i64: 64, 1>}, {pipeline_mode = #tpu.pipeline_mode<synchronous>, transform_indices = @transform_4, window_bounds = array<i64: 32, 64>}, {pipeline_mode = #tpu.pipeline_mode<synchronous>, transform_indices = @transform_5, window_bounds = array<i64: 32, 1>}, {transform_indices = @transform_6, window_bounds = array<i64: 1, 32, 128>}]} {
    %c0 = arith.constant 0 : index
    %c0_0 = arith.constant 0 : index
    %0 = vector.load %arg4[%c0, %c0_0] : memref<64x96xf32, #tpu.memory_space<vmem>>, vector<64x96xf32>
    %c0_1 = arith.constant 0 : index
    %c0_2 = arith.constant 0 : index
    %c0_3 = arith.constant 0 : index
    %1 = vector.load %arg2[%c0_1, %c0_2, %c0_3] : memref<1x96x128xf32, #tpu.memory_space<vmem>>, vector<1x96x128xf32>
    %2 = vector.shape_cast %1 : vector<1x96x128xf32> to vector<96x128xf32>
    %cst = arith.constant dense<0.000000e+00> : vector<64x128xf32>
    %3 = tpu.matmul %0, %2, %cst {dimension_numbers = #tpu.dot_dimension_numbers<[1], [0], [0], [1], [0, 0, 1, 1], [], []>} : vector<64x96xf32>, vector<96x128xf32>, vector<64x128xf32> -> vector<64x128xf32>
    %c0_4 = arith.constant 0 : index
    %c0_5 = arith.constant 0 : index
    %4 = vector.load %arg5[%c0_4, %c0_5] : memref<64x1xf32, #tpu.memory_space<vmem>>, vector<64x1xf32>
    %5 = vector.broadcast %4 : vector<64x1xf32> to vector<64x128xf32>
    %6 = arith.addf %3, %5 : vector<64x128xf32>
    %cst_6 = arith.constant 0.000000e+00 : f32
    %7 = vector.broadcast %cst_6 : f32 to vector<64x128xf32>
    %8 = arith.maximumf %6, %7 : vector<64x128xf32>
    %c0_7 = arith.constant 0 : index
    %c0_8 = arith.constant 0 : index
    %9 = vector.load %arg6[%c0_7, %c0_8] : memref<32x64xf32, #tpu.memory_space<vmem>>, vector<32x64xf32>
    %cst_9 = arith.constant dense<0.000000e+00> : vector<32x128xf32>
    %10 = tpu.matmul %9, %8, %cst_9 {dimension_numbers = #tpu.dot_dimension_numbers<[1], [0], [0], [1], [0, 0, 1, 1], [], []>} : vector<32x64xf32>, vector<64x128xf32>, vector<32x128xf32> -> vector<32x128xf32>
    %c0_10 = arith.constant 0 : index
    %c0_11 = arith.constant 0 : index
    %11 = vector.load %arg7[%c0_10, %c0_11] : memref<32x1xf32, #tpu.memory_space<vmem>>, vector<32x1xf32>
    %12 = vector.broadcast %11 : vector<32x1xf32> to vector<32x128xf32>
    %13 = arith.addf %10, %12 : vector<32x128xf32>
    %cst_12 = arith.constant 0.000000e+00 : f32
    %14 = vector.broadcast %cst_12 : f32 to vector<32x128xf32>
    %15 = arith.maximumf %13, %14 : vector<32x128xf32>
    %c0_13 = arith.constant 0 : index
    %c0_14 = arith.constant 0 : index
    %c0_15 = arith.constant 0 : index
    %16 = vector.load %arg3[%c0_13, %c0_14, %c0_15] : memref<1x32x128xf32, #tpu.memory_space<vmem>>, vector<1x32x128xf32>
    %17 = vector.shape_cast %16 : vector<1x32x128xf32> to vector<32x128xf32>
    %18 = arith.addf %15, %17 : vector<32x128xf32>
    %19 = tpu.iota {dimensions = array<i32: 1>} : vector<32x128xi32>
    %c128_i32 = arith.constant 128 : i32
    %20 = arith.muli %arg1, %c128_i32 : i32
    %21 = vector.broadcast %20 : i32 to vector<32x128xi32>
    %22 = arith.addi %19, %21 : vector<32x128xi32>
    %c48_i32 = arith.constant 48 : i32
    %23 = vector.broadcast %c48_i32 : i32 to vector<32x128xi32>
    %24 = arith.cmpi slt, %22, %23 : vector<32x128xi32>
    %cst_16 = arith.constant 0.000000e+00 : f32
    %25 = vector.broadcast %cst_16 : f32 to vector<32x128xf32>
    %26 = arith.select %24, %18, %25 : vector<32x128xi1>, vector<32x128xf32>
    %c0_17 = arith.constant 0 : index
    %c0_18 = arith.constant 0 : index
    %c0_19 = arith.constant 0 : index
    %27 = vector.load %arg8[%c0_17, %c0_18, %c0_19] : memref<1x32x128xf32, #tpu.memory_space<vmem>>, vector<1x32x128xf32>
    %28 = vector.shape_cast %27 : vector<1x32x128xf32> to vector<32x128xf32>
    %29 = vector.shape_cast %26 : vector<32x128xf32> to vector<1x32x128xf32>
    tpu.vector_store %arg8[%c0_17, %c0_18, %c0_19], %29 {strides = array<i32>} : memref<1x32x128xf32, #tpu.memory_space<vmem>>, vector<1x32x128xf32>,
    return
  }
  func.func @transform_0(%arg0: i32, %arg1: i32) -> (i32, i32, i32) {
    %c0_i32 = arith.constant 0 : i32
    %c0_i32_0 = arith.constant 0 : i32
    return %arg0, %c0_i32, %arg1 : i32, i32, i32
  }
  func.func @transform_1(%arg0: i32, %arg1: i32) -> (i32, i32, i32) {
    %c0_i32 = arith.constant 0 : i32
    %c0_i32_0 = arith.constant 0 : i32
    return %arg0, %c0_i32, %arg1 : i32, i32, i32
  }
  func.func @transform_2(%arg0: i32, %arg1: i32) -> (i32, i32) {
    %c0_i32 = arith.constant 0 : i32
    %c0_i32_0 = arith.constant 0 : i32
    %c0_i32_1 = arith.constant 0 : i32
    return %c0_i32, %c0_i32_0 : i32, i32
  }
  func.func @transform_3(%arg0: i32, %arg1: i32) -> (i32, i32) {
    %c0_i32 = arith.constant 0 : i32
    %c0_i32_0 = arith.constant 0 : i32
    %c0_i32_1 = arith.constant 0 : i32
    return %c0_i32, %c0_i32_0 : i32, i32
  }
  func.func @transform_4(%arg0: i32, %arg1: i32) -> (i32, i32) {
    %c0_i32 = arith.constant 0 : i32
    %c0_i32_0 = arith.constant 0 : i32
    %c0_i32_1 = arith.constant 0 : i32
    return %c0_i32, %c0_i32_0 : i32, i32
  }
  func.func @transform_5(%arg0: i32, %arg1: i32) -> (i32, i32) {
    %c0_i32 = arith.constant 0 : i32
    %c0_i32_0 = arith.constant 0 : i32
    %c0_i32_1 = arith.constant 0 : i32
    return %c0_i32, %c0_i32_0 : i32, i32
  }
  func.func @transform_6(%arg0: i32, %arg1: i32) -> (i32, i32, i32) {
    %c0_i32 = arith.constant 0 : i32
    %c0_i32_0 = arith.constant 0 : i32
    return %arg0, %c0_i32, %arg1 : i32, i32, i32
  }
}

module attributes {stable_mosaic.version = 11 : i64} {
  func.func @_pointwise_mlp_kernel(%arg0: i32, %arg1: i32, %arg2: memref<1x32x128xf32, #tpu.memory_space<vmem>>, %arg3: memref<64x32xf32, #tpu.memory_space<vmem>>, %arg4: memref<64x1xf32, #tpu.memory_space<vmem>>, %arg5: memref<32x64xf32, #tpu.memory_space<vmem>>, %arg6: memref<32x1xf32, #tpu.memory_space<vmem>>, %arg7: memref<1x32x128xf32, #tpu.memory_space<vmem>>) attributes {dimension_semantics = [#tpu.dimension_semantics<parallel>, #tpu.dimension_semantics<parallel>], iteration_bounds = array<i64: 2, 1>, scalar_prefetch = 0 : i64, scratch_operands = 0 : i64, tpu.core_type = #tpu.core_type<tc>, window_params = [{transform_indices = @transform_0, window_bounds = array<i64: 1, 32, 128>}, {pipeline_mode = #tpu.pipeline_mode<synchronous>, transform_indices = @transform_1, window_bounds = array<i64: 64, 32>}, {pipeline_mode = #tpu.pipeline_mode<synchronous>, transform_indices = @transform_2, window_bounds = array<i64: 64, 1>}, {pipeline_mode = #tpu.pipeline_mode<synchronous>, transform_indices = @transform_3, window_bounds = array<i64: 32, 64>}, {pipeline_mode = #tpu.pipeline_mode<synchronous>, transform_indices = @transform_4, window_bounds = array<i64: 32, 1>}, {transform_indices = @transform_5, window_bounds = array<i64: 1, 32, 128>}]} {
    %c0 = arith.constant 0 : index
    %c0_0 = arith.constant 0 : index
    %c0_1 = arith.constant 0 : index
    %0 = vector.load %arg2[%c0, %c0_0, %c0_1] : memref<1x32x128xf32, #tpu.memory_space<vmem>>, vector<1x32x128xf32>
    %1 = vector.shape_cast %0 : vector<1x32x128xf32> to vector<32x128xf32>
    %c0_2 = arith.constant 0 : index
    %c0_3 = arith.constant 0 : index
    %2 = vector.load %arg3[%c0_2, %c0_3] : memref<64x32xf32, #tpu.memory_space<vmem>>, vector<64x32xf32>
    %cst = arith.constant dense<0.000000e+00> : vector<64x128xf32>
    %3 = tpu.matmul %2, %1, %cst {dimension_numbers = #tpu.dot_dimension_numbers<[1], [0], [0], [1], [0, 0, 1, 1], [], []>} : vector<64x32xf32>, vector<32x128xf32>, vector<64x128xf32> -> vector<64x128xf32>
    %c0_4 = arith.constant 0 : index
    %c0_5 = arith.constant 0 : index
    %4 = vector.load %arg4[%c0_4, %c0_5] : memref<64x1xf32, #tpu.memory_space<vmem>>, vector<64x1xf32>
    %5 = vector.broadcast %4 : vector<64x1xf32> to vector<64x128xf32>
    %6 = arith.addf %3, %5 : vector<64x128xf32>
    %cst_6 = arith.constant 0.000000e+00 : f32
    %7 = vector.broadcast %cst_6 : f32 to vector<64x128xf32>
    %8 = arith.maximumf %6, %7 : vector<64x128xf32>
    %c0_7 = arith.constant 0 : index
    %c0_8 = arith.constant 0 : index
    %9 = vector.load %arg5[%c0_7, %c0_8] : memref<32x64xf32, #tpu.memory_space<vmem>>, vector<32x64xf32>
    %cst_9 = arith.constant dense<0.000000e+00> : vector<32x128xf32>
    %10 = tpu.matmul %9, %8, %cst_9 {dimension_numbers = #tpu.dot_dimension_numbers<[1], [0], [0], [1], [0, 0, 1, 1], [], []>} : vector<32x64xf32>, vector<64x128xf32>, vector<32x128xf32> -> vector<32x128xf32>
    %c0_10 = arith.constant 0 : index
    %c0_11 = arith.constant 0 : index
    %11 = vector.load %arg6[%c0_10, %c0_11] : memref<32x1xf32, #tpu.memory_space<vmem>>, vector<32x1xf32>
    %12 = vector.broadcast %11 : vector<32x1xf32> to vector<32x128xf32>
    %13 = arith.addf %10, %12 : vector<32x128xf32>
    %cst_12 = arith.constant 0.000000e+00 : f32
    %14 = vector.broadcast %cst_12 : f32 to vector<32x128xf32>
    %15 = arith.maximumf %13, %14 : vector<32x128xf32>
    %c0_13 = arith.constant 0 : index
    %c0_14 = arith.constant 0 : index
    %c0_15 = arith.constant 0 : index
    %16 = vector.load %arg7[%c0_13, %c0_14, %c0_15] : memref<1x32x128xf32, #tpu.memory_space<vmem>>, vector<1x32x128xf32>
    %17 = vector.shape_cast %16 : vector<1x32x128xf32> to vector<32x128xf32>
    %18 = vector.shape_cast %15 : vector<32x128xf32> to vector<1x32x128xf32>
    tpu.vector_store %arg7[%c0_13, %c0_14, %c0_15], %18 {strides = array<i32>} : memref<1x32x128xf32, #tpu.memory_space<vmem>>, vector<1x32x128xf32>,
    return
  }
  func.func @transform_0(%arg0: i32, %arg1: i32) -> (i32, i32, i32) {
    %c0_i32 = arith.constant 0 : i32
    %c0_i32_0 = arith.constant 0 : i32
    return %arg0, %c0_i32, %arg1 : i32, i32, i32
  }
  func.func @transform_1(%arg0: i32, %arg1: i32) -> (i32, i32) {
    %c0_i32 = arith.constant 0 : i32
    %c0_i32_0 = arith.constant 0 : i32
    %c0_i32_1 = arith.constant 0 : i32
    return %c0_i32, %c0_i32_0 : i32, i32
  }
  func.func @transform_2(%arg0: i32, %arg1: i32) -> (i32, i32) {
    %c0_i32 = arith.constant 0 : i32
    %c0_i32_0 = arith.constant 0 : i32
    %c0_i32_1 = arith.constant 0 : i32
    return %c0_i32, %c0_i32_0 : i32, i32
  }
  func.func @transform_3(%arg0: i32, %arg1: i32) -> (i32, i32) {
    %c0_i32 = arith.constant 0 : i32
    %c0_i32_0 = arith.constant 0 : i32
    %c0_i32_1 = arith.constant 0 : i32
    return %c0_i32, %c0_i32_0 : i32, i32
  }
  func.func @transform_4(%arg0: i32, %arg1: i32) -> (i32, i32) {
    %c0_i32 = arith.constant 0 : i32
    %c0_i32_0 = arith.constant 0 : i32
    %c0_i32_1 = arith.constant 0 : i32
    return %c0_i32, %c0_i32_0 : i32, i32
  }
  func.func @transform_5(%arg0: i32, %arg1: i32) -> (i32, i32, i32) {
    %c0_i32 = arith.constant 0 : i32
    %c0_i32_0 = arith.constant 0 : i32
    return %arg0, %c0_i32, %arg1 : i32, i32, i32
  }
}

module attributes {stable_mosaic.version = 11 : i64} {
  func.func @_attention_pool_kernel(%arg0: i32, %arg1: memref<1x48x128xf32, #tpu.memory_space<vmem>>, %arg2: memref<7x128x64xf32, #tpu.memory_space<vmem>>, %arg3: memref<7x1x64xf32, #tpu.memory_space<vmem>>, %arg4: memref<7x64x1xf32, #tpu.memory_space<vmem>>, %arg5: memref<1x8x128xf32, #tpu.memory_space<vmem>>) attributes {dimension_semantics = [#tpu.dimension_semantics<parallel>], iteration_bounds = array<i64: 2>, scalar_prefetch = 0 : i64, scratch_operands = 0 : i64, tpu.core_type = #tpu.core_type<tc>, window_params = [{transform_indices = @transform_0, window_bounds = array<i64: 1, 48, 128>}, {pipeline_mode = #tpu.pipeline_mode<synchronous>, transform_indices = @transform_1, window_bounds = array<i64: 7, 128, 64>}, {pipeline_mode = #tpu.pipeline_mode<synchronous>, transform_indices = @transform_2, window_bounds = array<i64: 7, 1, 64>}, {pipeline_mode = #tpu.pipeline_mode<synchronous>, transform_indices = @transform_3, window_bounds = array<i64: 7, 64, 1>}, {transform_indices = @transform_4, window_bounds = array<i64: 1, 8, 128>}]} {
    %c0 = arith.constant 0 : index
    %c0_0 = arith.constant 0 : index
    %c0_1 = arith.constant 0 : index
    %0 = vector.load %arg1[%c0, %c0_0, %c0_1] : memref<1x48x128xf32, #tpu.memory_space<vmem>>, vector<1x48x128xf32>
    %1 = vector.shape_cast %0 : vector<1x48x128xf32> to vector<48x128xf32>
    %c0_2 = arith.constant 0 : index
    %c0_3 = arith.constant 0 : index
    %c0_4 = arith.constant 0 : index
    %2 = vector.load %arg2[%c0_2, %c0_3, %c0_4] : memref<7x128x64xf32, #tpu.memory_space<vmem>>, vector<1x128x64xf32>
    %3 = vector.shape_cast %2 : vector<1x128x64xf32> to vector<128x64xf32>
    %cst = arith.constant dense<0.000000e+00> : vector<48x64xf32>
    %4 = tpu.matmul %1, %3, %cst {dimension_numbers = #tpu.dot_dimension_numbers<[1], [0], [0], [1], [0, 0, 1, 1], [], []>} : vector<48x128xf32>, vector<128x64xf32>, vector<48x64xf32> -> vector<48x64xf32>
    %c0_5 = arith.constant 0 : index
    %c0_6 = arith.constant 0 : index
    %c0_7 = arith.constant 0 : index
    %5 = vector.load %arg3[%c0_5, %c0_6, %c0_7] : memref<7x1x64xf32, #tpu.memory_space<vmem>>, vector<1x1x64xf32>
    %6 = vector.shape_cast %5 : vector<1x1x64xf32> to vector<1x64xf32>
    %7 = vector.broadcast %6 : vector<1x64xf32> to vector<48x64xf32>
    %8 = arith.addf %4, %7 : vector<48x64xf32>
    %9 = math.tanh %8 : vector<48x64xf32>
    %c0_8 = arith.constant 0 : index
    %c0_9 = arith.constant 0 : index
    %c0_10 = arith.constant 0 : index
    %10 = vector.load %arg4[%c0_8, %c0_9, %c0_10] : memref<7x64x1xf32, #tpu.memory_space<vmem>>, vector<1x64x1xf32>
    %11 = vector.shape_cast %10 : vector<1x64x1xf32> to vector<64x1xf32>
    %cst_11 = arith.constant dense<0.000000e+00> : vector<48x1xf32>
    %12 = tpu.matmul %9, %11, %cst_11 {dimension_numbers = #tpu.dot_dimension_numbers<[1], [0], [0], [1], [0, 0, 1, 1], [], []>} : vector<48x64xf32>, vector<64x1xf32>, vector<48x1xf32> -> vector<48x1xf32>
    %cst_12 = arith.constant dense<0xFF800000> : vector<1xf32>
    %13 = vector.multi_reduction <maximumf>, %12, %cst_12 [0] : vector<48x1xf32> to vector<1xf32>
    %14 = vector.shape_cast %13 : vector<1xf32> to vector<1x1xf32>
    %15 = vector.broadcast %14 : vector<1x1xf32> to vector<48x1xf32>
    %16 = arith.subf %12, %15 : vector<48x1xf32>
    %17 = math.exp %16 : vector<48x1xf32>
    %cst_13 = arith.constant dense<0.000000e+00> : vector<1xf32>
    %18 = vector.multi_reduction <add>, %17, %cst_13 [0] : vector<48x1xf32> to vector<1xf32>
    %19 = vector.shape_cast %18 : vector<1xf32> to vector<1x1xf32>
    %20 = vector.broadcast %19 : vector<1x1xf32> to vector<48x1xf32>
    %21 = arith.divf %17, %20 : vector<48x1xf32>
    %22 = vector.broadcast %21 : vector<48x1xf32> to vector<48x128xf32>
    %23 = arith.mulf %1, %22 : vector<48x128xf32>
    %cst_14 = arith.constant dense<0.000000e+00> : vector<128xf32>
    %24 = vector.multi_reduction <add>, %23, %cst_14 [0] : vector<48x128xf32> to vector<128xf32>
    %25 = vector.shape_cast %24 : vector<128xf32> to vector<1x128xf32>
    %c1 = arith.constant 1 : index
    %c0_15 = arith.constant 0 : index
    %c0_16 = arith.constant 0 : index
    %26 = vector.load %arg2[%c1, %c0_15, %c0_16] : memref<7x128x64xf32, #tpu.memory_space<vmem>>, vector<1x128x64xf32>
    %27 = vector.shape_cast %26 : vector<1x128x64xf32> to vector<128x64xf32>
    %cst_17 = arith.constant dense<0.000000e+00> : vector<48x64xf32>
    %28 = tpu.matmul %1, %27, %cst_17 {dimension_numbers = #tpu.dot_dimension_numbers<[1], [0], [0], [1], [0, 0, 1, 1], [], []>} : vector<48x128xf32>, vector<128x64xf32>, vector<48x64xf32> -> vector<48x64xf32>
    %c1_18 = arith.constant 1 : index
    %c0_19 = arith.constant 0 : index
    %c0_20 = arith.constant 0 : index
    %29 = vector.load %arg3[%c1_18, %c0_19, %c0_20] : memref<7x1x64xf32, #tpu.memory_space<vmem>>, vector<1x1x64xf32>
    %30 = vector.shape_cast %29 : vector<1x1x64xf32> to vector<1x64xf32>
    %31 = vector.broadcast %30 : vector<1x64xf32> to vector<48x64xf32>
    %32 = arith.addf %28, %31 : vector<48x64xf32>
    %33 = math.tanh %32 : vector<48x64xf32>
    %c1_21 = arith.constant 1 : index
    %c0_22 = arith.constant 0 : index
    %c0_23 = arith.constant 0 : index
    %34 = vector.load %arg4[%c1_21, %c0_22, %c0_23] : memref<7x64x1xf32, #tpu.memory_space<vmem>>, vector<1x64x1xf32>
    %35 = vector.shape_cast %34 : vector<1x64x1xf32> to vector<64x1xf32>
    %cst_24 = arith.constant dense<0.000000e+00> : vector<48x1xf32>
    %36 = tpu.matmul %33, %35, %cst_24 {dimension_numbers = #tpu.dot_dimension_numbers<[1], [0], [0], [1], [0, 0, 1, 1], [], []>} : vector<48x64xf32>, vector<64x1xf32>, vector<48x1xf32> -> vector<48x1xf32>
    %cst_25 = arith.constant dense<0xFF800000> : vector<1xf32>
    %37 = vector.multi_reduction <maximumf>, %36, %cst_25 [0] : vector<48x1xf32> to vector<1xf32>
    %38 = vector.shape_cast %37 : vector<1xf32> to vector<1x1xf32>
    %39 = vector.broadcast %38 : vector<1x1xf32> to vector<48x1xf32>
    %40 = arith.subf %36, %39 : vector<48x1xf32>
    %41 = math.exp %40 : vector<48x1xf32>
    %cst_26 = arith.constant dense<0.000000e+00> : vector<1xf32>
    %42 = vector.multi_reduction <add>, %41, %cst_26 [0] : vector<48x1xf32> to vector<1xf32>
    %43 = vector.shape_cast %42 : vector<1xf32> to vector<1x1xf32>
    %44 = vector.broadcast %43 : vector<1x1xf32> to vector<48x1xf32>
    %45 = arith.divf %41, %44 : vector<48x1xf32>
    %46 = vector.broadcast %45 : vector<48x1xf32> to vector<48x128xf32>
    %47 = arith.mulf %1, %46 : vector<48x128xf32>
    %cst_27 = arith.constant dense<0.000000e+00> : vector<128xf32>
    %48 = vector.multi_reduction <add>, %47, %cst_27 [0] : vector<48x128xf32> to vector<128xf32>
    %49 = vector.shape_cast %48 : vector<128xf32> to vector<1x128xf32>
    %c2 = arith.constant 2 : index
    %c0_28 = arith.constant 0 : index
    %c0_29 = arith.constant 0 : index
    %50 = vector.load %arg2[%c2, %c0_28, %c0_29] : memref<7x128x64xf32, #tpu.memory_space<vmem>>, vector<1x128x64xf32>
    %51 = vector.shape_cast %50 : vector<1x128x64xf32> to vector<128x64xf32>
    %cst_30 = arith.constant dense<0.000000e+00> : vector<48x64xf32>
    %52 = tpu.matmul %1, %51, %cst_30 {dimension_numbers = #tpu.dot_dimension_numbers<[1], [0], [0], [1], [0, 0, 1, 1], [], []>} : vector<48x128xf32>, vector<128x64xf32>, vector<48x64xf32> -> vector<48x64xf32>
    %c2_31 = arith.constant 2 : index
    %c0_32 = arith.constant 0 : index
    %c0_33 = arith.constant 0 : index
    %53 = vector.load %arg3[%c2_31, %c0_32, %c0_33] : memref<7x1x64xf32, #tpu.memory_space<vmem>>, vector<1x1x64xf32>
    %54 = vector.shape_cast %53 : vector<1x1x64xf32> to vector<1x64xf32>
    %55 = vector.broadcast %54 : vector<1x64xf32> to vector<48x64xf32>
    %56 = arith.addf %52, %55 : vector<48x64xf32>
    %57 = math.tanh %56 : vector<48x64xf32>
    %c2_34 = arith.constant 2 : index
    %c0_35 = arith.constant 0 : index
    %c0_36 = arith.constant 0 : index
    %58 = vector.load %arg4[%c2_34, %c0_35, %c0_36] : memref<7x64x1xf32, #tpu.memory_space<vmem>>, vector<1x64x1xf32>
    %59 = vector.shape_cast %58 : vector<1x64x1xf32> to vector<64x1xf32>
    %cst_37 = arith.constant dense<0.000000e+00> : vector<48x1xf32>
    %60 = tpu.matmul %57, %59, %cst_37 {dimension_numbers = #tpu.dot_dimension_numbers<[1], [0], [0], [1], [0, 0, 1, 1], [], []>} : vector<48x64xf32>, vector<64x1xf32>, vector<48x1xf32> -> vector<48x1xf32>
    %cst_38 = arith.constant dense<0xFF800000> : vector<1xf32>
    %61 = vector.multi_reduction <maximumf>, %60, %cst_38 [0] : vector<48x1xf32> to vector<1xf32>
    %62 = vector.shape_cast %61 : vector<1xf32> to vector<1x1xf32>
    %63 = vector.broadcast %62 : vector<1x1xf32> to vector<48x1xf32>
    %64 = arith.subf %60, %63 : vector<48x1xf32>
    %65 = math.exp %64 : vector<48x1xf32>
    %cst_39 = arith.constant dense<0.000000e+00> : vector<1xf32>
    %66 = vector.multi_reduction <add>, %65, %cst_39 [0] : vector<48x1xf32> to vector<1xf32>
    %67 = vector.shape_cast %66 : vector<1xf32> to vector<1x1xf32>
    %68 = vector.broadcast %67 : vector<1x1xf32> to vector<48x1xf32>
    %69 = arith.divf %65, %68 : vector<48x1xf32>
    %70 = vector.broadcast %69 : vector<48x1xf32> to vector<48x128xf32>
    %71 = arith.mulf %1, %70 : vector<48x128xf32>
    %cst_40 = arith.constant dense<0.000000e+00> : vector<128xf32>
    %72 = vector.multi_reduction <add>, %71, %cst_40 [0] : vector<48x128xf32> to vector<128xf32>
    %73 = vector.shape_cast %72 : vector<128xf32> to vector<1x128xf32>
    %c3 = arith.constant 3 : index
    %c0_41 = arith.constant 0 : index
    %c0_42 = arith.constant 0 : index
    %74 = vector.load %arg2[%c3, %c0_41, %c0_42] : memref<7x128x64xf32, #tpu.memory_space<vmem>>, vector<1x128x64xf32>
    %75 = vector.shape_cast %74 : vector<1x128x64xf32> to vector<128x64xf32>
    %cst_43 = arith.constant dense<0.000000e+00> : vector<48x64xf32>
    %76 = tpu.matmul %1, %75, %cst_43 {dimension_numbers = #tpu.dot_dimension_numbers<[1], [0], [0], [1], [0, 0, 1, 1], [], []>} : vector<48x128xf32>, vector<128x64xf32>, vector<48x64xf32> -> vector<48x64xf32>
    %c3_44 = arith.constant 3 : index
    %c0_45 = arith.constant 0 : index
    %c0_46 = arith.constant 0 : index
    %77 = vector.load %arg3[%c3_44, %c0_45, %c0_46] : memref<7x1x64xf32, #tpu.memory_space<vmem>>, vector<1x1x64xf32>
    %78 = vector.shape_cast %77 : vector<1x1x64xf32> to vector<1x64xf32>
    %79 = vector.broadcast %78 : vector<1x64xf32> to vector<48x64xf32>
    %80 = arith.addf %76, %79 : vector<48x64xf32>
    %81 = math.tanh %80 : vector<48x64xf32>
    %c3_47 = arith.constant 3 : index
    %c0_48 = arith.constant 0 : index
    %c0_49 = arith.constant 0 : index
    %82 = vector.load %arg4[%c3_47, %c0_48, %c0_49] : memref<7x64x1xf32, #tpu.memory_space<vmem>>, vector<1x64x1xf32>
    %83 = vector.shape_cast %82 : vector<1x64x1xf32> to vector<64x1xf32>
    %cst_50 = arith.constant dense<0.000000e+00> : vector<48x1xf32>
    %84 = tpu.matmul %81, %83, %cst_50 {dimension_numbers = #tpu.dot_dimension_numbers<[1], [0], [0], [1], [0, 0, 1, 1], [], []>} : vector<48x64xf32>, vector<64x1xf32>, vector<48x1xf32> -> vector<48x1xf32>
    %cst_51 = arith.constant dense<0xFF800000> : vector<1xf32>
    %85 = vector.multi_reduction <maximumf>, %84, %cst_51 [0] : vector<48x1xf32> to vector<1xf32>
    %86 = vector.shape_cast %85 : vector<1xf32> to vector<1x1xf32>
    %87 = vector.broadcast %86 : vector<1x1xf32> to vector<48x1xf32>
    %88 = arith.subf %84, %87 : vector<48x1xf32>
    %89 = math.exp %88 : vector<48x1xf32>
    %cst_52 = arith.constant dense<0.000000e+00> : vector<1xf32>
    %90 = vector.multi_reduction <add>, %89, %cst_52 [0] : vector<48x1xf32> to vector<1xf32>
    %91 = vector.shape_cast %90 : vector<1xf32> to vector<1x1xf32>
    %92 = vector.broadcast %91 : vector<1x1xf32> to vector<48x1xf32>
    %93 = arith.divf %89, %92 : vector<48x1xf32>
    %94 = vector.broadcast %93 : vector<48x1xf32> to vector<48x128xf32>
    %95 = arith.mulf %1, %94 : vector<48x128xf32>
    %cst_53 = arith.constant dense<0.000000e+00> : vector<128xf32>
    %96 = vector.multi_reduction <add>, %95, %cst_53 [0] : vector<48x128xf32> to vector<128xf32>
    %97 = vector.shape_cast %96 : vector<128xf32> to vector<1x128xf32>
    %c4 = arith.constant 4 : index
    %c0_54 = arith.constant 0 : index
    %c0_55 = arith.constant 0 : index
    %98 = vector.load %arg2[%c4, %c0_54, %c0_55] : memref<7x128x64xf32, #tpu.memory_space<vmem>>, vector<1x128x64xf32>
    %99 = vector.shape_cast %98 : vector<1x128x64xf32> to vector<128x64xf32>
    %cst_56 = arith.constant dense<0.000000e+00> : vector<48x64xf32>
    %100 = tpu.matmul %1, %99, %cst_56 {dimension_numbers = #tpu.dot_dimension_numbers<[1], [0], [0], [1], [0, 0, 1, 1], [], []>} : vector<48x128xf32>, vector<128x64xf32>, vector<48x64xf32> -> vector<48x64xf32>
    %c4_57 = arith.constant 4 : index
    %c0_58 = arith.constant 0 : index
    %c0_59 = arith.constant 0 : index
    %101 = vector.load %arg3[%c4_57, %c0_58, %c0_59] : memref<7x1x64xf32, #tpu.memory_space<vmem>>, vector<1x1x64xf32>
    %102 = vector.shape_cast %101 : vector<1x1x64xf32> to vector<1x64xf32>
    %103 = vector.broadcast %102 : vector<1x64xf32> to vector<48x64xf32>
    %104 = arith.addf %100, %103 : vector<48x64xf32>
    %105 = math.tanh %104 : vector<48x64xf32>
    %c4_60 = arith.constant 4 : index
    %c0_61 = arith.constant 0 : index
    %c0_62 = arith.constant 0 : index
    %106 = vector.load %arg4[%c4_60, %c0_61, %c0_62] : memref<7x64x1xf32, #tpu.memory_space<vmem>>, vector<1x64x1xf32>
    %107 = vector.shape_cast %106 : vector<1x64x1xf32> to vector<64x1xf32>
    %cst_63 = arith.constant dense<0.000000e+00> : vector<48x1xf32>
    %108 = tpu.matmul %105, %107, %cst_63 {dimension_numbers = #tpu.dot_dimension_numbers<[1], [0], [0], [1], [0, 0, 1, 1], [], []>} : vector<48x64xf32>, vector<64x1xf32>, vector<48x1xf32> -> vector<48x1xf32>
    %cst_64 = arith.constant dense<0xFF800000> : vector<1xf32>
    %109 = vector.multi_reduction <maximumf>, %108, %cst_64 [0] : vector<48x1xf32> to vector<1xf32>
    %110 = vector.shape_cast %109 : vector<1xf32> to vector<1x1xf32>
    %111 = vector.broadcast %110 : vector<1x1xf32> to vector<48x1xf32>
    %112 = arith.subf %108, %111 : vector<48x1xf32>
    %113 = math.exp %112 : vector<48x1xf32>
    %cst_65 = arith.constant dense<0.000000e+00> : vector<1xf32>
    %114 = vector.multi_reduction <add>, %113, %cst_65 [0] : vector<48x1xf32> to vector<1xf32>
    %115 = vector.shape_cast %114 : vector<1xf32> to vector<1x1xf32>
    %116 = vector.broadcast %115 : vector<1x1xf32> to vector<48x1xf32>
    %117 = arith.divf %113, %116 : vector<48x1xf32>
    %118 = vector.broadcast %117 : vector<48x1xf32> to vector<48x128xf32>
    %119 = arith.mulf %1, %118 : vector<48x128xf32>
    %cst_66 = arith.constant dense<0.000000e+00> : vector<128xf32>
    %120 = vector.multi_reduction <add>, %119, %cst_66 [0] : vector<48x128xf32> to vector<128xf32>
    %121 = vector.shape_cast %120 : vector<128xf32> to vector<1x128xf32>
    %c5 = arith.constant 5 : index
    %c0_67 = arith.constant 0 : index
    %c0_68 = arith.constant 0 : index
    %122 = vector.load %arg2[%c5, %c0_67, %c0_68] : memref<7x128x64xf32, #tpu.memory_space<vmem>>, vector<1x128x64xf32>
    %123 = vector.shape_cast %122 : vector<1x128x64xf32> to vector<128x64xf32>
    %cst_69 = arith.constant dense<0.000000e+00> : vector<48x64xf32>
    %124 = tpu.matmul %1, %123, %cst_69 {dimension_numbers = #tpu.dot_dimension_numbers<[1], [0], [0], [1], [0, 0, 1, 1], [], []>} : vector<48x128xf32>, vector<128x64xf32>, vector<48x64xf32> -> vector<48x64xf32>
    %c5_70 = arith.constant 5 : index
    %c0_71 = arith.constant 0 : index
    %c0_72 = arith.constant 0 : index
    %125 = vector.load %arg3[%c5_70, %c0_71, %c0_72] : memref<7x1x64xf32, #tpu.memory_space<vmem>>, vector<1x1x64xf32>
    %126 = vector.shape_cast %125 : vector<1x1x64xf32> to vector<1x64xf32>
    %127 = vector.broadcast %126 : vector<1x64xf32> to vector<48x64xf32>
    %128 = arith.addf %124, %127 : vector<48x64xf32>
    %129 = math.tanh %128 : vector<48x64xf32>
    %c5_73 = arith.constant 5 : index
    %c0_74 = arith.constant 0 : index
    %c0_75 = arith.constant 0 : index
    %130 = vector.load %arg4[%c5_73, %c0_74, %c0_75] : memref<7x64x1xf32, #tpu.memory_space<vmem>>, vector<1x64x1xf32>
    %131 = vector.shape_cast %130 : vector<1x64x1xf32> to vector<64x1xf32>
    %cst_76 = arith.constant dense<0.000000e+00> : vector<48x1xf32>
    %132 = tpu.matmul %129, %131, %cst_76 {dimension_numbers = #tpu.dot_dimension_numbers<[1], [0], [0], [1], [0, 0, 1, 1], [], []>} : vector<48x64xf32>, vector<64x1xf32>, vector<48x1xf32> -> vector<48x1xf32>
    %cst_77 = arith.constant dense<0xFF800000> : vector<1xf32>
    %133 = vector.multi_reduction <maximumf>, %132, %cst_77 [0] : vector<48x1xf32> to vector<1xf32>
    %134 = vector.shape_cast %133 : vector<1xf32> to vector<1x1xf32>
    %135 = vector.broadcast %134 : vector<1x1xf32> to vector<48x1xf32>
    %136 = arith.subf %132, %135 : vector<48x1xf32>
    %137 = math.exp %136 : vector<48x1xf32>
    %cst_78 = arith.constant dense<0.000000e+00> : vector<1xf32>
    %138 = vector.multi_reduction <add>, %137, %cst_78 [0] : vector<48x1xf32> to vector<1xf32>
    %139 = vector.shape_cast %138 : vector<1xf32> to vector<1x1xf32>
    %140 = vector.broadcast %139 : vector<1x1xf32> to vector<48x1xf32>
    %141 = arith.divf %137, %140 : vector<48x1xf32>
    %142 = vector.broadcast %141 : vector<48x1xf32> to vector<48x128xf32>
    %143 = arith.mulf %1, %142 : vector<48x128xf32>
    %cst_79 = arith.constant dense<0.000000e+00> : vector<128xf32>
    %144 = vector.multi_reduction <add>, %143, %cst_79 [0] : vector<48x128xf32> to vector<128xf32>
    %145 = vector.shape_cast %144 : vector<128xf32> to vector<1x128xf32>
    %c6 = arith.constant 6 : index
    %c0_80 = arith.constant 0 : index
    %c0_81 = arith.constant 0 : index
    %146 = vector.load %arg2[%c6, %c0_80, %c0_81] : memref<7x128x64xf32, #tpu.memory_space<vmem>>, vector<1x128x64xf32>
    %147 = vector.shape_cast %146 : vector<1x128x64xf32> to vector<128x64xf32>
    %cst_82 = arith.constant dense<0.000000e+00> : vector<48x64xf32>
    %148 = tpu.matmul %1, %147, %cst_82 {dimension_numbers = #tpu.dot_dimension_numbers<[1], [0], [0], [1], [0, 0, 1, 1], [], []>} : vector<48x128xf32>, vector<128x64xf32>, vector<48x64xf32> -> vector<48x64xf32>
    %c6_83 = arith.constant 6 : index
    %c0_84 = arith.constant 0 : index
    %c0_85 = arith.constant 0 : index
    %149 = vector.load %arg3[%c6_83, %c0_84, %c0_85] : memref<7x1x64xf32, #tpu.memory_space<vmem>>, vector<1x1x64xf32>
    %150 = vector.shape_cast %149 : vector<1x1x64xf32> to vector<1x64xf32>
    %151 = vector.broadcast %150 : vector<1x64xf32> to vector<48x64xf32>
    %152 = arith.addf %148, %151 : vector<48x64xf32>
    %153 = math.tanh %152 : vector<48x64xf32>
    %c6_86 = arith.constant 6 : index
    %c0_87 = arith.constant 0 : index
    %c0_88 = arith.constant 0 : index
    %154 = vector.load %arg4[%c6_86, %c0_87, %c0_88] : memref<7x64x1xf32, #tpu.memory_space<vmem>>, vector<1x64x1xf32>
    %155 = vector.shape_cast %154 : vector<1x64x1xf32> to vector<64x1xf32>
    %cst_89 = arith.constant dense<0.000000e+00> : vector<48x1xf32>
    %156 = tpu.matmul %153, %155, %cst_89 {dimension_numbers = #tpu.dot_dimension_numbers<[1], [0], [0], [1], [0, 0, 1, 1], [], []>} : vector<48x64xf32>, vector<64x1xf32>, vector<48x1xf32> -> vector<48x1xf32>
    %cst_90 = arith.constant dense<0xFF800000> : vector<1xf32>
    %157 = vector.multi_reduction <maximumf>, %156, %cst_90 [0] : vector<48x1xf32> to vector<1xf32>
    %158 = vector.shape_cast %157 : vector<1xf32> to vector<1x1xf32>
    %159 = vector.broadcast %158 : vector<1x1xf32> to vector<48x1xf32>
    %160 = arith.subf %156, %159 : vector<48x1xf32>
    %161 = math.exp %160 : vector<48x1xf32>
    %cst_91 = arith.constant dense<0.000000e+00> : vector<1xf32>
    %162 = vector.multi_reduction <add>, %161, %cst_91 [0] : vector<48x1xf32> to vector<1xf32>
    %163 = vector.shape_cast %162 : vector<1xf32> to vector<1x1xf32>
    %164 = vector.broadcast %163 : vector<1x1xf32> to vector<48x1xf32>
    %165 = arith.divf %161, %164 : vector<48x1xf32>
    %166 = vector.broadcast %165 : vector<48x1xf32> to vector<48x128xf32>
    %167 = arith.mulf %1, %166 : vector<48x128xf32>
    %cst_92 = arith.constant dense<0.000000e+00> : vector<128xf32>
    %168 = vector.multi_reduction <add>, %167, %cst_92 [0] : vector<48x128xf32> to vector<128xf32>
    %169 = vector.shape_cast %168 : vector<128xf32> to vector<1x128xf32>
    %cst_93 = arith.constant dense<0xFF800000> : vector<128xf32>
    %170 = vector.multi_reduction <maximumf>, %1, %cst_93 [0] : vector<48x128xf32> to vector<128xf32>
    %171 = vector.shape_cast %170 : vector<128xf32> to vector<1x128xf32>
    %172 = tpu.concatenate %25, %49, %73, %97, %121, %145, %169, %171 in 0 : vector<1x128xf32>, vector<1x128xf32>, vector<1x128xf32>, vector<1x128xf32>, vector<1x128xf32>, vector<1x128xf32>, vector<1x128xf32>, vector<1x128xf32> -> vector<8x128xf32>
    %c0_94 = arith.constant 0 : index
    %c0_95 = arith.constant 0 : index
    %c0_96 = arith.constant 0 : index
    %173 = vector.load %arg5[%c0_94, %c0_95, %c0_96] : memref<1x8x128xf32, #tpu.memory_space<vmem>>, vector<1x8x128xf32>
    %174 = vector.shape_cast %173 : vector<1x8x128xf32> to vector<8x128xf32>
    %175 = vector.shape_cast %172 : vector<8x128xf32> to vector<1x8x128xf32>
    tpu.vector_store %arg5[%c0_94, %c0_95, %c0_96], %175 {strides = array<i32>} : memref<1x8x128xf32, #tpu.memory_space<vmem>>, vector<1x8x128xf32>,
    return
  }
  func.func @transform_0(%arg0: i32) -> (i32, i32, i32) {
    %c0_i32 = arith.constant 0 : i32
    %c0_i32_0 = arith.constant 0 : i32
    %c0_i32_1 = arith.constant 0 : i32
    return %arg0, %c0_i32, %c0_i32_0 : i32, i32, i32
  }
  func.func @transform_1(%arg0: i32) -> (i32, i32, i32) {
    %c0_i32 = arith.constant 0 : i32
    %c0_i32_0 = arith.constant 0 : i32
    %c0_i32_1 = arith.constant 0 : i32
    %c0_i32_2 = arith.constant 0 : i32
    return %c0_i32, %c0_i32_0, %c0_i32_1 : i32, i32, i32
  }
  func.func @transform_2(%arg0: i32) -> (i32, i32, i32) {
    %c0_i32 = arith.constant 0 : i32
    %c0_i32_0 = arith.constant 0 : i32
    %c0_i32_1 = arith.constant 0 : i32
    %c0_i32_2 = arith.constant 0 : i32
    return %c0_i32, %c0_i32_0, %c0_i32_1 : i32, i32, i32
  }
  func.func @transform_3(%arg0: i32) -> (i32, i32, i32) {
    %c0_i32 = arith.constant 0 : i32
    %c0_i32_0 = arith.constant 0 : i32
    %c0_i32_1 = arith.constant 0 : i32
    %c0_i32_2 = arith.constant 0 : i32
    return %c0_i32, %c0_i32_0, %c0_i32_1 : i32, i32, i32
  }
  func.func @transform_4(%arg0: i32) -> (i32, i32, i32) {
    %c0_i32 = arith.constant 0 : i32
    %c0_i32_0 = arith.constant 0 : i32
    %c0_i32_1 = arith.constant 0 : i32
    return %arg0, %c0_i32, %c0_i32_0 : i32, i32, i32
  }
}

</mosaic_0001>

<bundles_post_ra>
// kernel: custom-call.2
= control target key start
LH: loop header
LB: loop body
LE: loop exit
PB: predicated region body
PF: predicated region fallthrough
CT: control target
= control target key end

     0   :  { %s6_s0 = inlined_call_operand.vmem [shape: f32[2,64], index: 0, kind: output, shape index: {}]  }

// kernel: enhanced_forward.3
= control target key start
LH: loop header
LB: loop body
LE: loop exit
PB: predicated region body
PF: predicated region fallthrough
CT: control target
= control target key end

     0   :  { %s792_s21 = smov 0   ;;  %s794_s22 = smov 0   ;;  %s936_s0 = inlined_call_operand.vmem [shape: f32[2,96,128], index: 0, kind: input, shape index: {}]   ;;  %s937_s1 = inlined_call_operand.vmem [shape: f32[2,32,128], index: 1, kind: input, shape index: {}]   ;;  %s938_s2 = inlined_call_operand.vmem [shape: f32[64,96], index: 2, kind: input, shape index: {}]   ;;  %s939_s3 = inlined_call_operand.vmem [shape: f32[64,1], index: 3, kind: input, shape index: {}]   ;;  %s940_s4 = inlined_call_operand.vmem [shape: f32[32,64], index: 4, kind: input, shape index: {}]   ;;  %s941_s5 = inlined_call_operand.vmem [shape: f32[32,1], index: 5, kind: input, shape index: {}]   ;;  %s942_s6 = inlined_call_operand.vmem [shape: f32[2,32,128], index: 6, kind: output, shape index: {}]  }
   0x1   :  { %s796_s23 = smov 0  }
   0x2 LB: > { %s28_s24 = sadd.s32 1, %s750_s22  ;;  %p657_p0 = scmp.ge.s32.totalorder %s754_s23, 1  ;;  %s754_s23 = sphi %s796_s23, %s16_s23   ;;  %s750_s22 = sphi %s794_s22, %s944_s22   ;;  %s746_s21 = sphi %s792_s21, %s943_s21  }
   0x3   : > { %p30_p1 = scmp.ge.s32.totalorder %s28_s24, 2  ;;  %p246_p2 = scmp.lt.s32.totalorder %s754_s23, 3 }
   0x5   : > { %s946_s24 = smov (%p30_p1, %s28_s24), 0  ;;  %p247_p3 = pnand %p657_p0, %p246_p2 }
   0x6   : > { %p290_p4 = scmp.lt.s32.totalorder (!%p247_p3), %s746_s21, 1 }
   0x7   : > { %250 = sbr.rel (%p247_p3) target bundleno = 365 (0x16d), region = 44 }
   0xc   : > { %v341_v0 = vld [vmem:[%s939_s3 + $0x38] sm:$0xff]  ;;  %v756_v1 = vmov 0   ;;  %v339_v2 = vld [vmem:[%s939_s3 + $0x28] sm:$0xff]  ;;  %s948_s21 = smov (!%p290_p4, %s746_s21), 1  ;;  %v340_v7 = vld [vmem:[%s939_s3 + $0x30] sm:$0xff]  ;;  %vm382_vm0 = vcmask 785408  }
   0xd   : > { %729 = vset.pattern.permute.xlu0 %v756_v1  ;;  %730 = vset.pattern.permute.xlu1 %v756_v1  ;;  %s703_s29 = smul.u32 96, %s948_s21  ;;  %v338_v8 = vld [vmem:[%s939_s3 + $0x20] sm:$0xff]  ;;  %v337_v11 = vld [vmem:[%s939_s3 + $0x18] sm:$0xff]  ;;  %v335_v13 = vld [vmem:[%s939_s3 + $0x8] sm:$0xff]  ;;  %vm484_vm1 = vcmask 523264   ;;  %s677_s13 = sshll.u32 %s948_s21, 5 }
   0xe   : > { %379 = vperm.xlu0 %729, %v341_v0   ;;  %369 = vperm.xlu1 %730, %v339_v2   ;;  %v334_v15 = vld [vmem:[%s939_s3] sm:$0xff]  ;;  %v336_v17 = vld [vmem:[%s939_s3 + $0x10] sm:$0xff]  ;;  %v461_v20 = vld [vmem:[%s941_s5 + $0x8] sm:$0xff]  ;;  %s914_s16 = scalar_lea.vmem %s937_s1, %s677_s13  ;;  %s313_s21 = scalar_lea.vmem %s942_s6, %s677_s13 }
   0xf   : > { %731 = vset.pattern.permute.xlu2 %v756_v1  ;;  %s822_s8 = scalar_lea.vmem %s936_s0, %s703_s29  ;;  %v316_v22 = vld [vmem:[%s938_s2 + $0x10] sm:$0xff]  ;;  %v319_v23 = vld [vmem:[%s938_s2 + $0x28] sm:$0xff]  ;;  %v314_v25 = vld [vmem:[%s938_s2] sm:$0xff] }
  0x10   : > { %v333_v3 = vld [vmem:[%s822_s8 + $0x58] sm:$0xff]  ;;  %v332_v4 = vld [vmem:[%s822_s8 + $0x50] sm:$0xff]  ;;  %v331_v5 = vld [vmem:[%s822_s8 + $0x48] sm:$0xff]  ;;  %359 = vperm.xlu2 %731, %v337_v11  }
  0x11   : > { %679 = vmatpush.msra.mxu2 %v333_v3  ;;  %680 = vmatpush.msra.mxu3 %v333_v3  ;;  %v330_v6 = vld [vmem:[%s822_s8 + $0x40] sm:$0xff]  ;;  %v329_v9 = vld [vmem:[%s822_s8 + $0x38] sm:$0xff]  ;;  %v328_v10 = vld [vmem:[%s822_s8 + $0x30] sm:$0xff] }
  0x12   : > { %411 = vmatpush.msra.mxu0 %v333_v3  ;;  %v327_v12 = vld [vmem:[%s822_s8 + $0x28] sm:$0xff]  ;;  %v326_v14 = vld [vmem:[%s822_s8 + $0x20] sm:$0xff]  ;;  %v325_v16 = vld [vmem:[%s822_s8 + $0x18] sm:$0xff] }
  0x13   : > { %681 = vmatpush.msra.mxu2 %v332_v4  ;;  %682 = vmatpush.msra.mxu3 %v332_v4  ;;  %v324_v18 = vld [vmem:[%s822_s8 + $0x10] sm:$0xff]  ;;  %v323_v19 = vld [vmem:[%s822_s8 + $0x8] sm:$0xff]  ;;  %v322_v21 = vld [vmem:[%s822_s8] sm:$0xff] }
  0x14   : > { %412 = vmatpush.msra.mxu0 %v332_v4  ;;  %v462_v24 = vld [vmem:[%s941_s5 + $0x10] sm:$0xff]  ;;  %v460_v26 = vld [vmem:[%s941_s5] sm:$0xff]  ;;  %v317_v27 = vld [vmem:[%s938_s2 + $0x18] sm:$0xff] }
  0x15   : > { %683 = vmatpush.msra.mxu2 %v331_v5  ;;  %684 = vmatpush.msra.mxu3 %v331_v5  ;;  %v320_v28 = vld [vmem:[%s938_s2 + $0x30] sm:$0xff]  ;;  %v315_v29 = vld [vmem:[%s938_s2 + $0x8] sm:$0xff]  ;;  %v463_v30 = vld [vmem:[%s941_s5 + $0x18] sm:$0xff] }
  0x16   : > { %413 = vmatpush.msra.mxu0 %v331_v5  ;;  %374 = vperm.xlu0 %729, %v340_v7   ;;  %v318_v31 = vld [vmem:[%s938_s2 + $0x20] sm:$0xff]  ;;  %v321_v32 = vld [vmem:[%s938_s2 + $0x38] sm:$0xff]  ;;  %v457_v2 = vld [vmem:[%s940_s4 + $0x8] sm:$0xff]  ;;  %v538_v5 = vlaneseq }
  0x17   : > { %685 = vmatpush.msra.mxu2 %v330_v6  ;;  %686 = vmatpush.msra.mxu3 %v330_v6  ;;  %v456_v1 = vld [vmem:[%s940_s4] sm:$0xff]  ;;  %v458_v3 = vld [vmem:[%s940_s4 + $0x10] sm:$0xff]  ;;  %v459_v4 = vld [vmem:[%s940_s4 + $0x18] sm:$0xff] }
  0x18   : > { %414 = vmatpush.msra.mxu0 %v330_v6  ;;  %364 = vperm.xlu1 %730, %v338_v8   ;;  %v539_v8 = vand.u32 127, %v538_v5 }
  0x19   : > { %687 = vmatpush.msra.mxu2 %v329_v9  ;;  %688 = vmatpush.msra.mxu3 %v329_v9 }
  0x1a   : > { %415 = vmatpush.msra.mxu0 %v329_v9  ;;  %354 = vperm.xlu2 %731, %v336_v17   ;;  %vm543_vm2 = vcmp.lt.s32.totalorder %v539_v8, 48  ;;  %v531_v17 = vld [vmem:[%s914_s16 + $0x8] sm:$0xff] }
  0x1b   : > { %689 = vmatpush.msra.mxu2 %v328_v10  ;;  %690 = vmatpush.msra.mxu3 %v328_v10 }
  0x1c   : > { %416 = vmatpush.msra.mxu0 %v328_v10  ;;  %v530_v10 = vld [vmem:[%s914_s16] sm:$0xff] }
  0x1d   : > { %691 = vmatpush.msra.mxu2 %v327_v12  ;;  %692 = vmatpush.msra.mxu3 %v327_v12 }
  0x1e   : > { %417 = vmatpush.msra.mxu0 %v327_v12  ;;  %349 = vperm.xlu0 %729, %v335_v13  }
  0x1f   : > { %693 = vmatpush.msra.mxu2 %v326_v14  ;;  %694 = vmatpush.msra.mxu3 %v326_v14 }
  0x20   : > { %418 = vmatpush.msra.mxu0 %v326_v14  ;;  %344 = vperm.xlu1 %730, %v334_v15  }
  0x21   : > { %695 = vmatpush.msra.mxu2 %v325_v16  ;;  %696 = vmatpush.msra.mxu3 %v325_v16 }
  0x22   : > { %419 = vmatpush.msra.mxu0 %v325_v16  ;;  %466 = vperm.xlu2 %731, %v460_v26  }
  0x23   : > { %697 = vmatpush.msra.mxu2 %v324_v18  ;;  %698 = vmatpush.msra.mxu3 %v324_v18 }
  0x24   : > { %420 = vmatpush.msra.mxu0 %v324_v18 }
  0x25   : > { %699 = vmatpush.msra.mxu2 %v323_v19  ;;  %700 = vmatpush.msra.mxu3 %v323_v19 }
  0x26   : > { %421 = vmatpush.msra.mxu0 %v323_v19  ;;  %471 = vperm.xlu0 %729, %v461_v20  }
  0x27   : > { %701 = vmatpush.msra.mxu2 %v322_v21  ;;  %702 = vmatpush.msra.mxu3 %v322_v21 }
  0x28   : > { %665 = vmatmul.msk.f32.vlgmr.msra.gmra.mxu2 %vm382_vm0, %v316_v22  ;;  %668 = vmatmul.msk.f32.vlgmr.msra.gmra.mxu3 %vm382_vm0, %v319_v23 }
  0x29   : > { %422 = vmatpush.msra.mxu0 %v322_v21  ;;  %476 = vperm.xlu1 %730, %v462_v24   ;;  %v532_v24 = vld [vmem:[%s914_s16 + $0x10] sm:$0xff] }
  0x2a   : > { %663 = vmatmul.msk.f32.vlgmr.msra.gmra.mxu0 %vm382_vm0, %v314_v25  ;;  %481 = vperm.xlu2 %731, %v463_v30  }
  0x30   : > { %666 = vmatmul.msk.f32.gmra.mxu2 %vm382_vm0, %v317_v27  ;;  %669 = vmatmul.msk.f32.gmra.mxu3 %vm382_vm0, %v320_v28 }
  0x32   : > { %664 = vmatmul.msk.f32.gmra.mxu0 %vm382_vm0, %v315_v29 }
  0x38   : > { %667 = vmatmul.msk.f32.gmra.mxu2 %vm382_vm0, %v318_v31  ;;  %670 = vmatmul.msk.f32.gmra.mxu3 %vm382_vm0, %v321_v32  ;;  %v533_v31 = vld [vmem:[%s914_s16 + $0x18] sm:$0xff] }
  0x6a   : > { %v360_v39 = vpop.permute.xlu2 %359 }
  0x74   : > { %v355_v53 = vpop.permute.xlu2 %354 }
  0x7c   : > { %v467_v6 = vpop.permute.xlu2 %466 }
  0x80   : > { %v380_v35 = vpop.permute.xlu0 %379  ;;  %v370_v36 = vpop.permute.xlu1 %369 }
  0x84   : > { %v482_v28 = vpop.permute.xlu2 %481 }
  0x88   : > { %v375_v41 = vpop.permute.xlu0 %374 }
  0x8a   : > { %v365_v45 = vpop.permute.xlu1 %364 }
  0x90   : > { %v350_v57 = vpop.permute.xlu0 %349 }
  0x92   : > { %v345_v60 = vpop.permute.xlu1 %344 }
  0x98   : > { %v472_v14 = vpop.permute.xlu0 %471 }
  0x9b   : > { %v477_v21 = vpop.permute.xlu1 %476 }
  0xa7   : > { %v424_v40 = vpop.f32.mrf.mxu0 }
  0xa8   : > { %v425_v62 = vadd.f32 %v424_v40, %v345_v60 }
  0xaa   : > { %v448_v0 = vmax.f32 %v425_v62, 0.0 }
  0xab   : > { %v430_v33 = vpop.f32.mrf.mxu2  ;;  %v439_v34 = vpop.f32.mrf.mxu3 }
  0xac   : > { %v440_v47 = vadd.f32 %v439_v34, %v370_v36  ;;  %v431_v55 = vadd.f32 %v430_v33, %v355_v53 }
  0xae   : > { %v453_v51 = vmax.f32 %v440_v47, 0.0  ;;  %v450_v61 = vmax.f32 %v431_v55, 0.0 }
  0xaf   : > { %v427_v54 = vpop.f32.mrf.mxu0 }
  0xb0   : > { %v428_v59 = vadd.f32 %v427_v54, %v350_v57 }
  0xb2   : > { %v449_v63 = vmax.f32 %v428_v59, 0.0 }
  0xb3   : > { %v433_v37 = vpop.f32.mrf.mxu2  ;;  %v442_v38 = vpop.f32.mrf.mxu3 }
  0xb4   : > { %v443_v43 = vadd.f32 %v442_v38, %v375_v41  ;;  %v434_v52 = vadd.f32 %v433_v37, %v360_v39 }
  0xb6   : > { %v454_v49 = vmax.f32 %v443_v43, 0.0  ;;  %v451_v58 = vmax.f32 %v434_v52, 0.0 }
  0xbb   : > { %v445_v42 = vpop.f32.mrf.mxu3  ;;  %v436_v46 = vpop.f32.mrf.mxu2 }
  0xbc   : > { %v446_v44 = vadd.f32 %v445_v42, %v380_v35  ;;  %v437_v50 = vadd.f32 %v436_v46, %v365_v45 }
  0xbe   : > { %v455_v48 = vmax.f32 %v446_v44, 0.0  ;;  %v452_v56 = vmax.f32 %v437_v50, 0.0 }
  0xc0   : > { %505 = vmatpush.msra.mxu1 %v455_v48 }
  0xc2   : > { %506 = vmatpush.msra.mxu1 %v454_v49 }
  0xc4   : > { %507 = vmatpush.msra.mxu1 %v453_v51 }
  0xc6   : > { %508 = vmatpush.msra.mxu1 %v452_v56 }
  0xc8   : > { %509 = vmatpush.msra.mxu1 %v451_v58 }
  0xca   : > { %510 = vmatpush.msra.mxu1 %v450_v61 }
  0xcc   : > { %511 = vmatpush.msra.mxu1 %v449_v63 }
  0xce   : > { %512 = vmatpush.msra.mxu1 %v448_v0 }
  0xcf   : > { %671 = vmatmul.msk.f32.vlgmr.msra.gmra.mxu1 %vm484_vm1, %v456_v1 }
  0xd7   : > { %672 = vmatmul.msk.f32.gmra.mxu1 %vm484_vm1, %v457_v2 }
  0xdf   : > { %673 = vmatmul.msk.f32.gmra.mxu1 %vm484_vm1, %v458_v3 }
  0xe7   : > { %674 = vmatmul.msk.f32.gmra.mxu1 %vm484_vm1, %v459_v4 }
 0x14c   : > { %v514_v7 = vpop.f32.mrf.mxu1 }
 0x14d   : > { %v515_v9 = vadd.f32 %v514_v7, %v467_v6 }
 0x14f   : > { %v526_v11 = vmax.f32 %v515_v9, 0.0 }
 0x151   : > { %v534_v12 = vadd.f32 %v530_v10, %v526_v11 }
 0x153   : > { %v544_v13 = vsel %vm543_vm2, %v534_v12, 0.0 }
 0x154   : > { %548 = vst [vmem:[%s313_s21] sm:$0xff] %v544_v13  ;;  %v517_v15 = vpop.f32.mrf.mxu1 }
 0x155   : > { %v518_v16 = vadd.f32 %v517_v15, %v472_v14 }
 0x157   : > { %v527_v18 = vmax.f32 %v518_v16, 0.0 }
 0x159   : > { %v535_v19 = vadd.f32 %v531_v17, %v527_v18 }
 0x15b   : > { %v545_v20 = vsel %vm543_vm2, %v535_v19, 0.0 }
 0x15c   : > { %549 = vst [vmem:[%s313_s21 + $0x8] sm:$0xff] %v545_v20  ;;  %v520_v22 = vpop.f32.mrf.mxu1 }
 0x15d   : > { %v521_v23 = vadd.f32 %v520_v22, %v477_v21 }
 0x15f   : > { %v528_v25 = vmax.f32 %v521_v23, 0.0 }
 0x161   : > { %v536_v26 = vadd.f32 %v532_v24, %v528_v25 }
 0x163   : > { %v546_v27 = vsel %vm543_vm2, %v536_v26, 0.0 }
 0x164   : > { %550 = vst [vmem:[%s313_s21 + $0x10] sm:$0xff] %v546_v27  ;;  %v523_v29 = vpop.f32.mrf.mxu1 }
 0x165   : > { %v524_v30 = vadd.f32 %v523_v29, %v482_v28 }
 0x167   : > { %v529_v32 = vmax.f32 %v524_v30, 0.0 }
 0x169   : > { %v537_v33 = vadd.f32 %v533_v31, %v529_v32 }
 0x16b   : > { %v547_v34 = vsel %vm543_vm2, %v537_v33, 0.0 }
 0x16c   : > { %551 = vst [vmem:[%s313_s21 + $0x18] sm:$0xff] %v547_v34 }
 0x16d PF: > { %s16_s23 = sadd.s32 1, %s754_s23   ;;  %s943_s21 = smov %s750_s22 }
 0x16e   : > { %p13_p5 = scmp.ge.s32.totalorder %s16_s23, 4   ;;  %s944_s22 = smov %s946_s24 }
 0x170   :  { %15 = sbr.rel (!%p13_p5) target bundleno = 2 (0x2), region = 77 }

// kernel: enhanced_forward.4
= control target key start
LH: loop header
LB: loop body
LE: loop exit
PB: predicated region body
PF: predicated region fallthrough
CT: control target
= control target key end

     0   :  { %s671_s18 = smov 0   ;;  %s673_s19 = smov 0   ;;  %s791_s0 = inlined_call_operand.vmem [shape: f32[2,32,128], index: 0, kind: input, shape index: {}]   ;;  %s792_s1 = inlined_call_operand.vmem [shape: f32[64,32], index: 1, kind: input, shape index: {}]   ;;  %s793_s2 = inlined_call_operand.vmem [shape: f32[64,1], index: 2, kind: input, shape index: {}]   ;;  %s794_s3 = inlined_call_operand.vmem [shape: f32[32,64], index: 3, kind: input, shape index: {}]   ;;  %s795_s4 = inlined_call_operand.vmem [shape: f32[32,1], index: 4, kind: input, shape index: {}]   ;;  %s796_s5 = inlined_call_operand.vmem [shape: f32[2,32,128], index: 5, kind: output, shape index: {}]  }
   0x1   :  { %s675_s20 = smov 0  }
   0x2 LB: > { %s27_s21 = sadd.s32 1, %s634_s19  ;;  %p555_p0 = scmp.ge.s32.totalorder %s638_s20, 1  ;;  %s638_s20 = sphi %s675_s20, %s15_s20   ;;  %s634_s19 = sphi %s673_s19, %s798_s19   ;;  %s630_s18 = sphi %s671_s18, %s797_s18  }
   0x3   : > { %p29_p1 = scmp.ge.s32.totalorder %s27_s21, 2  ;;  %p206_p2 = scmp.lt.s32.totalorder %s638_s20, 3 }
   0x5   : > { %s800_s21 = smov (%p29_p1, %s27_s21), 0  ;;  %p207_p3 = pnand %p555_p0, %p206_p2 }
   0x6   : > { %p240_p4 = scmp.lt.s32.totalorder (!%p207_p3), %s630_s18, 1 }
   0x7   : > { %210 = sbr.rel (%p207_p3) target bundleno = 360 (0x168), region = 40 }
   0xc   : > { %v640_v0 = vmov 0   ;;  %v273_v1 = vld [vmem:[%s793_s2 + $0x28] sm:$0xff]  ;;  %v275_v2 = vld [vmem:[%s793_s2 + $0x38] sm:$0xff]  ;;  %s802_s18 = smov (!%p240_p4, %s630_s18), 1  ;;  %v272_v5 = vld [vmem:[%s793_s2 + $0x20] sm:$0xff]  ;;  %vm316_vm0 = vcmask 261120  }
   0xd   : > { %614 = vset.pattern.permute.xlu1 %v640_v0  ;;  %613 = vset.pattern.permute.xlu0 %v640_v0  ;;  %s574_s26 = sshll.u32 %s802_s18, 5  ;;  %v274_v6 = vld [vmem:[%s793_s2 + $0x30] sm:$0xff]  ;;  %v263_v9 = vld [vmem:[%s792_s1 + $0x18] sm:$0xff]  ;;  %v260_v10 = vld [vmem:[%s792_s1] sm:$0xff]  ;;  %vm418_vm1 = vcmask 523264  }
   0xe   : > { %303 = vperm.xlu1 %614, %v273_v1   ;;  %313 = vperm.xlu0 %613, %v275_v2   ;;  %s247_s29 = scalar_lea.vmem %s791_s0, %s574_s26  ;;  %v269_v11 = vld [vmem:[%s793_s2 + $0x8] sm:$0xff]  ;;  %v268_v12 = vld [vmem:[%s793_s2] sm:$0xff]  ;;  %v271_v13 = vld [vmem:[%s793_s2 + $0x18] sm:$0xff]  ;;  %s255_s11 = scalar_lea.vmem %s796_s5, %s574_s26 }
   0xf   : > { %615 = vset.pattern.permute.xlu2 %v640_v0  ;;  %v259_v3 = vld [vmem:[%s247_s29 + $0x18] sm:$0xff]  ;;  %v258_v4 = vld [vmem:[%s247_s29 + $0x10] sm:$0xff]  ;;  %v257_v7 = vld [vmem:[%s247_s29 + $0x8] sm:$0xff] }
  0x10   : > { %576 = vmatpush.msra.mxu2 %v259_v3  ;;  %353 = vmatpush.msra.mxu0 %v259_v3  ;;  %v256_v8 = vld [vmem:[%s247_s29] sm:$0xff]  ;;  %v261_v15 = vld [vmem:[%s792_s1 + $0x8] sm:$0xff]  ;;  %v270_v16 = vld [vmem:[%s793_s2 + $0x10] sm:$0xff] }
  0x11   : > { %293 = vperm.xlu2 %615, %v271_v13   ;;  %v264_v14 = vld [vmem:[%s792_s1 + $0x20] sm:$0xff]  ;;  %v395_v17 = vld [vmem:[%s795_s4 + $0x8] sm:$0xff]  ;;  %v396_v18 = vld [vmem:[%s795_s4 + $0x10] sm:$0xff] }
  0x12   : > { %577 = vmatpush.msra.mxu2 %v258_v4  ;;  %354 = vmatpush.msra.mxu0 %v258_v4  ;;  %v265_v19 = vld [vmem:[%s792_s1 + $0x28] sm:$0xff]  ;;  %v262_v20 = vld [vmem:[%s792_s1 + $0x10] sm:$0xff]  ;;  %v394_v21 = vld [vmem:[%s795_s4] sm:$0xff] }
  0x13   : > { %v266_v22 = vld [vmem:[%s792_s1 + $0x30] sm:$0xff]  ;;  %v397_v23 = vld [vmem:[%s795_s4 + $0x18] sm:$0xff]  ;;  %v390_v57 = vld [vmem:[%s794_s3] sm:$0xff] }
  0x14   : > { %578 = vmatpush.msra.mxu2 %v257_v7  ;;  %355 = vmatpush.msra.mxu0 %v257_v7  ;;  %v267_v24 = vld [vmem:[%s792_s1 + $0x38] sm:$0xff]  ;;  %v391_v58 = vld [vmem:[%s794_s3 + $0x8] sm:$0xff]  ;;  %v392_v59 = vld [vmem:[%s794_s3 + $0x10] sm:$0xff] }
  0x15   : > { %v393_v60 = vld [vmem:[%s794_s3 + $0x18] sm:$0xff] }
  0x16   : > { %298 = vperm.xlu1 %614, %v272_v5   ;;  %308 = vperm.xlu0 %613, %v274_v6  }
  0x17   : > { %579 = vmatpush.msra.mxu2 %v256_v8  ;;  %356 = vmatpush.msra.mxu0 %v256_v8 }
  0x18   : > { %563 = vmatmul.msk.f32.vlgmr.msra.gmra.mxu2 %vm316_vm0, %v263_v9  ;;  %560 = vmatmul.msk.f32.vlgmr.msra.gmra.mxu0 %vm316_vm0, %v260_v10 }
  0x19   : > { %288 = vperm.xlu2 %615, %v270_v16  }
  0x1e   : > { %283 = vperm.xlu0 %613, %v269_v11   ;;  %278 = vperm.xlu1 %614, %v268_v12  }
  0x20   : > { %564 = vmatmul.msk.f32.gmra.mxu2 %vm316_vm0, %v264_v14  ;;  %561 = vmatmul.msk.f32.gmra.mxu0 %vm316_vm0, %v261_v15 }
  0x21   : > { %400 = vperm.xlu2 %615, %v394_v21  }
  0x26   : > { %405 = vperm.xlu0 %613, %v395_v17   ;;  %410 = vperm.xlu1 %614, %v396_v18  }
  0x28   : > { %565 = vmatmul.msk.f32.gmra.mxu2 %vm316_vm0, %v265_v19  ;;  %562 = vmatmul.msk.f32.gmra.mxu0 %vm316_vm0, %v262_v20 }
  0x29   : > { %415 = vperm.xlu2 %615, %v397_v23  }
  0x30   : > { %566 = vmatmul.msk.f32.gmra.mxu2 %vm316_vm0, %v266_v22 }
  0x38   : > { %567 = vmatmul.msk.f32.gmra.mxu2 %vm316_vm0, %v267_v24 }
  0x6b   : > { %v294_v33 = vpop.permute.xlu2 %293 }
  0x73   : > { %v289_v46 = vpop.permute.xlu2 %288 }
  0x7b   : > { %v401_v61 = vpop.permute.xlu2 %400 }
  0x80   : > { %v314_v29 = vpop.permute.xlu0 %313  ;;  %v304_v30 = vpop.permute.xlu1 %303 }
  0x83   : > { %v416_v9 = vpop.permute.xlu2 %415 }
  0x88   : > { %v309_v34 = vpop.permute.xlu0 %308  ;;  %v299_v38 = vpop.permute.xlu1 %298 }
  0x90   : > { %v284_v49 = vpop.permute.xlu0 %283  ;;  %v279_v52 = vpop.permute.xlu1 %278 }
  0x95   : > { %v358_v28 = vpop.f32.mrf.mxu0 }
  0x96   : > { %v359_v53 = vadd.f32 %v358_v28, %v279_v52 }
  0x98   : > { %v382_v56 = vmax.f32 %v359_v53, 0.0  ;;  %v406_v1 = vpop.permute.xlu0 %405  ;;  %v411_v5 = vpop.permute.xlu1 %410 }
  0x9b   : > { %v367_v25 = vpop.f32.mrf.mxu2 }
  0x9c   : > { %v368_v44 = vadd.f32 %v367_v25, %v294_v33 }
  0x9d   : > { %v361_v32 = vpop.f32.mrf.mxu0 }
  0x9e   : > { %v385_v50 = vmax.f32 %v368_v44, 0.0  ;;  %v362_v51 = vadd.f32 %v361_v32, %v284_v49 }
  0xa0   : > { %v383_v55 = vmax.f32 %v362_v51, 0.0 }
  0xa3   : > { %v370_v26 = vpop.f32.mrf.mxu2 }
  0xa4   : > { %v371_v41 = vadd.f32 %v370_v26, %v299_v38 }
  0xa5   : > { %v364_v43 = vpop.f32.mrf.mxu0 }
  0xa6   : > { %v386_v47 = vmax.f32 %v371_v41, 0.0  ;;  %v365_v48 = vadd.f32 %v364_v43, %v289_v46 }
  0xa8   : > { %v384_v54 = vmax.f32 %v365_v48, 0.0 }
  0xab   : > { %v373_v27 = vpop.f32.mrf.mxu2 }
  0xac   : > { %v374_v39 = vadd.f32 %v373_v27, %v304_v30 }
  0xae   : > { %v387_v45 = vmax.f32 %v374_v39, 0.0 }
  0xb3   : > { %v376_v31 = vpop.f32.mrf.mxu2 }
  0xb4   : > { %v377_v36 = vadd.f32 %v376_v31, %v309_v34 }
  0xb6   : > { %v388_v42 = vmax.f32 %v377_v36, 0.0 }
  0xbb   : > { %v379_v35 = vpop.f32.mrf.mxu2 }
  0xbc   : > { %v380_v37 = vadd.f32 %v379_v35, %v314_v29 }
  0xbe   : > { %v389_v40 = vmax.f32 %v380_v37, 0.0 }
  0xc0   : > { %439 = vmatpush.msra.mxu1 %v389_v40  ;;  %580 = vmatpush.msra.mxu3 %v389_v40 }
  0xc2   : > { %440 = vmatpush.msra.mxu1 %v388_v42  ;;  %581 = vmatpush.msra.mxu3 %v388_v42 }
  0xc4   : > { %441 = vmatpush.msra.mxu1 %v387_v45  ;;  %582 = vmatpush.msra.mxu3 %v387_v45 }
  0xc6   : > { %442 = vmatpush.msra.mxu1 %v386_v47  ;;  %583 = vmatpush.msra.mxu3 %v386_v47 }
  0xc8   : > { %443 = vmatpush.msra.mxu1 %v385_v50  ;;  %584 = vmatpush.msra.mxu3 %v385_v50 }
  0xca   : > { %444 = vmatpush.msra.mxu1 %v384_v54  ;;  %585 = vmatpush.msra.mxu3 %v384_v54 }
  0xcc   : > { %445 = vmatpush.msra.mxu1 %v383_v55  ;;  %586 = vmatpush.msra.mxu3 %v383_v55 }
  0xce   : > { %446 = vmatpush.msra.mxu1 %v382_v56  ;;  %587 = vmatpush.msra.mxu3 %v382_v56 }
  0xcf   : > { %568 = vmatmul.msk.f32.vlgmr.msra.gmra.mxu1 %vm418_vm1, %v390_v57  ;;  %569 = vmatmul.msk.f32.vlgmr.msra.gmra.mxu3 %vm418_vm1, %v391_v58 }
  0xd7   : > { %570 = vmatmul.msk.f32.gmra.mxu3 %vm418_vm1, %v392_v59 }
  0xdf   : > { %571 = vmatmul.msk.f32.gmra.mxu3 %vm418_vm1, %v393_v60 }
 0x14c   : > { %v448_v62 = vpop.f32.mrf.mxu1 }
 0x14d   : > { %v449_v63 = vadd.f32 %v448_v62, %v401_v61 }
 0x14f   : > { %v460_v0 = vmax.f32 %v449_v63, 0.0 }
 0x151   : > { %464 = vst [vmem:[%s255_s11] sm:$0xff] %v460_v0 }
 0x152   : > { %v451_v2 = vpop.f32.mrf.mxu3 }
 0x153   : > { %v452_v3 = vadd.f32 %v451_v2, %v406_v1 }
 0x155   : > { %v461_v4 = vmax.f32 %v452_v3, 0.0 }
 0x157   : > { %465 = vst [vmem:[%s255_s11 + $0x8] sm:$0xff] %v461_v4 }
 0x15a   : > { %v454_v6 = vpop.f32.mrf.mxu3 }
 0x15b   : > { %v455_v7 = vadd.f32 %v454_v6, %v411_v5 }
 0x15d   : > { %v462_v8 = vmax.f32 %v455_v7, 0.0 }
 0x15f   : > { %466 = vst [vmem:[%s255_s11 + $0x10] sm:$0xff] %v462_v8 }
 0x162   : > { %v457_v10 = vpop.f32.mrf.mxu3 }
 0x163   : > { %v458_v11 = vadd.f32 %v457_v10, %v416_v9 }
 0x165   : > { %v463_v12 = vmax.f32 %v458_v11, 0.0 }
 0x167   : > { %467 = vst [vmem:[%s255_s11 + $0x18] sm:$0xff] %v463_v12 }
 0x168 PF: > { %s15_s20 = sadd.s32 1, %s638_s20   ;;  %s797_s18 = smov %s634_s19 }
 0x169   : > { %p12_p5 = scmp.ge.s32.totalorder %s15_s20, 4   ;;  %s798_s19 = smov %s800_s21 }
 0x16b   :  { %14 = sbr.rel (!%p12_p5) target bundleno = 2 (0x2), region = 70 }

// kernel: enhanced_forward.5
= control target key start
LH: loop header
LB: loop body
LE: loop exit
PB: predicated region body
PF: predicated region fallthrough
CT: control target
= control target key end

     0   :  { %s2455_s15 = smov 0   ;;  %s3637_s0 = inlined_call_operand.vmem [shape: f32[2,48,128], index: 0, kind: input, shape index: {}]   ;;  %s3638_s1 = inlined_call_operand.vmem [shape: f32[7,128,64], index: 1, kind: input, shape index: {}]   ;;  %s3639_s2 = inlined_call_operand.vmem [shape: f32[7,1,64], index: 2, kind: input, shape index: {}]   ;;  %s3640_s3 = inlined_call_operand.vmem [shape: f32[7,64,1], index: 3, kind: input, shape index: {}]   ;;  %s3641_s4 = inlined_call_operand.vmem [shape: f32[2,8,128], index: 4, kind: output, shape index: {}]  }
   0x1 LB: > { %s1988_s16 = sadd.s32 4294967295, %s2427_s15   ;;  %p1992_p0 = scmp.ge.s32.totalorder %s2427_s15, 1  ;;  %s2427_s15 = sphi %s2455_s15, %s14_s15  }
   0x2   : > { %p162_p1 = scmp.lt.s32.totalorder %s2427_s15, 3 }
   0x4   : > { %p163_p2 = pnand %p1992_p0, %p162_p1 }
   0x5   : > { %p187_p3 = scmp.lt.s32.totalorder (!%p163_p2), %s1988_s16, 1 }
   0x6   : > { %166 = sbr.rel (%p163_p2) target bundleno = 848 (0x350), region = 36 }
   0xb   : > { %v217_v0 = vld [vmem:[%s3638_s1 + $0x78] sm:$0xff]  ;;  %v216_v1 = vld [vmem:[%s3638_s1 + $0x70] sm:$0xff]  ;;  %v215_v4 = vld [vmem:[%s3638_s1 + $0x68] sm:$0xff]  ;;  %s3647_s16 = smov (!%p187_p3, %s1988_s16), 1  ;;  %vm271_vm0 = vcmask 523264   ;;  %vm325_vm1 = vcmask 7168  }
   0xc   : > { %222 = vmatpush.msra.mxu0 %v217_v0  ;;  %v2016_v2 = vld [vmem:[%s3638_s1 + $0xf8] sm:$0xff]  ;;  %v2015_v3 = vld [vmem:[%s3638_s1 + $0xf0] sm:$0xff]  ;;  %v2014_v5 = vld [vmem:[%s3638_s1 + $0xe8] sm:$0xff]  ;;  %s2213_s19 = smul.u32 48, %s3647_s16 }
   0xd   : > { %467 = vmatpush.msra.mxu2 %v2016_v2  ;;  %v214_v6 = vld [vmem:[%s3638_s1 + $0x60] sm:$0xff]  ;;  %v213_v8 = vld [vmem:[%s3638_s1 + $0x58] sm:$0xff]  ;;  %v212_v10 = vld [vmem:[%s3638_s1 + $0x50] sm:$0xff] }
   0xe   : > { %223 = vmatpush.msra.mxu0 %v216_v1  ;;  %v2013_v7 = vld [vmem:[%s3638_s1 + $0xe0] sm:$0xff]  ;;  %v2012_v9 = vld [vmem:[%s3638_s1 + $0xd8] sm:$0xff]  ;;  %v2011_v11 = vld [vmem:[%s3638_s1 + $0xd0] sm:$0xff]  ;;  %s2560_s30 = scalar_lea.vmem %s3637_s0, %s2213_s19 }
   0xf   : > { %468 = vmatpush.msra.mxu2 %v2015_v3  ;;  %v211_v12 = vld [vmem:[%s3638_s1 + $0x48] sm:$0xff]  ;;  %v210_v13 = vld [vmem:[%s3638_s1 + $0x40] sm:$0xff]  ;;  %v209_v16 = vld [vmem:[%s3638_s1 + $0x38] sm:$0xff] }
  0x10   : > { %224 = vmatpush.msra.mxu0 %v215_v4  ;;  %v2010_v14 = vld [vmem:[%s3638_s1 + $0xc8] sm:$0xff]  ;;  %v2009_v15 = vld [vmem:[%s3638_s1 + $0xc0] sm:$0xff]  ;;  %v2008_v17 = vld [vmem:[%s3638_s1 + $0xb8] sm:$0xff] }
  0x11   : > { %469 = vmatpush.msra.mxu2 %v2014_v5  ;;  %v208_v18 = vld [vmem:[%s3638_s1 + $0x30] sm:$0xff]  ;;  %v207_v20 = vld [vmem:[%s3638_s1 + $0x28] sm:$0xff]  ;;  %v206_v22 = vld [vmem:[%s3638_s1 + $0x20] sm:$0xff] }
  0x12   : > { %225 = vmatpush.msra.mxu0 %v214_v6  ;;  %v2007_v19 = vld [vmem:[%s3638_s1 + $0xb0] sm:$0xff]  ;;  %v2006_v21 = vld [vmem:[%s3638_s1 + $0xa8] sm:$0xff]  ;;  %v2005_v23 = vld [vmem:[%s3638_s1 + $0xa0] sm:$0xff] }
  0x13   : > { %470 = vmatpush.msra.mxu2 %v2013_v7  ;;  %v205_v24 = vld [vmem:[%s3638_s1 + $0x18] sm:$0xff]  ;;  %v204_v26 = vld [vmem:[%s3638_s1 + $0x10] sm:$0xff]  ;;  %v203_v28 = vld [vmem:[%s3638_s1 + $0x8] sm:$0xff] }
  0x14   : > { %226 = vmatpush.msra.mxu0 %v213_v8  ;;  %v2004_v25 = vld [vmem:[%s3638_s1 + $0x98] sm:$0xff]  ;;  %v2003_v27 = vld [vmem:[%s3638_s1 + $0x90] sm:$0xff]  ;;  %v2002_v29 = vld [vmem:[%s3638_s1 + $0x88] sm:$0xff] }
  0x15   : > { %471 = vmatpush.msra.mxu2 %v2012_v9  ;;  %v202_v30 = vld [vmem:[%s3638_s1] sm:$0xff]  ;;  %v2078_v33 = vld [vmem:[%s3638_s1 + $0x1f8] sm:$0xff]  ;;  %v2077_v34 = vld [vmem:[%s3638_s1 + $0x1f0] sm:$0xff] }
  0x16   : > { %227 = vmatpush.msra.mxu0 %v212_v10  ;;  %v2569_v31 = vld [vmem:[%s2560_s30] sm:$0xff]  ;;  %v2076_v35 = vld [vmem:[%s3638_s1 + $0x1e8] sm:$0xff]  ;;  %v2074_v38 = vld [vmem:[%s3638_s1 + $0x1d8] sm:$0xff] }
  0x17   : > { %472 = vmatpush.msra.mxu2 %v2011_v11  ;;  %v2001_v32 = vld [vmem:[%s3638_s1 + $0x80] sm:$0xff]  ;;  %v2589_v37 = vld [vmem:[%s2560_s30 + $0x8] sm:$0xff]  ;;  %v2073_v39 = vld [vmem:[%s3638_s1 + $0x1d0] sm:$0xff] }
  0x18   : > { %228 = vmatpush.msra.mxu0 %v211_v12  ;;  %v2075_v36 = vld [vmem:[%s3638_s1 + $0x1e0] sm:$0xff]  ;;  %v2072_v40 = vld [vmem:[%s3638_s1 + $0x1c8] sm:$0xff]  ;;  %v2606_v42 = vld [vmem:[%s2560_s30 + $0x10] sm:$0xff] }
  0x19   : > { %473 = vmatpush.msra.mxu2 %v2010_v14  ;;  %v2071_v41 = vld [vmem:[%s3638_s1 + $0x1c0] sm:$0xff]  ;;  %v2070_v43 = vld [vmem:[%s3638_s1 + $0x1b8] sm:$0xff]  ;;  %v2069_v44 = vld [vmem:[%s3638_s1 + $0x1b0] sm:$0xff] }
  0x1a   : > { %229 = vmatpush.msra.mxu0 %v210_v13  ;;  %v2068_v45 = vld [vmem:[%s3638_s1 + $0x1a8] sm:$0xff]  ;;  %v2067_v46 = vld [vmem:[%s3638_s1 + $0x1a0] sm:$0xff]  ;;  %v2623_v47 = vld [vmem:[%s2560_s30 + $0x18] sm:$0xff] }
  0x1b   : > { %474 = vmatpush.msra.mxu2 %v2009_v15  ;;  %v2066_v48 = vld [vmem:[%s3638_s1 + $0x198] sm:$0xff]  ;;  %v2065_v49 = vld [vmem:[%s3638_s1 + $0x190] sm:$0xff]  ;;  %v2064_v50 = vld [vmem:[%s3638_s1 + $0x188] sm:$0xff] }
  0x1c   : > { %230 = vmatpush.msra.mxu0 %v209_v16  ;;  %v2063_v51 = vld [vmem:[%s3638_s1 + $0x180] sm:$0xff]  ;;  %v2140_v53 = vld [vmem:[%s3638_s1 + $0x2f8] sm:$0xff]  ;;  %v2648_v54 = vld [vmem:[%s2560_s30 + $0x28] sm:$0xff] }
  0x1d   : > { %475 = vmatpush.msra.mxu2 %v2008_v17  ;;  %v2640_v52 = vld [vmem:[%s2560_s30 + $0x20] sm:$0xff]  ;;  %v2139_v55 = vld [vmem:[%s3638_s1 + $0x2f0] sm:$0xff]  ;;  %v2138_v56 = vld [vmem:[%s3638_s1 + $0x2e8] sm:$0xff] }
  0x1e   : > { %231 = vmatpush.msra.mxu0 %v208_v18  ;;  %v2137_v57 = vld [vmem:[%s3638_s1 + $0x2e0] sm:$0xff]  ;;  %v2136_v58 = vld [vmem:[%s3638_s1 + $0x2d8] sm:$0xff]  ;;  %v2135_v59 = vld [vmem:[%s3638_s1 + $0x2d0] sm:$0xff] }
  0x1f   : > { %476 = vmatpush.msra.mxu2 %v2007_v19  ;;  %v2134_v60 = vld [vmem:[%s3638_s1 + $0x2c8] sm:$0xff]  ;;  %v2133_v61 = vld [vmem:[%s3638_s1 + $0x2c0] sm:$0xff]  ;;  %v2132_v62 = vld [vmem:[%s3638_s1 + $0x2b8] sm:$0xff] }
  0x20   : > { %232 = vmatpush.msra.mxu0 %v207_v20  ;;  %v2131_v63 = vld [vmem:[%s3638_s1 + $0x2b0] sm:$0xff]  ;;  %v2130_v0 = vld [vmem:[%s3638_s1 + $0x2a8] sm:$0xff]  ;;  %v2129_v1 = vld [vmem:[%s3638_s1 + $0x2a0] sm:$0xff] }
  0x21   : > { %477 = vmatpush.msra.mxu2 %v2006_v21  ;;  %v2128_v2 = vld [vmem:[%s3638_s1 + $0x298] sm:$0xff]  ;;  %v2127_v3 = vld [vmem:[%s3638_s1 + $0x290] sm:$0xff]  ;;  %v2126_v4 = vld [vmem:[%s3638_s1 + $0x288] sm:$0xff] }
  0x22   : > { %233 = vmatpush.msra.mxu0 %v206_v22  ;;  %v2125_v5 = vld [vmem:[%s3638_s1 + $0x280] sm:$0xff]  ;;  %v270_v6 = vld [vmem:[%s3640_s3 + $0x38] sm:$0xff]  ;;  %v269_v7 = vld [vmem:[%s3640_s3 + $0x30] sm:$0xff] }
  0x23   : > { %478 = vmatpush.msra.mxu2 %v2005_v23  ;;  %298 = vmatpush.msra.mxu1 %v270_v6  ;;  %v268_v8 = vld [vmem:[%s3640_s3 + $0x28] sm:$0xff]  ;;  %v267_v9 = vld [vmem:[%s3640_s3 + $0x20] sm:$0xff]  ;;  %v266_v10 = vld [vmem:[%s3640_s3 + $0x18] sm:$0xff] }
  0x24   : > { %234 = vmatpush.msra.mxu0 %v205_v24  ;;  %v265_v11 = vld [vmem:[%s3640_s3 + $0x10] sm:$0xff]  ;;  %v264_v12 = vld [vmem:[%s3640_s3 + $0x8] sm:$0xff]  ;;  %v263_v13 = vld [vmem:[%s3640_s3] sm:$0xff] }
  0x25   : > { %479 = vmatpush.msra.mxu2 %v2004_v25  ;;  %299 = vmatpush.msra.mxu1 %v269_v7  ;;  %v2047_v14 = vld [vmem:[%s3638_s1 + $0x178] sm:$0xff]  ;;  %v2046_v15 = vld [vmem:[%s3638_s1 + $0x170] sm:$0xff]  ;;  %v2045_v16 = vld [vmem:[%s3638_s1 + $0x168] sm:$0xff] }
  0x26   : > { %235 = vmatpush.msra.mxu0 %v204_v26  ;;  %v2044_v17 = vld [vmem:[%s3638_s1 + $0x160] sm:$0xff]  ;;  %v2025_v18 = vld [vmem:[%s3640_s3 + $0x78] sm:$0xff]  ;;  %v2024_v19 = vld [vmem:[%s3640_s3 + $0x70] sm:$0xff] }
  0x27   : > { %480 = vmatpush.msra.mxu2 %v2003_v27  ;;  %300 = vmatpush.msra.mxu1 %v268_v8  ;;  %v2043_v20 = vld [vmem:[%s3638_s1 + $0x158] sm:$0xff]  ;;  %v2023_v21 = vld [vmem:[%s3640_s3 + $0x68] sm:$0xff]  ;;  %v2022_v22 = vld [vmem:[%s3640_s3 + $0x60] sm:$0xff] }
  0x28   : > { %236 = vmatpush.msra.mxu0 %v203_v28  ;;  %2189 = vmatpush.msra.mxu3 %v2025_v18  ;;  %v2042_v23 = vld [vmem:[%s3638_s1 + $0x150] sm:$0xff]  ;;  %v2041_v24 = vld [vmem:[%s3638_s1 + $0x148] sm:$0xff]  ;;  %v2021_v25 = vld [vmem:[%s3640_s3 + $0x58] sm:$0xff] }
  0x29   : > { %481 = vmatpush.msra.mxu2 %v2002_v29  ;;  %301 = vmatpush.msra.mxu1 %v267_v9  ;;  %v2020_v26 = vld [vmem:[%s3640_s3 + $0x50] sm:$0xff]  ;;  %v2773_v27 = vld [vmem:[%s3639_s2] ss:$0 sm:$0xff]  ;;  %v2109_v6 = vld [vmem:[%s3638_s1 + $0x278] sm:$0xff] }
  0x2a   : > { %237 = vmatpush.msra.mxu0 %v202_v30  ;;  %2190 = vmatpush.msra.mxu3 %v2024_v19  ;;  %v2040_v28 = vld [vmem:[%s3638_s1 + $0x140] sm:$0xff]  ;;  %v2019_v30 = vld [vmem:[%s3640_s3 + $0x48] sm:$0xff]  ;;  %v2082_v7 = vld [vmem:[%s3640_s3 + $0xd0] sm:$0xff] }
  0x2b   : > { %238 = vmatmul.f32.vlgmr.msra.gmra.mxu0 %v2569_v31  ;;  %482 = vmatpush.msra.mxu2 %v2001_v32  ;;  %v2108_v8 = vld [vmem:[%s3638_s1 + $0x270] sm:$0xff]  ;;  %v2081_v9 = vld [vmem:[%s3640_s3 + $0xc8] sm:$0xff] }
  0x2c   : > { %483 = vmatmul.f32.vlgmr.msra.gmra.mxu2 %v2569_v31  ;;  %955 = vmatpush.msrb.mxu0 %v2078_v33  ;;  %v2018_v33 = vld [vmem:[%s3640_s3 + $0x40] sm:$0xff] }
  0x2d   : > { %302 = vmatpush.msra.mxu1 %v266_v10  ;;  %543 = vmatpush.msrb.mxu2 %v2025_v18  ;;  %v2107_v10 = vld [vmem:[%s3638_s1 + $0x268] sm:$0xff]  ;;  %v2106_v18 = vld [vmem:[%s3638_s1 + $0x260] sm:$0xff] }
  0x2e   : > { %956 = vmatpush.msrb.mxu0 %v2077_v34  ;;  %2191 = vmatpush.msra.mxu3 %v2023_v21  ;;  %v2039_v34 = vld [vmem:[%s3638_s1 + $0x138] sm:$0xff] }
  0x2f   : > { %303 = vmatpush.msra.mxu1 %v265_v11  ;;  %544 = vmatpush.msrb.mxu2 %v2024_v19  ;;  %v2080_v11 = vld [vmem:[%s3640_s3 + $0xc0] sm:$0xff]  ;;  %v2105_v19 = vld [vmem:[%s3638_s1 + $0x258] sm:$0xff] }
  0x30   : > { %957 = vmatpush.msrb.mxu0 %v2076_v35  ;;  %2192 = vmatpush.msra.mxu3 %v2022_v22  ;;  %v2038_v35 = vld [vmem:[%s3638_s1 + $0x130] sm:$0xff] }
  0x31   : > { %304 = vmatpush.msra.mxu1 %v264_v12  ;;  %545 = vmatpush.msrb.mxu2 %v2023_v21 }
  0x32   : > { %958 = vmatpush.msrb.mxu0 %v2075_v36  ;;  %2193 = vmatpush.msra.mxu3 %v2021_v25  ;;  %v2795_v36 = vld [vmem:[%s3639_s2 + $0x1] ss:$0 sm:$0xff] }
  0x33   : > { %241 = vmatmul.f32.gmra.mxu0 %v2589_v37  ;;  %305 = vmatpush.msra.mxu1 %v263_v13 }
  0x34   : > { %486 = vmatmul.f32.gmra.mxu2 %v2589_v37  ;;  %959 = vmatpush.msrb.mxu0 %v2074_v38 }
  0x35   : > { %711 = vmatpush.msrb.mxu1 %v2047_v14  ;;  %546 = vmatpush.msrb.mxu2 %v2022_v22 }
  0x36   : > { %960 = vmatpush.msrb.mxu0 %v2073_v39  ;;  %2194 = vmatpush.msra.mxu3 %v2020_v26 }
  0x37   : > { %712 = vmatpush.msrb.mxu1 %v2046_v15  ;;  %547 = vmatpush.msrb.mxu2 %v2021_v25 }
  0x38   : > { %961 = vmatpush.msrb.mxu0 %v2072_v40  ;;  %2195 = vmatpush.msra.mxu3 %v2019_v30 }
  0x39   : > { %713 = vmatpush.msrb.mxu1 %v2045_v16  ;;  %548 = vmatpush.msrb.mxu2 %v2020_v26 }
  0x3a   : > { %962 = vmatpush.msrb.mxu0 %v2071_v41  ;;  %2196 = vmatpush.msra.mxu3 %v2018_v33 }
  0x3b   : > { %244 = vmatmul.f32.gmra.mxu0 %v2606_v42  ;;  %714 = vmatpush.msrb.mxu1 %v2044_v17 }
  0x3c   : > { %489 = vmatmul.f32.gmra.mxu2 %v2606_v42  ;;  %963 = vmatpush.msrb.mxu0 %v2070_v43 }
  0x3d   : > { %715 = vmatpush.msrb.mxu1 %v2043_v20  ;;  %549 = vmatpush.msrb.mxu2 %v2019_v30  ;;  %v2104_v20 = vld [vmem:[%s3638_s1 + $0x250] sm:$0xff]  ;;  %v2886_v30 = vld [vmem:[%s3639_s2 + $0x3] ss:$0 sm:$0xff] }
  0x3e   : > { %964 = vmatpush.msrb.mxu0 %v2069_v44  ;;  %v2037_v44 = vld [vmem:[%s3638_s1 + $0x128] sm:$0xff] }
  0x3f   : > { %716 = vmatpush.msrb.mxu1 %v2042_v23  ;;  %550 = vmatpush.msrb.mxu2 %v2018_v33 }
  0x40   : > { %965 = vmatpush.msrb.mxu0 %v2068_v45  ;;  %v2036_v45 = vld [vmem:[%s3638_s1 + $0x120] sm:$0xff] }
  0x41   : > { %717 = vmatpush.msrb.mxu1 %v2041_v24 }
  0x42   : > { %966 = vmatpush.msrb.mxu0 %v2067_v46  ;;  %v2035_v46 = vld [vmem:[%s3638_s1 + $0x118] sm:$0xff] }
  0x43   : > { %247 = vmatmul.f32.gmra.mxu0 %v2623_v47  ;;  %718 = vmatpush.msrb.mxu1 %v2040_v28  ;;  %v2103_v28 = vld [vmem:[%s3638_s1 + $0x248] sm:$0xff] }
  0x44   : > { %492 = vmatmul.f32.gmra.mxu2 %v2623_v47  ;;  %967 = vmatpush.msrb.mxu0 %v2066_v48 }
  0x45   : > { %719 = vmatpush.msrb.mxu1 %v2039_v34 }
  0x46   : > { %968 = vmatpush.msrb.mxu0 %v2065_v49 }
  0x47   : > { %720 = vmatpush.msrb.mxu1 %v2038_v35 }
  0x48   : > { %969 = vmatpush.msrb.mxu0 %v2064_v50 }
  0x49   : > { %721 = vmatpush.msrb.mxu1 %v2037_v44 }
  0x4a   : > { %970 = vmatpush.msrb.mxu0 %v2063_v51 }
  0x4b   : > { %250 = vmatmul.f32.gmra.mxu0 %v2640_v52  ;;  %722 = vmatpush.msrb.mxu1 %v2036_v45 }
  0x4c   : > { %495 = vmatmul.f32.gmra.mxu2 %v2640_v52  ;;  %1443 = vmatpush.msra.mxu0 %v2140_v53  ;;  %v2034_v53 = vld [vmem:[%s3638_s1 + $0x110] sm:$0xff] }
  0x4d   : > { %723 = vmatpush.msrb.mxu1 %v2035_v46  ;;  %v2098_v46 = vld [vmem:[%s3638_s1 + $0x220] sm:$0xff] }
  0x4e   : > { %1444 = vmatpush.msra.mxu0 %v2139_v55 }
  0x4f   : > { %724 = vmatpush.msrb.mxu1 %v2034_v53 }
  0x50   : > { %1445 = vmatpush.msra.mxu0 %v2138_v56 }
  0x52   : > { %1446 = vmatpush.msra.mxu0 %v2137_v57  ;;  %v2087_v57 = vld [vmem:[%s3640_s3 + $0xf8] sm:$0xff] }
  0x53   : > { %253 = vmatmul.f32.gmra.mxu0 %v2648_v54  ;;  %1031 = vmatpush.msra.mxu2 %v2087_v57  ;;  %v2149_v57 = vld [vmem:[%s3640_s3 + $0x178] sm:$0xff] }
  0x54   : > { %498 = vmatmul.f32.gmra.mxu2 %v2648_v54  ;;  %1447 = vmatpush.msra.mxu0 %v2136_v58  ;;  %v2033_v58 = vld [vmem:[%s3638_s1 + $0x108] sm:$0xff] }
  0x55   : > { %725 = vmatpush.msrb.mxu1 %v2033_v58 }
  0x56   : > { %1448 = vmatpush.msra.mxu0 %v2135_v59  ;;  %v2086_v59 = vld [vmem:[%s3640_s3 + $0xf0] sm:$0xff] }
  0x57   : > { %1032 = vmatpush.msra.mxu2 %v2086_v59 }
  0x58   : > { %1449 = vmatpush.msra.mxu0 %v2134_v60  ;;  %v2085_v60 = vld [vmem:[%s3640_s3 + $0xe8] sm:$0xff] }
  0x59   : > { %1033 = vmatpush.msra.mxu2 %v2085_v60 }
  0x5a   : > { %1450 = vmatpush.msra.mxu0 %v2133_v61  ;;  %v2032_v61 = vld [vmem:[%s3638_s1 + $0x100] sm:$0xff] }
  0x5b   : > { %971 = vmatmul.f32.vlgmr.msrb.gmra.mxu0 %v2569_v31  ;;  %726 = vmatpush.msrb.mxu1 %v2032_v61  ;;  %v2148_v61 = vld [vmem:[%s3640_s3 + $0x170] sm:$0xff] }
  0x5c   : > { %1451 = vmatpush.msra.mxu0 %v2132_v62  ;;  %v2084_v62 = vld [vmem:[%s3640_s3 + $0xe0] sm:$0xff] }
  0x5d   : > { %1034 = vmatpush.msra.mxu2 %v2084_v62  ;;  %v2171_v62 = vld [vmem:[%s3638_s1 + $0x378] sm:$0xff] }
  0x5e   : > { %1452 = vmatpush.msra.mxu0 %v2131_v63 }
  0x60   : > { %1453 = vmatpush.msra.mxu0 %v2130_v0 }
  0x62   : > { %1454 = vmatpush.msra.mxu0 %v2129_v1 }
  0x63   : > { %974 = vmatmul.f32.gmra.mxu0 %v2589_v37 }
  0x64   : > { %1455 = vmatpush.msra.mxu0 %v2128_v2 }
  0x66   : > { %1456 = vmatpush.msra.mxu0 %v2127_v3 }
  0x68   : > { %1457 = vmatpush.msra.mxu0 %v2126_v4 }
  0x6a   : > { %1458 = vmatpush.msra.mxu0 %v2125_v5  ;;  %v2083_v5 = vld [vmem:[%s3640_s3 + $0xd8] sm:$0xff] }
  0x6b   : > { %977 = vmatmul.f32.gmra.mxu0 %v2606_v42  ;;  %1035 = vmatpush.msra.mxu2 %v2083_v5 }
  0x6c   : > { %1687 = vmatpush.msrb.mxu0 %v2171_v62 }
  0x6d   : > { %1036 = vmatpush.msra.mxu2 %v2082_v7  ;;  %v2144_v7 = vld [vmem:[%s3640_s3 + $0x150] sm:$0xff] }
  0x6f   : > { %1037 = vmatpush.msra.mxu2 %v2081_v9  ;;  %v2143_v9 = vld [vmem:[%s3640_s3 + $0x148] sm:$0xff] }
  0x71   : > { %1038 = vmatpush.msra.mxu2 %v2080_v11  ;;  %v2142_v11 = vld [vmem:[%s3640_s3 + $0x140] sm:$0xff] }
  0x73   : > { %980 = vmatmul.f32.gmra.mxu0 %v2623_v47 }
  0x7b   : > { %983 = vmatmul.f32.gmra.mxu0 %v2640_v52 }
  0x83   : > { %986 = vmatmul.f32.gmra.mxu0 %v2648_v54 }
  0x8b   : > { %1459 = vmatmul.f32.vlgmr.msra.gmra.mxu0 %v2569_v31 }
  0x93   : > { %1462 = vmatmul.f32.gmra.mxu0 %v2589_v37 }
  0x9b   : > { %1465 = vmatmul.f32.gmra.mxu0 %v2606_v42 }
  0xa3   : > { %1468 = vmatmul.f32.gmra.mxu0 %v2623_v47 }
  0xa8   : > { %v239_v29 = vpop.f32.mrf.mxu0 }
  0xa9   : > { %v240_v32 = vadd.f32 %v2773_v27, %v239_v29  ;;  %v2102_v29 = vld [vmem:[%s3638_s1 + $0x240] sm:$0xff] }
  0xab   : > { %2233 = vtanh.f32 %v240_v32  ;;  %1471 = vmatmul.f32.gmra.mxu0 %v2640_v52 }
  0xaf   : > { %v484_v38 = vpop.f32.mrf.mxu2 }
  0xb0   : > { %v242_v39 = vpop.f32.mrf.mxu0  ;;  %v485_v40 = vadd.f32 %v2795_v36, %v484_v38 }
  0xb1   : > { %v2234_v41 = vpop.eup %2233  ;;  %v243_v43 = vadd.f32 %v2773_v27, %v242_v39  ;;  %v2101_v39 = vld [vmem:[%s3638_s1 + $0x238] sm:$0xff] }
  0xb2   : > { %1995 = vmatmul.msk.f32.vlgmr.msra.gmra.mxu1 %vm271_vm0, %v2234_v41  ;;  %2235 = vtanh.f32 %v485_v40  ;;  %v2100_v40 = vld [vmem:[%s3638_s1 + $0x230] sm:$0xff] }
  0xb3   : > { %2237 = vtanh.f32 %v243_v43  ;;  %1474 = vmatmul.f32.gmra.mxu0 %v2648_v54  ;;  %1199 = vmatpush.msra.mxu1 %v2109_v6 }
  0xb5   : > { %1200 = vmatpush.msra.mxu1 %v2108_v8  ;;  %v2168_v8 = vld [vmem:[%s3638_s1 + $0x360] sm:$0xff] }
  0xb7   : > { %v487_v48 = vpop.f32.mrf.mxu2  ;;  %1201 = vmatpush.msra.mxu1 %v2107_v10  ;;  %v2167_v10 = vld [vmem:[%s3638_s1 + $0x358] sm:$0xff] }
  0xb8   : > { %v2236_v49 = vpop.eup %2235  ;;  %v245_v50 = vpop.f32.mrf.mxu0  ;;  %v488_v51 = vadd.f32 %v2795_v36, %v487_v48  ;;  %v2097_v48 = vld [vmem:[%s3638_s1 + $0x218] sm:$0xff] }
  0xb9   : > { %v2238_v55 = vpop.eup %2237  ;;  %v246_v56 = vadd.f32 %v2773_v27, %v245_v50  ;;  %2026 = vmatmul.msk.f32.vlgmr.msrb.gmra.mxu2 %vm271_vm0, %v2236_v49  ;;  %1202 = vmatpush.msra.mxu1 %v2106_v18  ;;  %v2096_v49 = vld [vmem:[%s3638_s1 + $0x210] sm:$0xff]  ;;  %v2983_v18 = vld [vmem:[%s3639_s2 + $0x5] ss:$0 sm:$0xff] }
  0xba   : > { %1996 = vmatmul.msk.f32.gmra.mxu1 %vm271_vm0, %v2238_v55  ;;  %2239 = vtanh.f32 %v488_v51  ;;  %v2095_v55 = vld [vmem:[%s3638_s1 + $0x208] sm:$0xff]  ;;  %1519 = vmatpush.msrb.mxu2 %v2149_v57  ;;  %v2052_v57 = vld [vmem:[%s3640_s3 + $0x98] sm:$0xff] }
  0xbb   : > { %2241 = vtanh.f32 %v246_v56  ;;  %1203 = vmatpush.msra.mxu1 %v2105_v19  ;;  %v2094_v56 = vld [vmem:[%s3638_s1 + $0x200] sm:$0xff] }
  0xbc   : > { %1520 = vmatpush.msrb.mxu2 %v2148_v61  ;;  %v2049_v61 = vld [vmem:[%s3640_s3 + $0x80] sm:$0xff] }
  0xbd   : > { %1204 = vmatpush.msra.mxu1 %v2104_v20 }
  0xbf   : > { %v490_v63 = vpop.f32.mrf.mxu2  ;;  %1205 = vmatpush.msra.mxu1 %v2103_v28 }
  0xc0   : > { %v2240_v0 = vpop.eup %2239  ;;  %v248_v1 = vpop.f32.mrf.mxu0  ;;  %v491_v2 = vadd.f32 %v2795_v36, %v490_v63  ;;  %v2147_v63 = vld [vmem:[%s3640_s3 + $0x168] sm:$0xff] }
  0xc1   : > { %v2242_v3 = vpop.eup %2241  ;;  %v249_v4 = vadd.f32 %v2773_v27, %v248_v1  ;;  %2027 = vmatmul.msk.f32.gmra.mxu2 %vm271_vm0, %v2240_v0  ;;  %1206 = vmatpush.msra.mxu1 %v2102_v29  ;;  %v2170_v0 = vld [vmem:[%s3638_s1 + $0x370] sm:$0xff]  ;;  %v2146_v1 = vld [vmem:[%s3640_s3 + $0x160] sm:$0xff] }
  0xc2   : > { %1997 = vmatmul.msk.f32.gmra.mxu1 %vm271_vm0, %v2242_v3  ;;  %2243 = vtanh.f32 %v491_v2  ;;  %v2169_v2 = vld [vmem:[%s3638_s1 + $0x368] sm:$0xff]  ;;  %1521 = vmatpush.msrb.mxu2 %v2147_v63  ;;  %v2145_v3 = vld [vmem:[%s3640_s3 + $0x158] sm:$0xff]  ;;  %v2160_v29 = vld [vmem:[%s3638_s1 + $0x320] sm:$0xff] }
  0xc3   : > { %2245 = vtanh.f32 %v249_v4  ;;  %1207 = vmatpush.msra.mxu1 %v2101_v39  ;;  %1688 = vmatpush.msrb.mxu0 %v2170_v0  ;;  %v2156_v39 = vld [vmem:[%s3638_s1 + $0x300] sm:$0xff] }
  0xc4   : > { %1522 = vmatpush.msrb.mxu2 %v2146_v1 }
  0xc5   : > { %1208 = vmatpush.msra.mxu1 %v2100_v40  ;;  %1689 = vmatpush.msrb.mxu0 %v2169_v2 }
  0xc6   : > { %1523 = vmatpush.msrb.mxu2 %v2145_v3 }
  0xc7   : > { %v493_v12 = vpop.f32.mrf.mxu2  ;;  %1690 = vmatpush.msrb.mxu0 %v2168_v8 }
  0xc8   : > { %v2244_v13 = vpop.eup %2243  ;;  %v251_v14 = vpop.f32.mrf.mxu0  ;;  %v494_v15 = vadd.f32 %v2795_v36, %v493_v12  ;;  %1524 = vmatpush.msrb.mxu2 %v2144_v7  ;;  %v2166_v12 = vld [vmem:[%s3638_s1 + $0x350] sm:$0xff] }
  0xc9   : > { %v2246_v16 = vpop.eup %2245  ;;  %v252_v17 = vadd.f32 %v2773_v27, %v251_v14  ;;  %2028 = vmatmul.msk.f32.vlgmr.msra.gmra.mxu3 %vm271_vm0, %v2244_v13  ;;  %1691 = vmatpush.msrb.mxu0 %v2167_v10 }
  0xca   : > { %1998 = vmatmul.msk.f32.gmra.mxu1 %vm271_vm0, %v2246_v16  ;;  %2247 = vtanh.f32 %v494_v15  ;;  %1525 = vmatpush.msrb.mxu2 %v2143_v9  ;;  %v2165_v16 = vld [vmem:[%s3638_s1 + $0x348] sm:$0xff] }
  0xcb   : > { %2249 = vtanh.f32 %v252_v17  ;;  %1692 = vmatpush.msrb.mxu0 %v2166_v12  ;;  %v2164_v17 = vld [vmem:[%s3638_s1 + $0x340] sm:$0xff] }
  0xcc   : > { %1526 = vmatpush.msrb.mxu2 %v2142_v11 }
  0xcd   : > { %1693 = vmatpush.msrb.mxu0 %v2165_v16 }
  0xcf   : > { %v496_v21 = vpop.f32.mrf.mxu2  ;;  %1694 = vmatpush.msrb.mxu0 %v2164_v17 }
  0xd0   : > { %v2248_v22 = vpop.eup %2247  ;;  %v254_v23 = vpop.f32.mrf.mxu0  ;;  %v497_v24 = vadd.f32 %v2795_v36, %v496_v21 }
  0xd1   : > { %v2250_v25 = vpop.eup %2249  ;;  %v255_v26 = vadd.f32 %v2773_v27, %v254_v23  ;;  %2029 = vmatmul.msk.f32.gmra.mxu3 %vm271_vm0, %v2248_v22  ;;  %v2163_v22 = vld [vmem:[%s3638_s1 + $0x338] sm:$0xff]  ;;  %v2162_v23 = vld [vmem:[%s3638_s1 + $0x330] sm:$0xff] }
  0xd2   : > { %1999 = vmatmul.msk.f32.gmra.mxu1 %vm271_vm0, %v2250_v25  ;;  %2251 = vtanh.f32 %v497_v24  ;;  %1695 = vmatpush.msrb.mxu0 %v2163_v22  ;;  %v2161_v25 = vld [vmem:[%s3638_s1 + $0x328] sm:$0xff] }
  0xd3   : > { %2253 = vtanh.f32 %v255_v26 }
  0xd4   : > { %1696 = vmatpush.msrb.mxu0 %v2162_v23 }
  0xd6   : > { %1697 = vmatpush.msrb.mxu0 %v2161_v25 }
  0xd7   : > { %v499_v27 = vpop.f32.mrf.mxu2 }
  0xd8   : > { %v2252_v32 = vpop.eup %2251  ;;  %v500_v33 = vadd.f32 %v2795_v36, %v499_v27  ;;  %v972_v34 = vpop.f32.mrf.mxu0  ;;  %v2099_v36 = vld [vmem:[%s3638_s1 + $0x228] sm:$0xff]  ;;  %1698 = vmatpush.msrb.mxu0 %v2160_v29 }
  0xd9   : > { %v2254_v35 = vpop.eup %2253  ;;  %2030 = vmatmul.msk.f32.gmra.mxu3 %vm271_vm0, %v2252_v32  ;;  %v973_v38 = vadd.f32 %v2886_v30, %v972_v34  ;;  %1209 = vmatpush.msra.mxu1 %v2099_v36  ;;  %v2158_v32 = vld [vmem:[%s3638_s1 + $0x310] sm:$0xff] }
  0xda   : > { %2000 = vmatmul.msk.f32.gmra.mxu1 %vm271_vm0, %v2254_v35  ;;  %2255 = vtanh.f32 %v500_v33  ;;  %v2157_v35 = vld [vmem:[%s3638_s1 + $0x308] sm:$0xff] }
  0xdb   : > { %2257 = vtanh.f32 %v973_v38  ;;  %1210 = vmatpush.msra.mxu1 %v2098_v46  ;;  %v2055_v46 = vld [vmem:[%s3640_s3 + $0xb0] sm:$0xff] }
  0xdd   : > { %1211 = vmatpush.msra.mxu1 %v2097_v48 }
  0xdf   : > { %1212 = vmatpush.msra.mxu1 %v2096_v49 }
  0xe0   : > { %v2256_v41 = vpop.eup %2255  ;;  %v975_v43 = vpop.f32.mrf.mxu0 }
  0xe1   : > { %v2258_v44 = vpop.eup %2257  ;;  %2031 = vmatmul.msk.f32.gmra.mxu3 %vm271_vm0, %v2256_v41  ;;  %v976_v45 = vadd.f32 %v2886_v30, %v975_v43  ;;  %1213 = vmatpush.msra.mxu1 %v2095_v55 }
  0xe2   : > { %727 = vmatmul.f32.vlgmr.msrb.gmra.mxu1 %v2569_v31  ;;  %2088 = vmatmul.msk.f32.vlgmr.msra.gmra.mxu2 %vm271_vm0, %v2258_v44 }
  0xe3   : > { %2259 = vtanh.f32 %v976_v45  ;;  %1214 = vmatpush.msra.mxu1 %v2094_v56  ;;  %v2056_v45 = vld [vmem:[%s3640_s3 + $0xb8] sm:$0xff] }
  0xe4   : > { %787 = vmatpush.msrb.mxu3 %v2056_v45 }
  0xe5   : > { %2197 = vmatpush.msrb.mxu1 %v2171_v62 }
  0xe6   : > { %788 = vmatpush.msrb.mxu3 %v2055_v46  ;;  %v2116_v46 = vld [vmem:[%s3640_s3 + $0x128] sm:$0xff] }
  0xe7   : > { %2198 = vmatpush.msrb.mxu1 %v2170_v0 }
  0xe8   : > { %v978_v50 = vpop.f32.mrf.mxu0 }
  0xe9   : > { %v2260_v51 = vpop.eup %2259  ;;  %v979_v53 = vadd.f32 %v2886_v30, %v978_v50  ;;  %2199 = vmatpush.msrb.mxu1 %v2169_v2 }
  0xea   : > { %730 = vmatmul.f32.gmra.mxu1 %v2589_v37  ;;  %2089 = vmatmul.msk.f32.gmra.mxu2 %vm271_vm0, %v2260_v51  ;;  %v2054_v51 = vld [vmem:[%s3640_s3 + $0xa8] sm:$0xff] }
  0xeb   : > { %2261 = vtanh.f32 %v979_v53  ;;  %2200 = vmatpush.msrb.mxu1 %v2168_v8  ;;  %v2053_v53 = vld [vmem:[%s3640_s3 + $0xa0] sm:$0xff]  ;;  %789 = vmatpush.msrb.mxu3 %v2054_v51 }
  0xed   : > { %2201 = vmatpush.msrb.mxu1 %v2167_v10  ;;  %790 = vmatpush.msrb.mxu3 %v2053_v53 }
  0xef   : > { %2202 = vmatpush.msrb.mxu1 %v2166_v12  ;;  %791 = vmatpush.msrb.mxu3 %v2052_v57  ;;  %v3096_v12 = vld [vmem:[%s3639_s2 + $0x2] ss:$0 sm:$0xff] }
  0xf0   : > { %v981_v58 = vpop.f32.mrf.mxu0 }
  0xf1   : > { %v2262_v59 = vpop.eup %2261  ;;  %v982_v60 = vadd.f32 %v2886_v30, %v981_v58  ;;  %2203 = vmatpush.msrb.mxu1 %v2165_v16  ;;  %v2051_v58 = vld [vmem:[%s3640_s3 + $0x90] sm:$0xff] }
  0xf2   : > { %733 = vmatmul.f32.gmra.mxu1 %v2606_v42  ;;  %2090 = vmatmul.msk.f32.gmra.mxu2 %vm271_vm0, %v2262_v59  ;;  %v2050_v59 = vld [vmem:[%s3640_s3 + $0x88] sm:$0xff] }
  0xf3   : > { %2263 = vtanh.f32 %v982_v60  ;;  %2204 = vmatpush.msrb.mxu1 %v2164_v17  ;;  %792 = vmatpush.msrb.mxu3 %v2051_v58 }
  0xf5   : > { %2205 = vmatpush.msrb.mxu1 %v2163_v22  ;;  %793 = vmatpush.msrb.mxu3 %v2050_v59  ;;  %v2115_v59 = vld [vmem:[%s3640_s3 + $0x120] sm:$0xff] }
  0xf7   : > { %2206 = vmatpush.msrb.mxu1 %v2162_v23  ;;  %794 = vmatpush.msrb.mxu3 %v2049_v61 }
  0xf8   : > { %v984_v4 = vpop.f32.mrf.mxu0 }
  0xf9   : > { %v2264_v5 = vpop.eup %2263  ;;  %v985_v6 = vadd.f32 %v2886_v30, %v984_v4  ;;  %2207 = vmatpush.msrb.mxu1 %v2161_v25 }
  0xfa   : > { %736 = vmatmul.f32.gmra.mxu1 %v2623_v47  ;;  %2091 = vmatmul.msk.f32.gmra.mxu2 %vm271_vm0, %v2264_v5 }
  0xfb   : > { %2265 = vtanh.f32 %v985_v6  ;;  %2208 = vmatpush.msrb.mxu1 %v2160_v29 }
 0x100   : > { %v987_v13 = vpop.f32.mrf.mxu0 }
 0x101   : > { %v2266_v14 = vpop.eup %2265  ;;  %v988_v15 = vadd.f32 %v2886_v30, %v987_v13  ;;  %v2159_v30 = vld [vmem:[%s3638_s1 + $0x318] sm:$0xff] }
 0x102   : > { %739 = vmatmul.f32.gmra.mxu1 %v2640_v52  ;;  %2092 = vmatmul.msk.f32.gmra.mxu2 %vm271_vm0, %v2266_v14 }
 0x103   : > { %2267 = vtanh.f32 %v988_v15  ;;  %1699 = vmatpush.msrb.mxu0 %v2159_v30  ;;  %2209 = vmatpush.msrb.mxu1 %v2159_v30 }
 0x105   : > { %1700 = vmatpush.msrb.mxu0 %v2158_v32  ;;  %2210 = vmatpush.msrb.mxu1 %v2158_v32 }
 0x107   : > { %1701 = vmatpush.msrb.mxu0 %v2157_v35  ;;  %2211 = vmatpush.msrb.mxu1 %v2157_v35 }
 0x108   : > { %v1460_v19 = vpop.f32.mrf.mxu0 }
 0x109   : > { %v2268_v20 = vpop.eup %2267  ;;  %v1461_v21 = vadd.f32 %v2983_v18, %v1460_v19  ;;  %1702 = vmatpush.msrb.mxu0 %v2156_v39  ;;  %2212 = vmatpush.msrb.mxu1 %v2156_v39  ;;  %v2118_v39 = vld [vmem:[%s3640_s3 + $0x138] sm:$0xff] }
 0x10a   : > { %742 = vmatmul.f32.gmra.mxu1 %v2648_v54  ;;  %2093 = vmatmul.msk.f32.gmra.mxu2 %vm271_vm0, %v2268_v20 }
 0x10b   : > { %2269 = vtanh.f32 %v1461_v21  ;;  %1703 = vmatmul.f32.vlgmr.msrb.gmra.mxu0 %v2569_v31  ;;  %1275 = vmatpush.msra.mxu3 %v2118_v39 }
 0x110   : > { %v1463_v24 = vpop.f32.mrf.mxu0 }
 0x111   : > { %v2270_v26 = vpop.eup %2269  ;;  %v1464_v28 = vadd.f32 %v2983_v18, %v1463_v24 }
 0x112   : > { %1215 = vmatmul.f32.vlgmr.msra.gmra.mxu1 %v2569_v31  ;;  %2150 = vmatmul.msk.f32.vlgmr.msrb.gmra.mxu2 %vm271_vm0, %v2270_v26 }
 0x113   : > { %2271 = vtanh.f32 %v1464_v28  ;;  %1706 = vmatmul.f32.gmra.mxu0 %v2589_v37 }
 0x118   : > { %v1466_v27 = vpop.f32.mrf.mxu0 }
 0x119   : > { %v2272_v33 = vpop.eup %2271  ;;  %v1467_v34 = vadd.f32 %v2983_v18, %v1466_v27 }
 0x11a   : > { %1218 = vmatmul.f32.gmra.mxu1 %v2589_v37  ;;  %2151 = vmatmul.msk.f32.gmra.mxu2 %vm271_vm0, %v2272_v33 }
 0x11b   : > { %2273 = vtanh.f32 %v1467_v34 }
 0x120   : > { %v1469_v38 = vpop.f32.mrf.mxu0 }
 0x121   : > { %v2274_v40 = vpop.eup %2273  ;;  %v1470_v36 = vadd.f32 %v2983_v18, %v1469_v38 }
 0x122   : > { %1221 = vmatmul.f32.gmra.mxu1 %v2606_v42  ;;  %2152 = vmatmul.msk.f32.gmra.mxu2 %vm271_vm0, %v2274_v40 }
 0x123   : > { %2275 = vtanh.f32 %v1470_v36 }
 0x128   : > { %v1472_v41 = vpop.f32.mrf.mxu0 }
 0x129   : > { %v2276_v43 = vpop.eup %2275  ;;  %v1473_v44 = vadd.f32 %v2983_v18, %v1472_v41 }
 0x12a   : > { %1224 = vmatmul.f32.gmra.mxu1 %v2623_v47  ;;  %2153 = vmatmul.msk.f32.gmra.mxu2 %vm271_vm0, %v2276_v43  ;;  %v2117_v43 = vld [vmem:[%s3640_s3 + $0x130] sm:$0xff] }
 0x12b   : > { %2277 = vtanh.f32 %v1473_v44  ;;  %1276 = vmatpush.msra.mxu3 %v2117_v43 }
 0x12d   : > { %1277 = vmatpush.msra.mxu3 %v2116_v46 }
 0x12f   : > { %v3032_v31 = vpop.f32.mrf.mxu1  ;;  %1278 = vmatpush.msra.mxu3 %v2115_v59 }
 0x130   : > { %v1475_v48 = vpop.f32.mrf.mxu0  ;;  %v326_v3 = vsel %vm325_vm1, %v3032_v31, -inf }
 0x131   : > { %v2278_v49 = vpop.eup %2277  ;;  %v1476_v50 = vadd.f32 %v2983_v18, %v1475_v48 }
 0x132   : > { %1227 = vmatmul.f32.gmra.mxu1 %v2640_v52  ;;  %2154 = vmatmul.msk.f32.gmra.mxu2 %vm271_vm0, %v2278_v49 }
 0x133   : > { %2279 = vtanh.f32 %v1476_v50 }
 0x137   : > { %v3043_v37 = vpop.f32.mrf.mxu1 }
 0x139   : > { %v2280_v55 = vpop.eup %2279 }
 0x13a   : > { %1230 = vmatmul.f32.gmra.mxu1 %v2648_v54  ;;  %2155 = vmatmul.msk.f32.gmra.mxu2 %vm271_vm0, %v2280_v55 }
 0x13c   : > { %v3069_v63 = vpop.f32.mrf.mxu2 }
 0x13f   : > { %v3047_v56 = vpop.f32.mrf.mxu1 }
 0x140   : > { %v328_v7 = vsel %vm325_vm1, %v3047_v56, -inf }
 0x142   : > { %1709 = vmatmul.f32.vlgmr.msrb.gmra.mxu1 %v2606_v42 }
 0x144   : > { %v3089_v10 = vpop.f32.mrf.mxu2 }
 0x145   : > { %v571_v22 = vsel %vm325_vm1, %v3089_v10, -inf }
 0x147   : > { %v3059_v60 = vpop.f32.mrf.mxu1 }
 0x148   : > { %v329_v4 = vsel %vm325_vm1, %v3059_v60, -inf }
 0x149   : > { %v335_v8 = vmax.f32 %v328_v7, %v329_v4  ;;  %v2113_v4 = vld [vmem:[%s3640_s3 + $0x110] sm:$0xff]  ;;  %v2112_v7 = vld [vmem:[%s3640_s3 + $0x108] sm:$0xff] }
 0x14a   : > { %1712 = vmatmul.f32.gmra.mxu1 %v2623_v47  ;;  %v327_v47 = vsel %vm325_vm1, %v3043_v37, -inf }
 0x14c   : > { %v3065_v42 = vpop.f32.mrf.mxu3 }
 0x14d   : > { %v572_v19 = vsel %vm325_vm1, %v3065_v42, -inf }
 0x14f   : > { %v3067_v62 = vpop.f32.mrf.mxu1 }
 0x150   : > { %v330_v1 = vsel %vm325_vm1, %v3067_v62, -inf }
 0x151   : > { %v331_v5 = vmax.f32 %v326_v3, %v330_v1 }
 0x152   : > { %1715 = vmatmul.f32.gmra.mxu1 %v2640_v52 }
 0x154   : > { %v3072_v0 = vpop.f32.mrf.mxu3 }
 0x155   : > { %v573_v21 = vsel %vm325_vm1, %v3072_v0, -inf }
 0x156   : > { %v579_v29 = vmax.f32 %v572_v19, %v573_v21 }
 0x157   : > { %v3076_v2 = vpop.f32.mrf.mxu1 }
 0x158   : > { %v332_v52 = vsel %vm325_vm1, %v3076_v2, -inf }
 0x159   : > { %v333_v6 = vmax.f32 %v327_v47, %v332_v52 }
 0x15a   : > { %1718 = vmatmul.f32.gmra.mxu1 %v2648_v54  ;;  %v570_v54 = vsel %vm325_vm1, %v3069_v63, -inf }
 0x15b   : > { %v334_v9 = vmax.f32 %v331_v5, %v333_v6 }
 0x15c   : > { %v3091_v11 = vpop.f32.mrf.mxu3 }
 0x15d   : > { %v336_v13 = vmax.f32 %v334_v9, %v335_v8  ;;  %v574_v18 = vsel %vm325_vm1, %v3091_v11, -inf }
 0x15e   : > { %v575_v23 = vmax.f32 %v570_v54, %v574_v18 }
 0x15f   : > { %v337_v14 = vrot.slane %v336_v13, 4  ;;  %v728_v15 = vpop.f32.mrf.mxu1 }
 0x160   : > { %v729_v16 = vadd.f32 %v3096_v12, %v728_v15 }
 0x161   : > { %v338_v17 = vmax.f32 %v336_v13, %v337_v14 }
 0x162   : > { %2281 = vtanh.f32 %v729_v16 }
 0x163   : > { %v339_v20 = vrot.slane %v338_v17, 2 }
 0x164   : > { %v3109_v24 = vpop.f32.mrf.mxu3 }
 0x165   : > { %v340_v25 = vmax.f32 %v338_v17, %v339_v20  ;;  %v576_v26 = vsel %vm325_vm1, %v3109_v24, -inf  ;;  %v3113_v28 = vpop.f32.mrf.mxu2  ;;  %v2111_v17 = vld [vmem:[%s3640_s3 + $0x100] sm:$0xff] }
 0x166   : > { %v577_v30 = vmax.f32 %v571_v22, %v576_v26 }
 0x167   : > { %v341_v27 = vrot.slane %v340_v25, 1  ;;  %v731_v32 = vpop.f32.mrf.mxu1 }
 0x168   : > { %v2282_v33 = vpop.eup %2281  ;;  %v578_v34 = vmax.f32 %v575_v23, %v577_v30  ;;  %v732_v35 = vadd.f32 %v3096_v12, %v731_v32 }
 0x169   : > { %v342_v38 = vmax.f32 %v340_v25, %v341_v27  ;;  %2057 = vmatmul.msk.f32.vlgmr.msrb.gmra.mxu3 %vm271_vm0, %v2282_v33 }
 0x16a   : > { %v580_v40 = vmax.f32 %v578_v34, %v579_v29  ;;  %2283 = vtanh.f32 %v732_v35 }
 0x16b   : > { %v343_v36 = vsub.f32 %v3032_v31, %v342_v38  ;;  %v344_v41 = vsub.f32 %v3043_v37, %v342_v38  ;;  %v345_v48 = vsub.f32 %v3047_v56, %v342_v38  ;;  %v346_v31 = vsub.f32 %v3059_v60, %v342_v38  ;;  %v2114_v60 = vld [vmem:[%s3640_s3 + $0x118] sm:$0xff] }
 0x16c   : > { %v581_v44 = vrot.slane %v580_v40, 4  ;;  %v347_v53 = vsub.f32 %v3067_v62, %v342_v38  ;;  %v348_v61 = vsub.f32 %v3076_v2, %v342_v38  ;;  %1279 = vmatpush.msra.mxu3 %v2114_v60  ;;  %v2429_v38 = vmov 0  }
 0x16d   : > { %v3125_v45 = vpop.f32.mrf.mxu2  ;;  %v349_v49 = vmul.f32 1.442695, %v343_v36  ;;  %v351_v37 = vmul.f32 1.442695, %v344_v41  ;;  %v353_v56 = vmul.f32 1.442695, %v345_v48  ;;  %2225 = vset.pattern.permute.xlu2 %v2429_v38  ;;  %2224 = vset.pattern.permute.xlu1 %v2429_v38 }
 0x16e   : > { %v582_v50 = vmax.f32 %v580_v40, %v581_v44  ;;  %v355_v62 = vmul.f32 1.442695, %v346_v31  ;;  %v357_v3 = vmul.f32 1.442695, %v347_v53  ;;  %v359_v5 = vmul.f32 1.442695, %v348_v61  ;;  %1280 = vmatpush.msra.mxu3 %v2113_v4  ;;  %2223 = vset.pattern.permute.xlu0 %v2429_v38 }
 0x16f   : > { %v734_v51 = vpop.f32.mrf.mxu1  ;;  %2285 = vpow2.f32 %v349_v49 }
 0x170   : > { %v2284_v55 = vpop.eup %2283  ;;  %v583_v57 = vrot.slane %v582_v50, 2  ;;  %v735_v58 = vadd.f32 %v3096_v12, %v734_v51  ;;  %1281 = vmatpush.msra.mxu3 %v2112_v7  ;;  %v1058_v7 = vsel %vm325_vm1, %v3113_v28, -inf }
 0x171   : > { %2058 = vmatmul.msk.f32.gmra.mxu3 %vm271_vm0, %v2284_v55 }
 0x172   : > { %v584_v1 = vmax.f32 %v582_v50, %v583_v57  ;;  %2287 = vtanh.f32 %v735_v58  ;;  %1282 = vmatpush.msra.mxu3 %v2111_v17 }
 0x173   : > { %2289 = vpow2.f32 %v351_v37 }
 0x174   : > { %v585_v47 = vrot.slane %v584_v1, 1  ;;  %2291 = vpow2.f32 %v353_v56 }
 0x175   : > { %v3145_v52 = vpop.f32.mrf.mxu2  ;;  %v3147_v2 = vpop.eup %2285  ;;  %2293 = vpow2.f32 %v355_v62 }
 0x176   : > { %v586_v6 = vmax.f32 %v584_v1, %v585_v47  ;;  %2295 = vpow2.f32 %v357_v3 }
 0x177   : > { %v737_v8 = vpop.f32.mrf.mxu1  ;;  %2297 = vpow2.f32 %v359_v5 }
 0x178   : > { %v2288_v9 = vpop.eup %2287  ;;  %v587_v13 = vsub.f32 %v3069_v63, %v586_v6  ;;  %v588_v14 = vsub.f32 %v3089_v10, %v586_v6  ;;  %v589_v15 = vsub.f32 %v3065_v42, %v586_v6  ;;  %v590_v16 = vsub.f32 %v3072_v0, %v586_v6 }
 0x179   : > { %v3159_v54 = vpop.eup %2289  ;;  %v591_v18 = vsub.f32 %v3091_v11, %v586_v6  ;;  %v592_v19 = vsub.f32 %v3109_v24, %v586_v6  ;;  %v738_v20 = vadd.f32 %v3096_v12, %v737_v8  ;;  %2059 = vmatmul.msk.f32.gmra.mxu3 %vm271_vm0, %v2288_v9  ;;  %v361_v42 = vsel %vm325_vm1, %v3147_v2, 0.0 }
 0x17a   : > { %v593_v63 = vmul.f32 1.442695, %v587_v13  ;;  %v595_v0 = vmul.f32 1.442695, %v588_v14  ;;  %v597_v10 = vmul.f32 1.442695, %v589_v15  ;;  %v3167_v21 = vpop.eup %2291 }
 0x17b   : > { %v599_v22 = vmul.f32 1.442695, %v590_v16  ;;  %2299 = vtanh.f32 %v738_v20  ;;  %v3169_v23 = vpop.eup %2293  ;;  %v601_v11 = vmul.f32 1.442695, %v591_v18  ;;  %v362_v24 = vsel %vm325_vm1, %v3159_v54, 0.0 }
 0x17c   : > { %2301 = vpow2.f32 %v593_v63  ;;  %v3173_v25 = vpop.eup %2295  ;;  %v603_v26 = vmul.f32 1.442695, %v592_v19  ;;  %v363_v30 = vadd.f32 %v362_v24, %v361_v42  ;;  %v364_v27 = vsel %vm325_vm1, %v3167_v21, 0.0  ;;  %v3230_v16 = vld [vmem:[%s3639_s2 + $0x4] ss:$0 sm:$0xff] }
 0x17d   : > { %2303 = vpow2.f32 %v595_v0  ;;  %v3175_v29 = vpop.f32.mrf.mxu2  ;;  %v3179_v34 = vpop.eup %2297  ;;  %v366_v39 = vsel %vm325_vm1, %v3169_v23, 0.0  ;;  %v368_v43 = vsel %vm325_vm1, %v3173_v25, 0.0  ;;  %v1059_v14 = vsel %vm325_vm1, %v3125_v45, -inf }
 0x17e   : > { %2305 = vpow2.f32 %v597_v10  ;;  %v365_v33 = vadd.f32 %v364_v27, %v363_v30  ;;  %v370_v50 = vsel %vm325_vm1, %v3179_v34, 0.0  ;;  %v1061_v15 = vsel %vm325_vm1, %v3175_v29, -inf }
 0x17f   : > { %2307 = vpow2.f32 %v599_v22  ;;  %v740_v32 = vpop.f32.mrf.mxu1 }
 0x180   : > { %2309 = vpow2.f32 %v601_v11  ;;  %v741_v35 = vadd.f32 %v3096_v12, %v740_v32  ;;  %v367_v36 = vadd.f32 %v366_v39, %v365_v33 }
 0x181   : > { %v2300_v40 = vpop.eup %2299  ;;  %2311 = vpow2.f32 %v603_v26 }
 0x182   : > { %v3184_v41 = vpop.eup %2301  ;;  %2313 = vtanh.f32 %v741_v35  ;;  %2060 = vmatmul.msk.f32.gmra.mxu3 %vm271_vm0, %v2300_v40  ;;  %v369_v48 = vadd.f32 %v368_v43, %v367_v36 }
 0x183   : > { %v3189_v44 = vpop.eup %2303  ;;  %v605_v46 = vsel %vm325_vm1, %v3184_v41, 0.0 }
 0x184   : > { %v3193_v49 = vpop.eup %2305  ;;  %v606_v31 = vsel %vm325_vm1, %v3189_v44, 0.0  ;;  %v371_v57 = vadd.f32 %v370_v50, %v369_v48 }
 0x185   : > { %v3199_v51 = vpop.eup %2307  ;;  %v607_v53 = vadd.f32 %v606_v31, %v605_v46  ;;  %v608_v37 = vsel %vm325_vm1, %v3193_v49, 0.0  ;;  %v3203_v55 = vpop.f32.mrf.mxu2 }
 0x186   : > { %v3205_v58 = vpop.eup %2309  ;;  %v610_v59 = vsel %vm325_vm1, %v3199_v51, 0.0  ;;  %v372_v60 = vrot.slane %v371_v57, 4  ;;  %v1062_v8 = vsel %vm325_vm1, %v3203_v55, -inf }
 0x187   : > { %v3209_v56 = vpop.eup %2311  ;;  %v609_v61 = vadd.f32 %v608_v37, %v607_v53  ;;  %v743_v1 = vpop.f32.mrf.mxu1  ;;  %v612_v3 = vsel %vm325_vm1, %v3205_v58, 0.0  ;;  %v1063_v18 = vmax.f32 %v1058_v7, %v1062_v8 }
 0x188   : > { %v2314_v62 = vpop.eup %2313  ;;  %v744_v47 = vadd.f32 %v3096_v12, %v743_v1  ;;  %v373_v5 = vadd.f32 %v372_v60, %v371_v57  ;;  %v614_v6 = vsel %vm325_vm1, %v3209_v56, 0.0  ;;  %v1060_v12 = vsel %vm325_vm1, %v3145_v52, -inf  ;;  %v2180_v57 = vld [vmem:[%s3640_s3 + $0x1b8] sm:$0xff]  ;;  %v2179_v1 = vld [vmem:[%s3640_s3 + $0x1b0] sm:$0xff] }
 0x189   : > { %v611_v4 = vadd.f32 %v610_v59, %v609_v61  ;;  %v1067_v0 = vmax.f32 %v1060_v12, %v1061_v15  ;;  %1763 = vmatpush.msrb.mxu3 %v2180_v57 }
 0x18a   : > { %2315 = vtanh.f32 %v744_v47  ;;  %2061 = vmatmul.msk.f32.gmra.mxu3 %vm271_vm0, %v2314_v62  ;;  %v374_v13 = vrot.slane %v373_v5, 2 }
 0x18b   : > { %v613_v9 = vadd.f32 %v612_v3, %v611_v4  ;;  %1764 = vmatpush.msrb.mxu3 %v2179_v1 }
 0x18c   : > { %v375_v20 = vadd.f32 %v374_v13, %v373_v5 }
 0x18d   : > { %v615_v17 = vadd.f32 %v614_v6, %v613_v9  ;;  %v3232_v19 = vpop.f32.mrf.mxu2 }
 0x18e   : > { %v1064_v42 = vsel %vm325_vm1, %v3232_v19, -inf  ;;  %v376_v11 = vrot.slane %v375_v20, 1 }
 0x18f   : > { %v616_v63 = vrot.slane %v615_v17, 4  ;;  %v1216_v10 = vpop.f32.mrf.mxu1  ;;  %v1065_v22 = vmax.f32 %v1059_v14, %v1064_v42 }
 0x190   : > { %v2316_v24 = vpop.eup %2315  ;;  %v1217_v26 = vadd.f32 %v3230_v16, %v1216_v10  ;;  %v377_v32 = vadd.f32 %v376_v11, %v375_v20 }
 0x191   : > { %v617_v30 = vadd.f32 %v616_v63, %v615_v17  ;;  %v1066_v27 = vmax.f32 %v1063_v18, %v1065_v22 }
 0x192   : > { %2317 = vtanh.f32 %v1217_v26  ;;  %2062 = vmatmul.msk.f32.gmra.mxu3 %vm271_vm0, %v2316_v24  ;;  %v387_v62 = vand.u32 2147483647, %v377_v32  ;;  %v389_v3 = vand.u32 2147483648, %v377_v32  ;;  %vm383_vm3 = vweird.f32 %v377_v32  ;;  %v2177_v26 = vld [vmem:[%s3640_s3 + $0x1a0] sm:$0xff] }
 0x193   : > { %v618_v33 = vrot.slane %v617_v30, 2  ;;  %v1068_v35 = vmax.f32 %v1066_v27, %v1067_v0  ;;  %2319 = vrcp.f32 %v377_v32 }
 0x194   : > { %vm388_vm4 = vcmp.eq.f32.partialorder %v387_v62, 8.507059e+37  ;;  %v390_v14 = vor.u32 1.1754944e-38, %v389_v3  ;;  %v2174_v3 = vld [vmem:[%s3640_s3 + $0x188] sm:$0xff] }
 0x195   : > { %v619_v38 = vadd.f32 %v618_v33, %v617_v30  ;;  %v1069_v39 = vrot.slane %v1068_v35, 4  ;;  %v3238_v40 = vpop.f32.mrf.mxu2 }
 0x197   : > { %v620_v36 = vrot.slane %v619_v38, 1  ;;  %v1070_v43 = vmax.f32 %v1068_v35, %v1069_v39  ;;  %v1219_v46 = vpop.f32.mrf.mxu1 }
 0x198   : > { %v2318_v48 = vpop.eup %2317  ;;  %v1220_v50 = vadd.f32 %v3230_v16, %v1219_v46 }
 0x199   : > { %v2320_v31 = vpop.eup %2319  ;;  %v1071_v53 = vrot.slane %v1070_v43, 2  ;;  %v3241_v37 = vadd.f32 %v620_v36, %v619_v38  ;;  %v2176_v38 = vld [vmem:[%s3640_s3 + $0x198] sm:$0xff]  ;;  %v2175_v36 = vld [vmem:[%s3640_s3 + $0x190] sm:$0xff] }
 0x19a   : > { %2321 = vtanh.f32 %v1220_v50  ;;  %2119 = vmatmul.msk.f32.vlgmr.msra.gmra.mxu3 %vm271_vm0, %v2318_v48  ;;  %v379_v59 = vmul.f32 %v2320_v31, %v377_v32  ;;  %vm384_vm2 = vweird.f32 %v2320_v31 }
 0x19b   : > { %v1072_v61 = vmax.f32 %v1070_v43, %v1071_v53  ;;  %2323 = vrcp.f32 %v3241_v37  ;;  %vm385_vm5 = vmor %vm383_vm3, %vm384_vm2  ;;  %v631_v33 = vand.u32 2147483647, %v3241_v37  ;;  %v633_v35 = vand.u32 2147483648, %v3241_v37 }
 0x19c   : > { %v380_v60 = vsub.f32 1.0, %v379_v59  ;;  %vm627_vm6 = vweird.f32 %v3241_v37 }
 0x19d   : > { %v1073_v47 = vrot.slane %v1072_v61, 1  ;;  %v3250_v4 = vpop.f32.mrf.mxu2  ;;  %vm3300_vm9 = vcmp.eq.f32.partialorder %v631_v33, 8.507059e+37  ;;  %v634_v57 = vor.u32 1.1754944e-38, %v633_v35 }
 0x19e   : > { %v381_v5 = vmul.f32 %v2320_v31, %v380_v60 }
 0x19f   : > { %v1074_v6 = vmax.f32 %v1072_v61, %v1073_v47  ;;  %v1222_v7 = vpop.f32.mrf.mxu1 }
 0x1a0   : > { %v2322_v8 = vpop.eup %2321  ;;  %v1223_v9 = vadd.f32 %v3230_v16, %v1222_v7  ;;  %v382_v13 = vadd.f32 %v2320_v31, %v381_v5 }
 0x1a1   : > { %v1075_v12 = vsub.f32 %v3113_v28, %v1074_v6  ;;  %v1076_v15 = vsub.f32 %v3125_v45, %v1074_v6  ;;  %v1077_v17 = vsub.f32 %v3145_v52, %v1074_v6  ;;  %v1078_v18 = vsub.f32 %v3175_v29, %v1074_v6  ;;  %v3261_v28 = vpop.eup %2323 }
 0x1a2   : > { %v1079_v20 = vsub.f32 %v3203_v55, %v1074_v6  ;;  %v1080_v42 = vsub.f32 %v3232_v19, %v1074_v6  ;;  %2325 = vtanh.f32 %v1223_v9  ;;  %v386_v63 = vsel %vm385_vm5, %v2320_v31, %v382_v13  ;;  %2120 = vmatmul.msk.f32.gmra.mxu3 %vm271_vm0, %v2322_v8  ;;  %v2178_v19 = vld [vmem:[%s3640_s3 + $0x1a8] sm:$0xff] }
 0x1a3   : > { %v1081_v0 = vmul.f32 1.442695, %v1075_v12  ;;  %v1083_v10 = vmul.f32 1.442695, %v1076_v15  ;;  %v1085_v22 = vmul.f32 1.442695, %v1077_v17  ;;  %v391_v11 = vsel %vm388_vm4, %v390_v14, %v386_v63  ;;  %1765 = vmatpush.msrb.mxu3 %v2178_v19 }
 0x1a4   : > { %v1087_v45 = vmul.f32 1.442695, %v1078_v18  ;;  %v396_v52 = vmul.f32 %v3173_v25, %v391_v11  ;;  %v1089_v29 = vmul.f32 1.442695, %v1079_v20  ;;  %v394_v24 = vmul.f32 %v3167_v21, %v391_v11  ;;  %v2173_v15 = vld [vmem:[%s3640_s3 + $0x180] sm:$0xff] }
 0x1a5   : > { %2327 = vpow2.f32 %v1081_v0  ;;  %v392_v55 = vmul.f32 %v3147_v2, %v391_v11  ;;  %v3272_v30 = vpop.f32.mrf.mxu2  ;;  %v1091_v27 = vmul.f32 1.442695, %v1080_v42  ;;  %v623_v2 = vmul.f32 %v3261_v28, %v3241_v37  ;;  %1766 = vmatpush.msrb.mxu3 %v2177_v26 }
 0x1a6   : > { %2329 = vpow2.f32 %v1083_v10  ;;  %420 = vperm.xlu2 %2225, %v396_v52   ;;  %410 = vperm.xlu1 %2224, %v394_v24   ;;  %vm628_vm7 = vweird.f32 %v3261_v28  ;;  %v397_v31 = vmul.f32 %v3179_v34, %v391_v11  ;;  %v395_v1 = vmul.f32 %v3169_v23, %v391_v11  ;;  %v1704_v24 = vpop.f32.mrf.mxu0 }
 0x1a7   : > { %2331 = vpow2.f32 %v1085_v22  ;;  %400 = vperm.xlu0 %2223, %v392_v55   ;;  %v1225_v21 = vpop.f32.mrf.mxu1  ;;  %v624_v39 = vsub.f32 1.0, %v623_v2  ;;  %1767 = vmatpush.msrb.mxu3 %v2176_v38  ;;  %vm3296_vm8 = vmor %vm627_vm6, %vm628_vm7  ;;  %v393_v60 = vmul.f32 %v3159_v54, %v391_v11  ;;  %v1546_v55 = vsel %vm325_vm1, %v3238_v40, -inf }
 0x1a8   : > { %v2326_v25 = vpop.eup %2325  ;;  %2333 = vpow2.f32 %v1087_v45  ;;  %v1226_v32 = vadd.f32 %v3230_v16, %v1225_v21  ;;  %v1547_v2 = vsel %vm325_vm1, %v3250_v4, -inf }
 0x1a9   : > { %2335 = vpow2.f32 %v1089_v29  ;;  %v625_v46 = vmul.f32 %v3261_v28, %v624_v39  ;;  %1768 = vmatpush.msrb.mxu3 %v2175_v36 }
 0x1aa   : > { %2337 = vpow2.f32 %v1091_v27  ;;  %2121 = vmatmul.msk.f32.gmra.mxu3 %vm271_vm0, %v2326_v25  ;;  %v1548_v25 = vsel %vm325_vm1, %v3272_v30, -inf }
 0x1ab   : > { %v3288_v43 = vpop.eup %2327  ;;  %2339 = vtanh.f32 %v1226_v32  ;;  %v626_v34 = vadd.f32 %v3261_v28, %v625_v46  ;;  %1769 = vmatpush.msrb.mxu3 %v2174_v3 }
 0x1ac   : > { %v3291_v48 = vpop.eup %2329  ;;  %v1093_v50 = vsel %vm325_vm1, %v3288_v43, 0.0 }
 0x1ad   : > { %v3304_v59 = vpop.eup %2331  ;;  %v1094_v61 = vsel %vm325_vm1, %v3291_v48, 0.0  ;;  %v3311_v62 = vpop.f32.mrf.mxu2  ;;  %v630_v8 = vsel %vm3296_vm8, %v3261_v28, %v626_v34  ;;  %1770 = vmatpush.msrb.mxu3 %v2173_v15 }
 0x1ae   : > { %v3316_v47 = vpop.eup %2333  ;;  %v1095_v5 = vadd.f32 %v1094_v61, %v1093_v50  ;;  %v1096_v6 = vsel %vm325_vm1, %v3304_v59, 0.0  ;;  %425 = vperm.xlu2 %2225, %v397_v31   ;;  %415 = vperm.xlu1 %2224, %v395_v1   ;;  %v635_v12 = vsel %vm3300_vm9, %v634_v57, %v630_v8  ;;  %v1549_v32 = vsel %vm325_vm1, %v3311_v62, -inf  ;;  %v1707_v53 = vpop.f32.mrf.mxu0 }
 0x1af   : > { %v3320_v7 = vpop.eup %2335  ;;  %v1098_v54 = vsel %vm325_vm1, %v3316_v47, 0.0  ;;  %405 = vperm.xlu0 %2223, %v393_v60   ;;  %v1228_v23 = vpop.f32.mrf.mxu1  ;;  %v638_v42 = vmul.f32 %v3193_v49, %v635_v12  ;;  %v636_v0 = vmul.f32 %v3184_v41, %v635_v12  ;;  %v637_v10 = vmul.f32 %v3189_v44, %v635_v12  ;;  %v3351_v41 = vld [vmem:[%s3639_s2 + $0x6] ss:$0 sm:$0xff] }
 0x1b0   : > { %v3327_v9 = vpop.eup %2337  ;;  %v1097_v13 = vadd.f32 %v1096_v6, %v1095_v5  ;;  %v1229_v14 = vadd.f32 %v3230_v16, %v1228_v23  ;;  %v1100_v18 = vsel %vm325_vm1, %v3320_v7, 0.0  ;;  %v641_v26 = vmul.f32 %v3209_v56, %v635_v12 }
 0x1b1   : > { %v2340_v17 = vpop.eup %2339  ;;  %v1102_v63 = vsel %vm325_vm1, %v3327_v9, 0.0  ;;  %v640_v27 = vmul.f32 %v3205_v58, %v635_v12  ;;  %v1705_v33 = vadd.f32 %v3351_v41, %v1704_v24  ;;  %v1555_v58 = vmax.f32 %v1548_v25, %v1549_v32 }
 0x1b2   : > { %v1099_v20 = vadd.f32 %v1098_v54, %v1097_v13  ;;  %2341 = vtanh.f32 %v1229_v14  ;;  %2122 = vmatmul.msk.f32.gmra.mxu3 %vm271_vm0, %v2340_v17  ;;  %v1708_v61 = vadd.f32 %v3351_v41, %v1707_v53 }
 0x1b4   : > { %v1101_v22 = vadd.f32 %v1100_v18, %v1099_v20 }
 0x1b5   : > { %v3343_v11 = vpop.f32.mrf.mxu2 }
 0x1b6   : > { %v1103_v28 = vadd.f32 %v1102_v63, %v1101_v22  ;;  %654 = vperm.xlu2 %2225, %v638_v42   ;;  %649 = vperm.xlu1 %2224, %v637_v10   ;;  %v1550_v19 = vsel %vm325_vm1, %v3343_v11, -inf }
 0x1b7   : > { %644 = vperm.xlu0 %2223, %v636_v0   ;;  %v1231_v45 = vpop.f32.mrf.mxu1  ;;  %v1551_v35 = vmax.f32 %v1546_v55, %v1550_v19 }
 0x1b8   : > { %v2342_v52 = vpop.eup %2341  ;;  %v1104_v29 = vrot.slane %v1103_v28, 4  ;;  %v1232_v49 = vadd.f32 %v3230_v16, %v1231_v45  ;;  %v639_v16 = vmul.f32 %v3199_v51, %v635_v12 }
 0x1ba   : > { %v1105_v44 = vadd.f32 %v1104_v29, %v1103_v28  ;;  %2343 = vtanh.f32 %v1232_v49  ;;  %2123 = vmatmul.msk.f32.gmra.mxu3 %vm271_vm0, %v2342_v52 }
 0x1bb   : > { %2345 = vtanh.f32 %v1705_v33 }
 0x1bc   : > { %v1106_v21 = vrot.slane %v1105_v44, 2 }
 0x1bd   : > { %v3366_v38 = vpop.f32.mrf.mxu2 }
 0x1be   : > { %v1107_v56 = vadd.f32 %v1106_v21, %v1105_v44  ;;  %v1552_v51 = vsel %vm325_vm1, %v3366_v38, -inf  ;;  %669 = vperm.xlu2 %2225, %v641_v26   ;;  %664 = vperm.xlu1 %2224, %v640_v27  }
 0x1bf   : > { %659 = vperm.xlu0 %2223, %v639_v16   ;;  %v1553_v39 = vmax.f32 %v1547_v2, %v1552_v51  ;;  %v1710_v57 = vpop.f32.mrf.mxu1 }
 0x1c0   : > { %v2344_v36 = vpop.eup %2343  ;;  %v1108_v46 = vrot.slane %v1107_v56, 1  ;;  %v1711_v23 = vadd.f32 %v3351_v41, %v1710_v57 }
 0x1c1   : > { %v1554_v50 = vmax.f32 %v1551_v35, %v1553_v39  ;;  %v2346_v60 = vpop.eup %2345 }
 0x1c2   : > { %v1109_v31 = vadd.f32 %v1108_v46, %v1107_v56  ;;  %2124 = vmatmul.msk.f32.gmra.mxu3 %vm271_vm0, %v2344_v36 }
 0x1c3   : > { %v1556_v37 = vmax.f32 %v1554_v50, %v1555_v58 }
 0x1c4   : > { %2347 = vrcp.f32 %v1109_v31  ;;  %v1121_v8 = vand.u32 2147483648, %v1109_v31  ;;  %vm1115_vm10 = vweird.f32 %v1109_v31  ;;  %v1119_v15 = vand.u32 2147483647, %v1109_v31 }
 0x1c5   : > { %v1557_v1 = vrot.slane %v1556_v37, 4  ;;  %2349 = vtanh.f32 %v1708_v61 }
 0x1c6   : > { %2351 = vtanh.f32 %v1711_v23  ;;  %v1122_v63 = vor.u32 1.1754944e-38, %v1121_v8  ;;  %vm1120_vm13 = vcmp.eq.f32.partialorder %v1119_v15, 8.507059e+37 }
 0x1c7   : > { %v1558_v34 = vmax.f32 %v1556_v37, %v1557_v1  ;;  %v1713_v14 = vpop.f32.mrf.mxu1 }
 0x1c8   : > { %v1714_v42 = vadd.f32 %v3351_v41, %v1713_v14 }
 0x1c9   : > { %v1559_v3 = vrot.slane %v1558_v34, 2 }
 0x1ca   : > { %v2348_v5 = vpop.eup %2347  ;;  %2181 = vmatmul.msk.f32.vlgmr.msrb.gmra.mxu3 %vm271_vm0, %v2346_v60  ;;  %2353 = vtanh.f32 %v1714_v42 }
 0x1cb   : > { %v1560_v6 = vmax.f32 %v1558_v34, %v1559_v3  ;;  %v1111_v54 = vmul.f32 %v2348_v5, %v1109_v31  ;;  %vm1116_vm11 = vweird.f32 %v2348_v5  ;;  %v2350_v17 = vpop.eup %2349 }
 0x1cc   : > { %vm1117_vm12 = vmor %vm1115_vm10, %vm1116_vm11  ;;  %v2352_v19 = vpop.eup %2351 }
 0x1cd   : > { %v1561_v13 = vrot.slane %v1560_v6, 1  ;;  %v1112_v12 = vsub.f32 1.0, %v1111_v54 }
 0x1cf   : > { %v1562_v18 = vmax.f32 %v1560_v6, %v1561_v13  ;;  %v1113_v20 = vmul.f32 %v2348_v5, %v1112_v12  ;;  %v1716_v27 = vpop.f32.mrf.mxu1 }
 0x1d0   : > { %v2354_v21 = vpop.eup %2353  ;;  %v1717_v35 = vadd.f32 %v3351_v41, %v1716_v27 }
 0x1d1   : > { %v1563_v0 = vsub.f32 %v3238_v40, %v1562_v18  ;;  %v1564_v10 = vsub.f32 %v3250_v4, %v1562_v18  ;;  %v1565_v22 = vsub.f32 %v3272_v30, %v1562_v18  ;;  %v1566_v28 = vsub.f32 %v3311_v62, %v1562_v18 }
 0x1d2   : > { %v1567_v45 = vsub.f32 %v3343_v11, %v1562_v18  ;;  %v1568_v52 = vsub.f32 %v3366_v38, %v1562_v18  ;;  %2182 = vmatmul.msk.f32.gmra.mxu3 %vm271_vm0, %v2350_v17  ;;  %v1114_v29 = vadd.f32 %v2348_v5, %v1113_v20 }
 0x1d3   : > { %v1569_v49 = vmul.f32 1.442695, %v1563_v0  ;;  %v1571_v24 = vmul.f32 1.442695, %v1564_v10  ;;  %v1573_v55 = vmul.f32 1.442695, %v1565_v22 }
 0x1d4   : > { %v1575_v44 = vmul.f32 1.442695, %v1566_v28  ;;  %v1118_v40 = vsel %vm1117_vm12, %v2348_v5, %v1114_v29  ;;  %v1577_v4 = vmul.f32 1.442695, %v1567_v45  ;;  %v1579_v62 = vmul.f32 1.442695, %v1568_v52 }
 0x1d5   : > { %2355 = vpow2.f32 %v1569_v49  ;;  %v1123_v30 = vsel %vm1120_vm13, %v1122_v63, %v1118_v40 }
 0x1d6   : > { %2357 = vpow2.f32 %v1571_v24  ;;  %v1124_v11 = vmul.f32 %v3288_v43, %v1123_v30  ;;  %v1125_v26 = vmul.f32 %v3291_v48, %v1123_v30  ;;  %v1126_v16 = vmul.f32 %v3304_v59, %v1123_v30 }
 0x1d7   : > { %2359 = vpow2.f32 %v1573_v55  ;;  %v1127_v43 = vmul.f32 %v3316_v47, %v1123_v30  ;;  %v1128_v48 = vmul.f32 %v3320_v7, %v1123_v30  ;;  %v1129_v7 = vmul.f32 %v3327_v9, %v1123_v30  ;;  %v1719_v31 = vpop.f32.mrf.mxu1 }
 0x1d8   : > { %2361 = vpow2.f32 %v1575_v44  ;;  %1132 = vperm.xlu0 %2223, %v1124_v11   ;;  %1137 = vperm.xlu1 %2224, %v1125_v26   ;;  %v1720_v57 = vadd.f32 %v3351_v41, %v1719_v31 }
 0x1d9   : > { %2363 = vpow2.f32 %v1577_v4  ;;  %1142 = vperm.xlu2 %2225, %v1126_v16  }
 0x1da   : > { %2365 = vpow2.f32 %v1579_v62  ;;  %2183 = vmatmul.msk.f32.gmra.mxu3 %vm271_vm0, %v2352_v19 }
 0x1db   : > { %v2356_v2 = vpop.eup %2355  ;;  %2367 = vtanh.f32 %v1717_v35 }
 0x1dc   : > { %v2358_v25 = vpop.eup %2357  ;;  %v1581_v32 = vsel %vm325_vm1, %v2356_v2, 0.0  ;;  %2369 = vtanh.f32 %v1720_v57 }
 0x1dd   : > { %v2360_v33 = vpop.eup %2359  ;;  %v1582_v59 = vsel %vm325_vm1, %v2358_v25, 0.0 }
 0x1de   : > { %v2362_v38 = vpop.eup %2361  ;;  %v1583_v56 = vadd.f32 %v1582_v59, %v1581_v32  ;;  %v1584_v51 = vsel %vm325_vm1, %v2360_v33, 0.0 }
 0x1df   : > { %v3392_v58 = vpop.eup %2363  ;;  %v1586_v39 = vsel %vm325_vm1, %v2362_v38, 0.0 }
 0x1e0   : > { %v3395_v36 = vpop.eup %2365  ;;  %v1585_v46 = vadd.f32 %v1584_v51, %v1583_v56  ;;  %1147 = vperm.xlu0 %2223, %v1127_v43   ;;  %1152 = vperm.xlu1 %2224, %v1128_v48   ;;  %v1588_v47 = vsel %vm325_vm1, %v3392_v58, 0.0  ;;  %v3437_v51 = vld [vmem:[%s2560_s30] sm:$0xff] }
 0x1e1   : > { %v1590_v53 = vsel %vm325_vm1, %v3395_v36, 0.0  ;;  %1157 = vperm.xlu2 %2225, %v1129_v7   ;;  %v2368_v1 = vpop.eup %2367 }
 0x1e2   : > { %v1587_v50 = vadd.f32 %v1586_v39, %v1585_v46  ;;  %2184 = vmatmul.msk.f32.gmra.mxu3 %vm271_vm0, %v2354_v21  ;;  %v2370_v6 = vpop.eup %2369  ;;  %v3441_v46 = vld [vmem:[%s2560_s30 + $0x8] sm:$0xff] }
 0x1e4   : > { %v1589_v37 = vadd.f32 %v1588_v47, %v1587_v50 }
 0x1e6   : > { %v1591_v61 = vadd.f32 %v1590_v53, %v1589_v37  ;;  %v3451_v37 = vld [vmem:[%s2560_s30 + $0x18] sm:$0xff] }
 0x1e8   : > { %v1592_v60 = vrot.slane %v1591_v61, 4 }
 0x1ea   : > { %v1593_v34 = vadd.f32 %v1592_v60, %v1591_v61  ;;  %2185 = vmatmul.msk.f32.gmra.mxu3 %vm271_vm0, %v2368_v1 }
 0x1ec   : > { %v1594_v3 = vrot.slane %v1593_v34, 2  ;;  %v3405_v9 = vpop.f32.mrf.mxu3 }
 0x1ed   : > { %v814_v44 = vsel %vm325_vm1, %v3405_v9, -inf }
 0x1ee   : > { %v1595_v5 = vadd.f32 %v1594_v3, %v1593_v34  ;;  %v3455_v34 = vld [vmem:[%s2560_s30 + $0x20] sm:$0xff] }
 0x1f0   : > { %v1596_v54 = vrot.slane %v1595_v5, 1 }
 0x1f2   : > { %v1597_v23 = vadd.f32 %v1596_v54, %v1595_v5  ;;  %2186 = vmatmul.msk.f32.gmra.mxu3 %vm271_vm0, %v2370_v6  ;;  %v3459_v5 = vld [vmem:[%s2560_s30 + $0x28] sm:$0xff]  ;;  %vm1920_vm0 = vcmask 1040384  }
 0x1f4   : > { %2371 = vrcp.f32 %v1597_v23  ;;  %v3408_v8 = vpop.f32.mrf.mxu3  ;;  %v1609_v12 = vand.u32 2147483648, %v1597_v23  ;;  %vm1603_vm14 = vweird.f32 %v1597_v23  ;;  %v1607_v17 = vand.u32 2147483647, %v1597_v23 }
 0x1f5   : > { %v815_v40 = vsel %vm325_vm1, %v3408_v8, -inf }
 0x1f6   : > { %v1610_v20 = vor.u32 1.1754944e-38, %v1609_v12  ;;  %vm1608_vm3 = vcmp.eq.f32.partialorder %v1607_v17, 8.507059e+37 }
 0x1fa   : > { %v2372_v41 = vpop.eup %2371 }
 0x1fb   : > { %v1599_v13 = vmul.f32 %v2372_v41, %v1597_v23  ;;  %vm1604_vm15 = vweird.f32 %v2372_v41 }
 0x1fc   : > { %v3410_v14 = vpop.f32.mrf.mxu3  ;;  %vm1605_vm2 = vmor %vm1603_vm14, %vm1604_vm15  ;;  %vm1922_vm15 = vcmask 1041408  }
 0x1fd   : > { %v1600_v15 = vsub.f32 1.0, %v1599_v13  ;;  %v816_v11 = vsel %vm325_vm1, %v3410_v14, -inf }
 0x1ff   : > { %v1601_v18 = vmul.f32 %v2372_v41, %v1600_v15 }
 0x200   : > { %v421_v49 = vpop.permute.xlu2 %420 }
 0x201   : > { %v1602_v42 = vadd.f32 %v2372_v41, %v1601_v18  ;;  %v432_v3 = vmul.f32 %v3455_v34, %v421_v49 }
 0x203   : > { %v1606_v63 = vsel %vm1605_vm2, %v2372_v41, %v1602_v42  ;;  %vm1924_vm2 = vcmask 1042432  }
 0x204   : > { %v1611_v0 = vsel %vm1608_vm3, %v1610_v20, %v1606_v63  ;;  %vm1926_vm3 = vcmask 1043456  }
 0x205   : > { %v3412_v10 = vpop.f32.mrf.mxu3  ;;  %v1613_v22 = vmul.f32 %v2358_v25, %v1611_v0  ;;  %v1612_v28 = vmul.f32 %v2356_v2, %v1611_v0  ;;  %v1614_v45 = vmul.f32 %v2360_v33, %v1611_v0  ;;  %v1615_v52 = vmul.f32 %v2362_v38, %v1611_v0 }
 0x206   : > { %v817_v4 = vsel %vm325_vm1, %v3412_v10, -inf  ;;  %v1616_v43 = vmul.f32 %v3392_v58, %v1611_v0  ;;  %v3434_v48 = vmul.f32 %v3395_v36, %v1611_v0  ;;  %v3445_v36 = vld [vmem:[%s2560_s30 + $0x10] sm:$0xff]  ;;  %s1994_s30 = sshll.u32 %s3647_s16, 3 }
 0x207   : > { %1625 = vperm.xlu1 %2224, %v1613_v22   ;;  %1620 = vperm.xlu0 %2223, %v1612_v28   ;;  %v823_v26 = vmax.f32 %v816_v11, %v817_v4  ;;  %s195_s25 = scalar_lea.vmem %s3641_s4, %s1994_s30 }
 0x208   : > { %v426_v33 = vpop.permute.xlu2 %425  ;;  %1640 = vperm.xlu2 %2225, %v1616_v43  }
 0x209   : > { %v433_v6 = vmul.f32 %v3459_v5, %v426_v33 }
 0x20d   : > { %v3414_v29 = vpop.f32.mrf.mxu3 }
 0x20e   : > { %v818_v24 = vsel %vm325_vm1, %v3414_v29, -inf }
 0x20f   : > { %1630 = vperm.xlu1 %2224, %v1614_v45   ;;  %1635 = vperm.xlu0 %2223, %v1615_v52   ;;  %v819_v19 = vmax.f32 %v814_v44, %v818_v24 }
 0x210   : > { %v655_v1 = vpop.permute.xlu2 %654 }
 0x211   : > { %v674_v63 = vmul.f32 %v3445_v36, %v655_v1 }
 0x215   : > { %v3418_v55 = vpop.f32.mrf.mxu3 }
 0x216   : > { %v820_v30 = vsel %vm325_vm1, %v3418_v55, -inf }
 0x217   : > { %v821_v62 = vmax.f32 %v815_v40, %v820_v30 }
 0x218   : > { %v411_v16 = vpop.permute.xlu1 %410  ;;  %v670_v40 = vpop.permute.xlu2 %669 }
 0x219   : > { %v401_v27 = vpop.permute.xlu0 %400  ;;  %v822_v21 = vmax.f32 %v819_v19, %v821_v62  ;;  %v430_v7 = vmul.f32 %v3445_v36, %v411_v16  ;;  %v677_v11 = vmul.f32 %v3459_v5, %v670_v40 }
 0x21a   : > { %v428_v39 = vmul.f32 %v3437_v51, %v401_v27 }
 0x21b   : > { %v824_v2 = vmax.f32 %v822_v21, %v823_v26 }
 0x21d   : > { %v825_v25 = vrot.slane %v824_v2, 4  ;;  %v3430_v32 = vpop.f32.mrf.mxu3 }
 0x21f   : > { %v826_v59 = vmax.f32 %v824_v2, %v825_v25 }
 0x220   : > { %v416_v38 = vpop.permute.xlu1 %415 }
 0x221   : > { %v827_v35 = vrot.slane %v826_v59, 2  ;;  %v406_v56 = vpop.permute.xlu0 %405  ;;  %v431_v57 = vmul.f32 %v3451_v37, %v416_v38 }
 0x222   : > { %v429_v58 = vmul.f32 %v3441_v46, %v406_v56 }
 0x223   : > { %v828_v47 = vmax.f32 %v826_v59, %v827_v35 }
 0x224   : > { %v434_v50 = vadd.f32 %v429_v58, %v428_v39 }
 0x225   : > { %v829_v31 = vrot.slane %v828_v47, 1  ;;  %v3448_v53 = vpop.f32.mrf.mxu3 }
 0x226   : > { %v435_v61 = vadd.f32 %v434_v50, %v430_v7 }
 0x227   : > { %v830_v60 = vmax.f32 %v828_v47, %v829_v31 }
 0x228   : > { %v436_v54 = vadd.f32 %v435_v61, %v431_v57  ;;  %v650_v17 = vpop.permute.xlu1 %649 }
 0x229   : > { %v831_v23 = vsub.f32 %v3405_v9, %v830_v60  ;;  %v832_v41 = vsub.f32 %v3408_v8, %v830_v60  ;;  %v833_v13 = vsub.f32 %v3410_v14, %v830_v60  ;;  %v834_v12 = vsub.f32 %v3412_v10, %v830_v60  ;;  %v645_v15 = vpop.permute.xlu0 %644 }
 0x22a   : > { %v835_v18 = vsub.f32 %v3414_v29, %v830_v60  ;;  %v437_v20 = vadd.f32 %v436_v54, %v432_v3  ;;  %v672_v42 = vmul.f32 %v3437_v51, %v645_v15  ;;  %v673_v9 = vmul.f32 %v3441_v46, %v650_v17 }
 0x22b   : > { %v837_v0 = vmul.f32 1.442695, %v831_v23  ;;  %v839_v22 = vmul.f32 1.442695, %v832_v41  ;;  %v841_v28 = vmul.f32 1.442695, %v833_v13  ;;  %v836_v8 = vsub.f32 %v3418_v55, %v830_v60 }
 0x22c   : > { %v843_v45 = vmul.f32 1.442695, %v834_v12  ;;  %v438_v14 = vadd.f32 %v437_v20, %v433_v6  ;;  %v678_v10 = vadd.f32 %v673_v9, %v672_v42  ;;  %v845_v29 = vmul.f32 1.442695, %v835_v18 }
 0x22d   : > { %2373 = vpow2.f32 %v837_v0  ;;  %v3471_v52 = vpop.f32.mrf.mxu3  ;;  %v847_v24 = vmul.f32 1.442695, %v836_v8 }
 0x22e   : > { %2375 = vpow2.f32 %v839_v22  ;;  %v679_v49 = vadd.f32 %v678_v10, %v674_v63  ;;  %v439_v44 = vrot.slane %v438_v14, 4  ;;  %v1302_v22 = vsel %vm325_vm1, %v3430_v32, -inf }
 0x22f   : > { %2377 = vpow2.f32 %v841_v28  ;;  %v1303_v28 = vsel %vm325_vm1, %v3448_v53, -inf }
 0x230   : > { %2379 = vpow2.f32 %v843_v45  ;;  %v665_v30 = vpop.permute.xlu1 %664  ;;  %v440_v27 = vadd.f32 %v439_v44, %v438_v14  ;;  %v1304_v44 = vsel %vm325_vm1, %v3471_v52, -inf }
 0x231   : > { %v660_v4 = vpop.permute.xlu0 %659  ;;  %2381 = vpow2.f32 %v845_v29  ;;  %v676_v55 = vmul.f32 %v3455_v34, %v665_v30 }
 0x232   : > { %v675_v19 = vmul.f32 %v3451_v37, %v660_v4  ;;  %2383 = vpow2.f32 %v847_v24  ;;  %v441_v58 = vrot.slane %v440_v27, 2 }
 0x233   : > { %v3475_v62 = vpop.eup %2373 }
 0x234   : > { %v3478_v26 = vpop.eup %2375  ;;  %v849_v16 = vsel %vm325_vm1, %v3475_v62, 0.0  ;;  %v680_v21 = vadd.f32 %v679_v49, %v675_v19  ;;  %v442_v60 = vadd.f32 %v441_v58, %v440_v27 }
 0x235   : > { %v3482_v2 = vpop.eup %2377  ;;  %v850_v25 = vsel %vm325_vm1, %v3478_v26, 0.0  ;;  %v3486_v43 = vpop.f32.mrf.mxu3 }
 0x236   : > { %v3488_v33 = vpop.eup %2379  ;;  %v851_v59 = vadd.f32 %v850_v25, %v849_v16  ;;  %v681_v35 = vadd.f32 %v680_v21, %v676_v55  ;;  %v852_v38 = vsel %vm325_vm1, %v3482_v2, 0.0  ;;  %v443_v12 = vrot.slane %v442_v60, 1 }
 0x237   : > { %v3492_v56 = vpop.eup %2381  ;;  %v854_v7 = vsel %vm325_vm1, %v3488_v33, 0.0  ;;  %v1305_v14 = vsel %vm325_vm1, %v3486_v43, -inf }
 0x238   : > { %v853_v39 = vadd.f32 %v852_v38, %v851_v59  ;;  %v682_v47 = vadd.f32 %v681_v35, %v677_v11  ;;  %v3496_v50 = vpop.eup %2383  ;;  %v856_v61 = vsel %vm325_vm1, %v3492_v56, 0.0  ;;  %v444_v42 = vadd.f32 %v443_v12, %v442_v60 }
 0x239   : > { %v858_v6 = vsel %vm325_vm1, %v3496_v50, 0.0  ;;  %v1311_v40 = vmax.f32 %v1304_v44, %v1305_v14 }
 0x23a   : > { %v855_v31 = vadd.f32 %v854_v7, %v853_v39  ;;  %v683_v57 = vrot.slane %v682_v47, 4 }
 0x23c   : > { %v857_v1 = vadd.f32 %v856_v61, %v855_v31  ;;  %v684_v3 = vadd.f32 %v683_v57, %v682_v47 }
 0x23d   : > { %v3502_v54 = vpop.f32.mrf.mxu3 }
 0x23e   : > { %v859_v23 = vadd.f32 %v858_v6, %v857_v1  ;;  %v685_v41 = vrot.slane %v684_v3, 2  ;;  %v1306_v0 = vsel %vm325_vm1, %v3502_v54, -inf }
 0x23f   : > { %v1307_v29 = vmax.f32 %v1302_v22, %v1306_v0 }
 0x240   : > { %v860_v13 = vrot.slane %v859_v23, 4  ;;  %v686_v15 = vadd.f32 %v685_v41, %v684_v3 }
 0x242   : > { %v861_v17 = vadd.f32 %v860_v13, %v859_v23  ;;  %v687_v18 = vrot.slane %v686_v15, 1 }
 0x244   : > { %v862_v20 = vrot.slane %v861_v17, 2  ;;  %v688_v63 = vadd.f32 %v687_v18, %v686_v15 }
 0x245   : > { %v1299_v9 = vpop.f32.mrf.mxu3 }
 0x246   : > { %v863_v8 = vadd.f32 %v862_v20, %v861_v17  ;;  %v3510_v45 = vsel %vm1920_vm0, %v444_v42, %v688_v63  ;;  %v1308_v10 = vsel %vm325_vm1, %v1299_v9, -inf  ;;  %vm1928_vm0 = vcmask 1044480  }
 0x247   : > { %v1309_v49 = vmax.f32 %v1303_v28, %v1308_v10 }
 0x248   : > { %v864_v24 = vrot.slane %v863_v8, 1 }
 0x249   : > { %v1310_v4 = vmax.f32 %v1307_v29, %v1309_v49 }
 0x24a   : > { %v865_v30 = vadd.f32 %v864_v24, %v863_v8 }
 0x24b   : > { %v1312_v19 = vmax.f32 %v1310_v4, %v1311_v40 }
 0x24c   : > { %2385 = vrcp.f32 %v865_v30  ;;  %v877_v58 = vand.u32 2147483648, %v865_v30  ;;  %v875_v31 = vand.u32 2147483647, %v865_v30  ;;  %vm871_vm5 = vweird.f32 %v865_v30 }
 0x24d   : > { %v1313_v55 = vrot.slane %v1312_v19, 4  ;;  %v3517_v11 = vpop.f32.mrf.mxu3 }
 0x24e   : > { %v878_v23 = vor.u32 1.1754944e-38, %v877_v58  ;;  %vm876_vm7 = vcmp.eq.f32.partialorder %v875_v31, 8.507059e+37 }
 0x24f   : > { %v1314_v16 = vmax.f32 %v1312_v19, %v1313_v55 }
 0x251   : > { %v1315_v27 = vrot.slane %v1314_v16, 2 }
 0x252   : > { %v2386_v21 = vpop.eup %2385 }
 0x253   : > { %v1316_v25 = vmax.f32 %v1314_v16, %v1315_v27  ;;  %v867_v59 = vmul.f32 %v2386_v21, %v865_v30  ;;  %vm872_vm4 = vweird.f32 %v2386_v21 }
 0x254   : > { %vm873_vm6 = vmor %vm871_vm5, %vm872_vm4  ;;  %vm1930_vm4 = vcmask 1045504   ;;  %vm1932_vm5 = vcmask 1046528  }
 0x255   : > { %v1317_v35 = vrot.slane %v1316_v25, 1  ;;  %v3519_v38 = vpop.f32.mrf.mxu3  ;;  %v868_v39 = vsub.f32 1.0, %v867_v59 }
 0x257   : > { %v1318_v47 = vmax.f32 %v1316_v25, %v1317_v35  ;;  %v869_v7 = vmul.f32 %v2386_v21, %v868_v39  ;;  %v1790_v25 = vsel %vm325_vm1, %v3517_v11, -inf  ;;  %v1791_v39 = vsel %vm325_vm1, %v3519_v38, -inf }
 0x259   : > { %v1319_v57 = vsub.f32 %v3430_v32, %v1318_v47  ;;  %v1320_v61 = vsub.f32 %v3448_v53, %v1318_v47  ;;  %v1321_v1 = vsub.f32 %v3471_v52, %v1318_v47  ;;  %v1322_v60 = vsub.f32 %v3486_v43, %v1318_v47 }
 0x25a   : > { %v1323_v3 = vsub.f32 %v3502_v54, %v1318_v47  ;;  %v870_v6 = vadd.f32 %v2386_v21, %v869_v7  ;;  %v1324_v15 = vsub.f32 %v1299_v9, %v1318_v47 }
 0x25b   : > { %v1325_v41 = vmul.f32 1.442695, %v1319_v57  ;;  %v1327_v13 = vmul.f32 1.442695, %v1320_v61  ;;  %v1329_v12 = vmul.f32 1.442695, %v1321_v1 }
 0x25c   : > { %v1331_v17 = vmul.f32 1.442695, %v1322_v60  ;;  %v874_v18 = vsel %vm873_vm6, %v2386_v21, %v870_v6  ;;  %v1333_v52 = vmul.f32 1.442695, %v1323_v3  ;;  %v1335_v42 = vmul.f32 1.442695, %v1324_v15 }
 0x25d   : > { %2387 = vpow2.f32 %v1325_v41  ;;  %v3526_v32 = vpop.f32.mrf.mxu3  ;;  %v879_v53 = vsel %vm876_vm7, %v878_v23, %v874_v18 }
 0x25e   : > { %2389 = vpow2.f32 %v1327_v13  ;;  %v882_v43 = vmul.f32 %v3482_v2, %v879_v53  ;;  %v881_v54 = vmul.f32 %v3478_v26, %v879_v53  ;;  %v880_v20 = vmul.f32 %v3475_v62, %v879_v53 }
 0x25f   : > { %2391 = vpow2.f32 %v1329_v12  ;;  %v885_v8 = vmul.f32 %v3496_v50, %v879_v53  ;;  %v884_v14 = vmul.f32 %v3492_v56, %v879_v53  ;;  %v883_v29 = vmul.f32 %v3488_v33, %v879_v53 }
 0x260   : > { %2393 = vpow2.f32 %v1331_v17  ;;  %898 = vperm.xlu2 %2225, %v882_v43   ;;  %893 = vperm.xlu1 %2224, %v881_v54   ;;  %v1792_v61 = vsel %vm325_vm1, %v3526_v32, -inf }
 0x261   : > { %888 = vperm.xlu0 %2223, %v880_v20   ;;  %2395 = vpow2.f32 %v1333_v52 }
 0x262   : > { %2397 = vpow2.f32 %v1335_v42 }
 0x263   : > { %v3531_v63 = vpop.eup %2387 }
 0x264   : > { %v3533_v0 = vpop.eup %2389  ;;  %v1337_v22 = vsel %vm325_vm1, %v3531_v63, 0.0 }
 0x265   : > { %v3537_v2 = vpop.eup %2391  ;;  %v1338_v26 = vsel %vm325_vm1, %v3533_v0, 0.0  ;;  %v3541_v62 = vpop.f32.mrf.mxu3 }
 0x266   : > { %v3543_v28 = vpop.eup %2393  ;;  %v1339_v9 = vadd.f32 %v1338_v26, %v1337_v22  ;;  %v1340_v10 = vsel %vm325_vm1, %v3537_v2, 0.0  ;;  %v1793_v58 = vsel %vm325_vm1, %v3541_v62, -inf }
 0x267   : > { %v3550_v49 = vpop.eup %2395  ;;  %v1342_v44 = vsel %vm325_vm1, %v3543_v28, 0.0  ;;  %v1799_v1 = vmax.f32 %v1792_v61, %v1793_v58 }
 0x268   : > { %v1341_v24 = vadd.f32 %v1340_v10, %v1339_v9  ;;  %913 = vperm.xlu2 %2225, %v885_v8   ;;  %908 = vperm.xlu1 %2224, %v884_v14   ;;  %v3554_v40 = vpop.eup %2397  ;;  %v1344_v56 = vsel %vm325_vm1, %v3550_v49, 0.0 }
 0x269   : > { %903 = vperm.xlu0 %2223, %v883_v29   ;;  %v1346_v30 = vsel %vm325_vm1, %v3554_v40, 0.0 }
 0x26a   : > { %v1343_v4 = vadd.f32 %v1342_v44, %v1341_v24 }
 0x26c   : > { %v1345_v50 = vadd.f32 %v1344_v56, %v1343_v4 }
 0x26d   : > { %v1784_v33 = vpop.f32.mrf.mxu3 }
 0x26e   : > { %v1347_v19 = vadd.f32 %v1346_v30, %v1345_v50  ;;  %v1794_v21 = vsel %vm325_vm1, %v1784_v33, -inf }
 0x26f   : > { %v1795_v7 = vmax.f32 %v1790_v25, %v1794_v21 }
 0x270   : > { %v1348_v55 = vrot.slane %v1347_v19, 4 }
 0x272   : > { %v1349_v16 = vadd.f32 %v1348_v55, %v1347_v19 }
 0x274   : > { %v1350_v27 = vrot.slane %v1349_v16, 2 }
 0x275   : > { %v1787_v59 = vpop.f32.mrf.mxu3 }
 0x276   : > { %v1351_v35 = vadd.f32 %v1350_v27, %v1349_v16  ;;  %v1796_v47 = vsel %vm325_vm1, %v1787_v59, -inf }
 0x277   : > { %v1797_v31 = vmax.f32 %v1791_v39, %v1796_v47 }
 0x278   : > { %v1352_v57 = vrot.slane %v1351_v35, 1 }
 0x279   : > { %v1798_v60 = vmax.f32 %v1795_v7, %v1797_v31 }
 0x27a   : > { %v1353_v3 = vadd.f32 %v1352_v57, %v1351_v35 }
 0x27b   : > { %v1800_v6 = vmax.f32 %v1798_v60, %v1799_v1 }
 0x27c   : > { %2399 = vrcp.f32 %v1353_v3  ;;  %v1365_v52 = vand.u32 2147483648, %v1353_v3  ;;  %v1363_v20 = vand.u32 2147483647, %v1353_v3  ;;  %vm1359_vm9 = vweird.f32 %v1353_v3 }
 0x27d   : > { %v1801_v23 = vrot.slane %v1800_v6, 4 }
 0x27e   : > { %v1366_v10 = vor.u32 1.1754944e-38, %v1365_v52  ;;  %vm1364_vm11 = vcmp.eq.f32.partialorder %v1363_v20, 8.507059e+37 }
 0x27f   : > { %v1802_v41 = vmax.f32 %v1800_v6, %v1801_v23 }
 0x281   : > { %v1803_v13 = vrot.slane %v1802_v41, 2 }
 0x282   : > { %v2400_v12 = vpop.eup %2399 }
 0x283   : > { %v1804_v15 = vmax.f32 %v1802_v41, %v1803_v13  ;;  %v1355_v17 = vmul.f32 %v2400_v12, %v1353_v3  ;;  %vm1360_vm8 = vweird.f32 %v2400_v12 }
 0x284   : > { %vm1361_vm10 = vmor %vm1359_vm9, %vm1360_vm8 }
 0x285   : > { %v1805_v18 = vrot.slane %v1804_v15, 1  ;;  %v1356_v53 = vsub.f32 1.0, %v1355_v17 }
 0x287   : > { %v1806_v43 = vmax.f32 %v1804_v15, %v1805_v18  ;;  %v1357_v54 = vmul.f32 %v2400_v12, %v1356_v53 }
 0x289   : > { %v1807_v42 = vsub.f32 %v3517_v11, %v1806_v43  ;;  %v1808_v22 = vsub.f32 %v3519_v38, %v1806_v43  ;;  %v1809_v26 = vsub.f32 %v3526_v32, %v1806_v43  ;;  %v1810_v9 = vsub.f32 %v3541_v62, %v1806_v43 }
 0x28a   : > { %v1811_v8 = vsub.f32 %v1784_v33, %v1806_v43  ;;  %v1358_v14 = vadd.f32 %v2400_v12, %v1357_v54  ;;  %v1812_v4 = vsub.f32 %v1787_v59, %v1806_v43 }
 0x28b   : > { %v1813_v29 = vmul.f32 1.442695, %v1807_v42  ;;  %v1815_v24 = vmul.f32 1.442695, %v1808_v22  ;;  %v1817_v44 = vmul.f32 1.442695, %v1809_v26 }
 0x28c   : > { %v1819_v56 = vmul.f32 1.442695, %v1810_v9  ;;  %v1362_v50 = vsel %vm1361_vm10, %v2400_v12, %v1358_v14  ;;  %v1821_v11 = vmul.f32 1.442695, %v1811_v8  ;;  %v1823_v33 = vmul.f32 1.442695, %v1812_v4  ;;  %v1133_v14 = vpop.permute.xlu0 %1132 }
 0x28d   : > { %2401 = vpow2.f32 %v1813_v29  ;;  %v1367_v30 = vsel %vm1364_vm11, %v1366_v10, %v1362_v50  ;;  %v1138_v10 = vpop.permute.xlu1 %1137  ;;  %v1143_v29 = vpop.permute.xlu2 %1142 }
 0x28e   : > { %2403 = vpow2.f32 %v1815_v24  ;;  %v1370_v38 = vmul.f32 %v3537_v2, %v1367_v30  ;;  %v1369_v32 = vmul.f32 %v3533_v0, %v1367_v30  ;;  %v1368_v62 = vmul.f32 %v3531_v63, %v1367_v30 }
 0x28f   : > { %2405 = vpow2.f32 %v1817_v44  ;;  %v1373_v0 = vmul.f32 %v3554_v40, %v1367_v30  ;;  %v1372_v63 = vmul.f32 %v3550_v49, %v1367_v30  ;;  %v1371_v35 = vmul.f32 %v3543_v28, %v1367_v30 }
 0x290   : > { %2407 = vpow2.f32 %v1819_v56  ;;  %1386 = vperm.xlu2 %2225, %v1370_v38   ;;  %1381 = vperm.xlu1 %2224, %v1369_v32  }
 0x291   : > { %1376 = vperm.xlu0 %2223, %v1368_v62   ;;  %2409 = vpow2.f32 %v1821_v11 }
 0x292   : > { %2411 = vpow2.f32 %v1823_v33 }
 0x293   : > { %v2402_v19 = vpop.eup %2401 }
 0x294   : > { %v2404_v55 = vpop.eup %2403  ;;  %v1825_v16 = vsel %vm325_vm1, %v2402_v19, 0.0  ;;  %v1148_v24 = vpop.permute.xlu0 %1147 }
 0x295   : > { %v2406_v27 = vpop.eup %2405  ;;  %v1826_v21 = vsel %vm325_vm1, %v2404_v55, 0.0  ;;  %v1153_v44 = vpop.permute.xlu1 %1152 }
 0x296   : > { %v2408_v2 = vpop.eup %2407  ;;  %v1827_v25 = vadd.f32 %v1826_v21, %v1825_v16  ;;  %v1828_v59 = vsel %vm325_vm1, %v2406_v27, 0.0  ;;  %v1158_v56 = vpop.permute.xlu2 %1157 }
 0x297   : > { %v2410_v39 = vpop.eup %2409  ;;  %v1830_v47 = vsel %vm325_vm1, %v2408_v2, 0.0 }
 0x298   : > { %v1829_v58 = vadd.f32 %v1828_v59, %v1827_v25  ;;  %1401 = vperm.xlu2 %2225, %v1373_v0   ;;  %1396 = vperm.xlu1 %2224, %v1372_v63   ;;  %v2412_v7 = vpop.eup %2411  ;;  %v1832_v57 = vsel %vm325_vm1, %v2410_v39, 0.0  ;;  %v1160_v25 = vmul.f32 %v3437_v51, %v1133_v14  ;;  %v1161_v0 = vmul.f32 %v3441_v46, %v1138_v10 }
 0x299   : > { %1391 = vperm.xlu0 %2223, %v1371_v35   ;;  %v1834_v40 = vsel %vm325_vm1, %v2412_v7, 0.0  ;;  %v1910_v14 = vmax.f32 %v3441_v46, %v3459_v5 }
 0x29a   : > { %v1831_v31 = vadd.f32 %v1830_v47, %v1829_v58  ;;  %v1166_v58 = vadd.f32 %v1161_v0, %v1160_v25  ;;  %v1162_v47 = vmul.f32 %v3445_v36, %v1143_v29 }
 0x29c   : > { %v1833_v61 = vadd.f32 %v1832_v57, %v1831_v31  ;;  %v1621_v4 = vpop.permute.xlu0 %1620 }
 0x29d   : > { %v1626_v50 = vpop.permute.xlu1 %1625 }
 0x29e   : > { %v1835_v1 = vadd.f32 %v1834_v40, %v1833_v61  ;;  %v3589_v30 = vpop.permute.xlu2 %1640 }
 0x2a0   : > { %v1836_v49 = vrot.slane %v1835_v1, 4 }
 0x2a2   : > { %v1837_v60 = vadd.f32 %v1836_v49, %v1835_v1  ;;  %v1167_v49 = vadd.f32 %v1166_v58, %v1162_v47  ;;  %v1652_v47 = vmul.f32 %v3455_v34, %v3589_v30 }
 0x2a4   : > { %v1838_v3 = vrot.slane %v1837_v60, 2  ;;  %v3587_v11 = vpop.permute.xlu0 %1635 }
 0x2a5   : > { %v1631_v38 = vpop.permute.xlu1 %1630 }
 0x2a6   : > { %v1839_v6 = vadd.f32 %v1838_v3, %v1837_v60  ;;  %v1163_v60 = vmul.f32 %v3451_v37, %v1148_v24 }
 0x2a8   : > { %v1840_v28 = vrot.slane %v1839_v6, 1 }
 0x2aa   : > { %v1841_v23 = vadd.f32 %v1840_v28, %v1839_v6 }
 0x2ac   : > { %2413 = vrcp.f32 %v1841_v23  ;;  %v1853_v15 = vand.u32 2147483648, %v1841_v23  ;;  %v1851_v18 = vand.u32 2147483647, %v1841_v23  ;;  %vm1847_vm13 = vweird.f32 %v1841_v23 }
 0x2ae   : > { %v1854_v52 = vor.u32 1.1754944e-38, %v1853_v15  ;;  %vm1852_vm1 = vcmp.eq.f32.partialorder %v1851_v18, 8.507059e+37  ;;  %v1164_v15 = vmul.f32 %v3455_v34, %v1153_v44 }
 0x2b2   : > { %v2414_v41 = vpop.eup %2413 }
 0x2b3   : > { %v1843_v13 = vmul.f32 %v2414_v41, %v1841_v23  ;;  %vm1848_vm12 = vweird.f32 %v2414_v41 }
 0x2b4   : > { %vm1849_vm14 = vmor %vm1847_vm13, %vm1848_vm12 }
 0x2b5   : > { %v1844_v12 = vsub.f32 1.0, %v1843_v13 }
 0x2b7   : > { %v1845_v17 = vmul.f32 %v2414_v41, %v1844_v12  ;;  %v1168_v12 = vadd.f32 %v1167_v49, %v1163_v60 }
 0x2b9   : > { %v1846_v53 = vadd.f32 %v2414_v41, %v1845_v17 }
 0x2ba   : > { %v899_v32 = vpop.permute.xlu2 %898 }
 0x2bb   : > { %v1850_v43 = vsel %vm1849_vm14, %v2414_v41, %v1846_v53 }
 0x2bc   : > { %v1855_v54 = vsel %vm1852_vm1, %v1854_v52, %v1850_v43 }
 0x2bd   : > { %v1856_v20 = vmul.f32 %v2402_v19, %v1855_v54  ;;  %v1859_v42 = vmul.f32 %v2408_v2, %v1855_v54  ;;  %v1857_v22 = vmul.f32 %v2404_v55, %v1855_v54  ;;  %v1858_v26 = vmul.f32 %v2406_v27, %v1855_v54 }
 0x2be   : > { %v1860_v9 = vmul.f32 %v2410_v39, %v1855_v54  ;;  %v1861_v8 = vmul.f32 %v2412_v7, %v1855_v54  ;;  %v918_v7 = vmul.f32 %v3445_v36, %v899_v32  ;;  %v1169_v54 = vadd.f32 %v1168_v12, %v1164_v15 }
 0x2bf   : > { %1864 = vperm.xlu2 %2225, %v1856_v20   ;;  %1879 = vperm.xlu1 %2224, %v1859_v42   ;;  %v1165_v20 = vmul.f32 %v3459_v5, %v1158_v56  ;;  %v1650_v56 = vmul.f32 %v3445_v36, %v1631_v38 }
 0x2c0   : > { %1869 = vperm.xlu0 %2223, %v1857_v22  }
 0x2c1   : > { %v1170_v29 = vadd.f32 %v1169_v54, %v1165_v20 }
 0x2c7   : > { %1874 = vperm.xlu2 %2225, %v1858_v26   ;;  %1645 = vperm.xlu1 %2224, %v3434_v48   ;;  %v914_v48 = vpop.permute.xlu2 %913  ;;  %v1649_v26 = vmul.f32 %v3441_v46, %v1626_v50  ;;  %v1912_v50 = vmax.f32 %v3445_v36, %v3451_v37 }
 0x2c8   : > { %1884 = vperm.xlu0 %2223, %v1860_v9   ;;  %v921_v52 = vmul.f32 %v3459_v5, %v914_v48  ;;  %v1648_v9 = vmul.f32 %v3437_v51, %v1621_v4 }
 0x2ca   : > { %v1654_v32 = vadd.f32 %v1649_v26, %v1648_v9 }
 0x2cf   : > { %1889 = vperm.xlu2 %2225, %v1861_v8   ;;  %v1909_v8 = vmax.f32 %v3437_v51, %v3455_v34 }
 0x2d2   : > { %v894_v33 = vpop.permute.xlu1 %893 }
 0x2d3   : > { %v889_v62 = vpop.permute.xlu0 %888  ;;  %v917_v21 = vmul.f32 %v3441_v46, %v894_v33 }
 0x2d4   : > { %v916_v2 = vmul.f32 %v3437_v51, %v889_v62  ;;  %v1911_v62 = vmax.f32 %v1909_v8, %v1910_v14 }
 0x2d6   : > { %v922_v59 = vadd.f32 %v917_v21, %v916_v2  ;;  %v1913_v2 = vmax.f32 %v1911_v62, %v1912_v50 }
 0x2d8   : > { %v923_v40 = vadd.f32 %v922_v59, %v918_v7  ;;  %v1914_v7 = vrot.slane %v1913_v2, 4 }
 0x2da   : > { %v909_v55 = vpop.permute.xlu1 %908  ;;  %v1915_v60 = vmax.f32 %v1913_v2, %v1914_v7 }
 0x2db   : > { %v904_v19 = vpop.permute.xlu0 %903  ;;  %v920_v23 = vmul.f32 %v3455_v34, %v909_v55  ;;  %v1171_v55 = vrot.slane %v1170_v29, 4 }
 0x2dc   : > { %v919_v31 = vmul.f32 %v3451_v37, %v904_v19 }
 0x2de   : > { %v924_v3 = vadd.f32 %v923_v40, %v919_v31 }
 0x2e0   : > { %v925_v17 = vadd.f32 %v924_v3, %v920_v23 }
 0x2e2   : > { %v926_v42 = vadd.f32 %v925_v17, %v921_v52 }
 0x2e4   : > { %v927_v24 = vrot.slane %v926_v42, 4 }
 0x2e6   : > { %v928_v4 = vadd.f32 %v927_v24, %v926_v42 }
 0x2e8   : > { %v929_v38 = vrot.slane %v928_v4, 2 }
 0x2ea   : > { %v1387_v16 = vpop.permute.xlu2 %1386 }
 0x2eb   : > { %v1406_v6 = vmul.f32 %v3445_v36, %v1387_v16  ;;  %v1655_v16 = vadd.f32 %v1654_v32, %v1650_v56 }
 0x2f2   : > { %v1402_v57 = vpop.permute.xlu2 %1401 }
 0x2f3   : > { %v1409_v10 = vmul.f32 %v3459_v5, %v1402_v57  ;;  %v930_v57 = vadd.f32 %v929_v38, %v928_v4 }
 0x2f5   : > { %v931_v23 = vrot.slane %v930_v57, 1 }
 0x302   : > { %v1382_v63 = vpop.permute.xlu1 %1381 }
 0x303   : > { %v1377_v27 = vpop.permute.xlu0 %1376  ;;  %v1405_v35 = vmul.f32 %v3441_v46, %v1382_v63 }
 0x304   : > { %v1404_v39 = vmul.f32 %v3437_v51, %v1377_v27  ;;  %v1651_v27 = vmul.f32 %v3451_v37, %v3587_v11 }
 0x306   : > { %v1410_v1 = vadd.f32 %v1405_v35, %v1404_v39  ;;  %v1172_v39 = vadd.f32 %v1171_v55, %v1170_v29  ;;  %v1656_v58 = vadd.f32 %v1655_v16, %v1651_v27 }
 0x308   : > { %v1411_v41 = vadd.f32 %v1410_v1, %v1406_v6  ;;  %v1657_v1 = vadd.f32 %v1656_v58, %v1652_v47 }
 0x30a   : > { %v1397_v13 = vpop.permute.xlu1 %1396 }
 0x30b   : > { %v1392_v61 = vpop.permute.xlu0 %1391  ;;  %v1408_v43 = vmul.f32 %v3455_v34, %v1397_v13 }
 0x30c   : > { %v1407_v28 = vmul.f32 %v3451_v37, %v1392_v61 }
 0x30e   : > { %v1412_v18 = vadd.f32 %v1411_v41, %v1407_v28 }
 0x310   : > { %v1413_v22 = vadd.f32 %v1412_v18, %v1408_v43 }
 0x312   : > { %v1414_v44 = vadd.f32 %v1413_v22, %v1409_v10 }
 0x314   : > { %v1415_v48 = vrot.slane %v1414_v44, 4 }
 0x316   : > { %v1416_v63 = vadd.f32 %v1415_v48, %v1414_v44 }
 0x318   : > { %v1417_v11 = vrot.slane %v1416_v63, 2 }
 0x319   : > { %v1865_v53 = vpop.permute.xlu2 %1864 }
 0x31a   : > { %v1892_v25 = vmul.f32 %v3437_v51, %v1865_v53  ;;  %v1173_v51 = vrot.slane %v1172_v39, 2  ;;  %v1418_v30 = vadd.f32 %v1417_v11, %v1416_v63  ;;  %v932_v53 = vadd.f32 %v931_v23, %v930_v57 }
 0x31c   : > { %v1174_v12 = vadd.f32 %v1173_v51, %v1172_v39  ;;  %v1419_v52 = vrot.slane %v1418_v30, 1  ;;  %v1923_v26 = vsel %vm1922_vm15, %v3510_v45, %v932_v53 }
 0x31e   : > { %v1175_v54 = vrot.slane %v1174_v12, 1  ;;  %v1420_v9 = vadd.f32 %v1419_v52, %v1418_v30 }
 0x320   : > { %v1176_v8 = vadd.f32 %v1175_v54, %v1174_v12 }
 0x321   : > { %v1875_v33 = vpop.permute.xlu2 %1874 }
 0x322   : > { %v1894_v59 = vmul.f32 %v3445_v36, %v1875_v33  ;;  %v1925_v44 = vsel %vm1924_vm2, %v1923_v26, %v1176_v8 }
 0x323   : > { %v1927_v32 = vsel %vm1926_vm3, %v1925_v44, %v1420_v9 }
 0x331   : > { %v1880_v19 = vpop.permute.xlu1 %1879 }
 0x332   : > { %v1870_v21 = vpop.permute.xlu0 %1869  ;;  %v1895_v61 = vmul.f32 %v3451_v37, %v1880_v19  ;;  %v1916_v37 = vrot.slane %v1915_v60, 2 }
 0x333   : > { %v1893_v0 = vmul.f32 %v3441_v46, %v1870_v21  ;;  %v1890_v46 = vpop.permute.xlu2 %1889 }
 0x334   : > { %v1897_v41 = vmul.f32 %v3459_v5, %v1890_v46  ;;  %v1917_v42 = vmax.f32 %v1915_v60, %v1916_v37 }
 0x335   : > { %v1898_v35 = vadd.f32 %v1893_v0, %v1892_v25 }
 0x336   : > { %v1918_v10 = vrot.slane %v1917_v42, 1 }
 0x337   : > { %v1899_v31 = vadd.f32 %v1898_v35, %v1894_v59 }
 0x338   : > { %v1919_v50 = vmax.f32 %v1917_v42, %v1918_v10 }
 0x339   : > { %v1646_v40 = vpop.permute.xlu1 %1645  ;;  %v1900_v3 = vadd.f32 %v1899_v31, %v1895_v61 }
 0x33a   : > { %v1653_v49 = vmul.f32 %v3459_v5, %v1646_v40  ;;  %v1885_v36 = vpop.permute.xlu0 %1884 }
 0x33b   : > { %v1896_v6 = vmul.f32 %v3455_v34, %v1885_v36 }
 0x33c   : > { %v1658_v28 = vadd.f32 %v1657_v1, %v1653_v49 }
 0x33d   : > { %v1901_v13 = vadd.f32 %v1900_v3, %v1896_v6 }
 0x33e   : > { %v1659_v15 = vrot.slane %v1658_v28, 4 }
 0x33f   : > { %v1902_v17 = vadd.f32 %v1901_v13, %v1897_v41 }
 0x340   : > { %v1660_v18 = vadd.f32 %v1659_v15, %v1658_v28 }
 0x341   : > { %v1903_v43 = vrot.slane %v1902_v17, 4 }
 0x342   : > { %v1661_v20 = vrot.slane %v1660_v18, 2 }
 0x343   : > { %v1904_v34 = vadd.f32 %v1903_v43, %v1902_v17 }
 0x344   : > { %v1662_v22 = vadd.f32 %v1661_v20, %v1660_v18 }
 0x345   : > { %v1905_v5 = vrot.slane %v1904_v34, 2 }
 0x346   : > { %v1663_v14 = vrot.slane %v1662_v22, 1 }
 0x347   : > { %v1906_v29 = vadd.f32 %v1905_v5, %v1904_v34 }
 0x348   : > { %v1664_v24 = vadd.f32 %v1663_v14, %v1662_v22 }
 0x349   : > { %v1907_v56 = vrot.slane %v1906_v29, 1 }
 0x34a   : > { %v1929_v62 = vsel %vm1928_vm0, %v1927_v32, %v1664_v24 }
 0x34b   : > { %v1908_v33 = vadd.f32 %v1907_v56, %v1906_v29 }
 0x34d   : > { %v1931_v45 = vsel %vm1930_vm4, %v1929_v62, %v1908_v33 }
 0x34e   : > { %v1933_v4 = vsel %vm1932_vm5, %v1931_v45, %v1919_v50 }
 0x34f   : > { %1934 = vst [vmem:[%s195_s25] sm:$0xff] %v1933_v4 }
 0x350 PF: > { %s14_s15 = sadd.s32 1, %s2427_s15  }
 0x351   : > { %p11_p4 = scmp.ge.s32.totalorder %s14_s15, 4  }
 0x353   :  { %13 = sbr.rel (!%p11_p4) target bundleno = 1 (0x1), region = 84 }

</bundles_post_ra>
